<compile_context>
chip_gen: v7x
topology: tpu7x:2x2x1
jax: 0.10.0
libtpu: 0.0.40
codegen_flags: <defaults>
</compile_context>

<pallas_src>
import functools

import jax
import jax.numpy as jnp
from jax.experimental import pallas as pl
from jax.experimental.pallas import tpu as pltpu

KSIZE = 7
PAD = 3


def spatial_attn_kernel(x_ref, w_ref, o_ref, pad_ref, sum_ref, max_ref, *, C, H, W):
    # x_ref  : (Bblk, Ct, H, W)      VMEM input block
    # w_ref  : (2*7*7,)              SMEM flattened conv weights
    # o_ref  : (Bblk, 1, H, W)       VMEM output block (revisited across channel axis)
    # pad_ref: (2, Bblk, H+6, W+6)   VMEM zero-padded [avg, max] planes
    # sum_ref/max_ref: (Bblk, H, W)  VMEM running channel-sum / channel-max
    Bblk, Ct = x_ref.shape[0], x_ref.shape[1]
    Hp, Wp = H + 2 * PAD, W + 2 * PAD
    ci = pl.program_id(1)
    n_c = pl.num_programs(1)

    @pl.when(ci == 0)
    def _init():
        sum_ref[...] = jnp.zeros_like(sum_ref)
        max_ref[...] = jnp.full(max_ref.shape, -jnp.inf, max_ref.dtype)

    # Fused single pass over this step's channels: one read of each plane feeds
    # both the running sum and the running max.
    s = sum_ref[...]
    m = max_ref[...]
    for c in range(Ct):
        xc = x_ref[:, c].astype(jnp.float32)
        s = s + xc
        m = jnp.maximum(m, xc)
    sum_ref[...] = s
    max_ref[...] = m

    @pl.when(ci == n_c - 1)
    def _finalize():
        avg = s * jnp.float32(1.0 / C)
        mx = m

        # Zero only the 3-wide border strips; the interior is fully overwritten
        # below, so no full-scratch re-zeroing is needed (and this stays correct
        # when the batch axis is megacore-partitioned).
        zrow = jnp.zeros((2, Bblk, PAD, Wp), jnp.float32)
        zcol = jnp.zeros((2, Bblk, H, PAD), jnp.float32)
        pad_ref[:, :, 0:PAD, :] = zrow
        pad_ref[:, :, PAD + H:Hp, :] = zrow
        pad_ref[:, :, PAD:PAD + H, 0:PAD] = zcol
        pad_ref[:, :, PAD:PAD + H, PAD + W:Wp] = zcol
        pad_ref[0, :, PAD:PAD + H, PAD:PAD + W] = avg
        pad_ref[1, :, PAD:PAD + H, PAD:PAD + W] = mx

        # 7x7 conv (2 in-ch -> 1 out-ch) on the VPU: 14 row-band loads, kw taps
        # as in-register lane-offset slices, 4 independent partial accumulators.
        acc = [jnp.zeros((Bblk, H, W), jnp.float32) for _ in range(4)]
        for c in range(2):
            for kh in range(KSIZE):
                band = pad_ref[c, :, kh:kh + H, :]               # (Bblk, H, Wp)
                a = 2 * c + (kh % 2)
                part = acc[a]
                for kw in range(KSIZE):
                    wv = w_ref[(c * KSIZE + kh) * KSIZE + kw]    # SMEM scalar
                    part = part + wv * band[:, :, kw:kw + W]
                acc[a] = part
        conv = (acc[0] + acc[1]) + (acc[2] + acc[3])
        o_ref[:, 0] = (jnp.tanh(conv) + 1.0).astype(o_ref.dtype)


def _largest_divisor_le(n, cap):
    cap = max(1, min(n, cap))
    for d in range(cap, 0, -1):
        if n % d == 0:
            return d
    return 1


def spatial_attention(x, w, *, b_block=None, c_block=None,
                      vmem_limit_bytes=32 * 1024 * 1024):
    """x: (B, C, H, W) float, w: (2, 7, 7) float32 -> (B, 1, H, W) in x.dtype."""
    B, C, H, W = x.shape
    assert w.shape == (2, KSIZE, KSIZE)
    w_flat = w.astype(jnp.float32).reshape(-1)   # 1-D SMEM weights

    plane_bytes = H * W * 4
    if b_block is None:        # keep the per-step spatial working set modest
        b_block = _largest_divisor_le(B, max(1, (512 * 1024) // (4 * plane_bytes)))
    if c_block is None:        # bound the input block (and channel-loop unroll)
        c_block = _largest_divisor_le(
            C, min(128, max(1, (1 << 20) // (b_block * plane_bytes))))

    kernel = functools.partial(spatial_attn_kernel, C=C, H=H, W=W)
    return pl.pallas_call(
        kernel,
        out_shape=jax.ShapeDtypeStruct((B, 1, H, W), x.dtype),
        grid_spec=pltpu.PrefetchScalarGridSpec(
            num_scalar_prefetch=0,
            grid=(B // b_block, C // c_block),
            in_specs=[
                pl.BlockSpec((b_block, c_block, H, W), lambda b, c: (b, c, 0, 0)),
                pl.BlockSpec(memory_space=pltpu.MemorySpace.SMEM),
            ],
            out_specs=pl.BlockSpec((b_block, 1, H, W), lambda b, c: (b, 0, 0, 0)),
            scratch_shapes=[
                pltpu.VMEM((2, b_block, H + 2 * PAD, W + 2 * PAD), jnp.float32),
                pltpu.VMEM((b_block, H, W), jnp.float32),   # running channel sum
                pltpu.VMEM((b_block, H, W), jnp.float32),   # running channel max
            ],
        ),
        compiler_params=pltpu.CompilerParams(
            dimension_semantics=("parallel", "arbitrary"),
            vmem_limit_bytes=vmem_limit_bytes,
        ),
    )(x, w_flat)


def reference(x, w):
    """Pure-JAX reference matching the PyTorch forward."""
    avg = jnp.mean(x, axis=1, keepdims=True)
    mx = jnp.max(x, axis=1, keepdims=True)
    out = jnp.concatenate([avg, mx], axis=1)                  # (B, 2, H, W)
    out = jax.lax.conv_general_dilated(
        out, w[None],                                         # OIHW = (1, 2, 7, 7)
        window_strides=(1, 1),
        padding=((PAD, PAD), (PAD, PAD)),
        dimension_numbers=("NCHW", "OIHW", "NCHW"),
        precision=jax.lax.Precision.HIGHEST)
    return jnp.tanh(out) + 1.0


if __name__ == "__main__":
    B, C, H, W = 2, 4, 16, 16

    key = jax.random.PRNGKey(0)
    kx, kw_key = jax.random.split(key)
    x = jax.random.normal(kx, (B, C, H, W), dtype=jnp.float32)
    # Deterministic conv weight init (shape from nn.Conv2d(2, 1, 7), bias=False).
    fan_in = 2 * KSIZE * KSIZE
    bound = 1.0 / (fan_in ** 0.5)
    w = jax.random.uniform(kw_key, (2, KSIZE, KSIZE), jnp.float32, -bound, bound)

    ref = reference(x, w)

    # Default blocking: single grid step for this small shape.
    out = jax.block_until_ready(spatial_attention(x, w))
    assert out.shape == (B, 1, H, W)
    assert jnp.allclose(out, ref, atol=1e-5, rtol=1e-5), "mismatch vs reference"

    # Forced multi-step blocking: exercises the channel-reduction accumulators
    # and the batch-parallel grid axis.
    out2 = jax.block_until_ready(spatial_attention(x, w, b_block=1, c_block=2))
    assert jnp.allclose(out2, ref, atol=1e-5, rtol=1e-5), "mismatch (blocked path)"

    print("KERNEL_OK")
</pallas_src>

<mosaic_0001>
module attributes {stable_mosaic.version = 11 : i64} {
  func.func @spatial_attn_kernel(%arg0: i32, %arg1: i32, %arg2: memref<2x4x16x16xf32, #tpu.memory_space<vmem>>, %arg3: memref<98xf32, #tpu.memory_space<smem>>, %arg4: memref<2x1x16x16xf32, #tpu.memory_space<vmem>>, %arg5: memref<2x2x22x22xf32, #tpu.memory_space<vmem>>, %arg6: memref<2x16x16xf32, #tpu.memory_space<vmem>>, %arg7: memref<2x16x16xf32, #tpu.memory_space<vmem>>) attributes {dimension_semantics = [#tpu.dimension_semantics<parallel>, #tpu.dimension_semantics<arbitrary>], iteration_bounds = array<i64: 1, 1>, scalar_prefetch = 0 : i64, scratch_operands = 3 : i64, tpu.core_type = #tpu.core_type<tc>, window_params = [{transform_indices = @transform_0, window_bounds = array<i64: 2, 4, 16, 16>}, {transform_indices = @transform_1, window_bounds = array<i64: 98>}, {transform_indices = @transform_2, window_bounds = array<i64: 2, 1, 16, 16>}]} {
    %c0_i32 = arith.constant 0 : i32
    %0 = arith.cmpi eq, %arg1, %c0_i32 : i32
    %1 = arith.extui %0 : i1 to i32
    %c0_i32_0 = arith.constant 0 : i32
    %2 = arith.cmpi ne, %1, %c0_i32_0 : i32
    scf.if %2 {
      %cst = arith.constant 0.000000e+00 : f32
      %26 = vector.broadcast %cst : f32 to vector<2x16x16xf32>
      %c0_27 = arith.constant 0 : index
      %c0_28 = arith.constant 0 : index
      %c0_29 = arith.constant 0 : index
      %27 = vector.load %arg6[%c0_27, %c0_28, %c0_29] : memref<2x16x16xf32, #tpu.memory_space<vmem>>, vector<2x16x16xf32>
      tpu.vector_store %arg6[%c0_27, %c0_28, %c0_29], %26 {strides = array<i32>} : memref<2x16x16xf32, #tpu.memory_space<vmem>>, vector<2x16x16xf32>,
      %cst_30 = arith.constant 0xFF800000 : f32
      %28 = vector.broadcast %cst_30 : f32 to vector<2x16x16xf32>
      %c0_31 = arith.constant 0 : index
      %c0_32 = arith.constant 0 : index
      %c0_33 = arith.constant 0 : index
      %29 = vector.load %arg7[%c0_31, %c0_32, %c0_33] : memref<2x16x16xf32, #tpu.memory_space<vmem>>, vector<2x16x16xf32>
      tpu.vector_store %arg7[%c0_31, %c0_32, %c0_33], %28 {strides = array<i32>} : memref<2x16x16xf32, #tpu.memory_space<vmem>>, vector<2x16x16xf32>,
    } else {
    }
    %c0 = arith.constant 0 : index
    %c0_1 = arith.constant 0 : index
    %c0_2 = arith.constant 0 : index
    %3 = vector.load %arg6[%c0, %c0_1, %c0_2] : memref<2x16x16xf32, #tpu.memory_space<vmem>>, vector<2x16x16xf32>
    %c0_3 = arith.constant 0 : index
    %c0_4 = arith.constant 0 : index
    %c0_5 = arith.constant 0 : index
    %4 = vector.load %arg7[%c0_3, %c0_4, %c0_5] : memref<2x16x16xf32, #tpu.memory_space<vmem>>, vector<2x16x16xf32>
    %c0_6 = arith.constant 0 : index
    %c0_7 = arith.constant 0 : index
    %c0_8 = arith.constant 0 : index
    %c0_9 = arith.constant 0 : index
    %5 = vector.load %arg2[%c0_6, %c0_7, %c0_8, %c0_9] : memref<2x4x16x16xf32, #tpu.memory_space<vmem>>, vector<2x1x16x16xf32>
    %6 = vector.shape_cast %5 : vector<2x1x16x16xf32> to vector<2x16x16xf32>
    %7 = arith.addf %3, %6 : vector<2x16x16xf32>
    %8 = arith.maximumf %4, %6 : vector<2x16x16xf32>
    %c0_10 = arith.constant 0 : index
    %c1 = arith.constant 1 : index
    %c0_11 = arith.constant 0 : index
    %c0_12 = arith.constant 0 : index
    %9 = vector.load %arg2[%c0_10, %c1, %c0_11, %c0_12] : memref<2x4x16x16xf32, #tpu.memory_space<vmem>>, vector<2x1x16x16xf32>
    %10 = vector.shape_cast %9 : vector<2x1x16x16xf32> to vector<2x16x16xf32>
    %11 = arith.addf %7, %10 : vector<2x16x16xf32>
    %12 = arith.maximumf %8, %10 : vector<2x16x16xf32>
    %c0_13 = arith.constant 0 : index
    %c2 = arith.constant 2 : index
    %c0_14 = arith.constant 0 : index
    %c0_15 = arith.constant 0 : index
    %13 = vector.load %arg2[%c0_13, %c2, %c0_14, %c0_15] : memref<2x4x16x16xf32, #tpu.memory_space<vmem>>, vector<2x1x16x16xf32>
    %14 = vector.shape_cast %13 : vector<2x1x16x16xf32> to vector<2x16x16xf32>
    %15 = arith.addf %11, %14 : vector<2x16x16xf32>
    %16 = arith.maximumf %12, %14 : vector<2x16x16xf32>
    %c0_16 = arith.constant 0 : index
    %c3 = arith.constant 3 : index
    %c0_17 = arith.constant 0 : index
    %c0_18 = arith.constant 0 : index
    %17 = vector.load %arg2[%c0_16, %c3, %c0_17, %c0_18] : memref<2x4x16x16xf32, #tpu.memory_space<vmem>>, vector<2x1x16x16xf32>
    %18 = vector.shape_cast %17 : vector<2x1x16x16xf32> to vector<2x16x16xf32>
    %19 = arith.addf %15, %18 : vector<2x16x16xf32>
    %20 = arith.maximumf %16, %18 : vector<2x16x16xf32>
    %c0_19 = arith.constant 0 : index
    %c0_20 = arith.constant 0 : index
    %c0_21 = arith.constant 0 : index
    %21 = vector.load %arg6[%c0_19, %c0_20, %c0_21] : memref<2x16x16xf32, #tpu.memory_space<vmem>>, vector<2x16x16xf32>
    tpu.vector_store %arg6[%c0_19, %c0_20, %c0_21], %19 {strides = array<i32>} : memref<2x16x16xf32, #tpu.memory_space<vmem>>, vector<2x16x16xf32>,
    %c0_22 = arith.constant 0 : index
    %c0_23 = arith.constant 0 : index
    %c0_24 = arith.constant 0 : index
    %22 = vector.load %arg7[%c0_22, %c0_23, %c0_24] : memref<2x16x16xf32, #tpu.memory_space<vmem>>, vector<2x16x16xf32>
    tpu.vector_store %arg7[%c0_22, %c0_23, %c0_24], %20 {strides = array<i32>} : memref<2x16x16xf32, #tpu.memory_space<vmem>>, vector<2x16x16xf32>,
    %c0_i32_25 = arith.constant 0 : i32
    %23 = arith.cmpi eq, %arg1, %c0_i32_25 : i32
    %24 = arith.extui %23 : i1 to i32
    %c0_i32_26 = arith.constant 0 : i32
    %25 = arith.cmpi ne, %24, %c0_i32_26 : i32
    scf.if %25 {
      %cst = arith.constant 2.500000e-01 : f32
      %26 = vector.broadcast %cst : f32 to vector<2x16x16xf32>
      %27 = arith.mulf %19, %26 : vector<2x16x16xf32>
      %cst_27 = arith.constant 0.000000e+00 : f32
      %28 = vector.broadcast %cst_27 : f32 to vector<2x2x3x22xf32>
      %cst_28 = arith.constant 0.000000e+00 : f32
      %29 = vector.broadcast %cst_28 : f32 to vector<2x2x16x3xf32>
      %c0_29 = arith.constant 0 : index
      %c0_30 = arith.constant 0 : index
      %c0_31 = arith.constant 0 : index
      %c0_32 = arith.constant 0 : index
      %30 = vector.load %arg5[%c0_29, %c0_30, %c0_31, %c0_32] : memref<2x2x22x22xf32, #tpu.memory_space<vmem>>, vector<2x2x3x22xf32>
      tpu.vector_store %arg5[%c0_29, %c0_30, %c0_31, %c0_32], %28 {strides = array<i32>} : memref<2x2x22x22xf32, #tpu.memory_space<vmem>>, vector<2x2x3x22xf32>,
      %c0_33 = arith.constant 0 : index
      %c0_34 = arith.constant 0 : index
      %c19 = arith.constant 19 : index
      %c0_35 = arith.constant 0 : index
      %31 = vector.load %arg5[%c0_33, %c0_34, %c19, %c0_35] : memref<2x2x22x22xf32, #tpu.memory_space<vmem>>, vector<2x2x3x22xf32>
      tpu.vector_store %arg5[%c0_33, %c0_34, %c19, %c0_35], %28 {strides = array<i32>} : memref<2x2x22x22xf32, #tpu.memory_space<vmem>>, vector<2x2x3x22xf32>,
      %c0_36 = arith.constant 0 : index
      %c0_37 = arith.constant 0 : index
      %c3_38 = arith.constant 3 : index
      %c0_39 = arith.constant 0 : index
      %32 = vector.load %arg5[%c0_36, %c0_37, %c3_38, %c0_39] : memref<2x2x22x22xf32, #tpu.memory_space<vmem>>, vector<2x2x16x3xf32>
      tpu.vector_store %arg5[%c0_36, %c0_37, %c3_38, %c0_39], %29 {strides = array<i32>} : memref<2x2x22x22xf32, #tpu.memory_space<vmem>>, vector<2x2x16x3xf32>,
      %c0_40 = arith.constant 0 : index
      %c0_41 = arith.constant 0 : index
      %c3_42 = arith.constant 3 : index
      %c19_43 = arith.constant 19 : index
      %33 = vector.load %arg5[%c0_40, %c0_41, %c3_42, %c19_43] : memref<2x2x22x22xf32, #tpu.memory_space<vmem>>, vector<2x2x16x3xf32>
      tpu.vector_store %arg5[%c0_40, %c0_41, %c3_42, %c19_43], %29 {strides = array<i32>} : memref<2x2x22x22xf32, #tpu.memory_space<vmem>>, vector<2x2x16x3xf32>,
      %c0_44 = arith.constant 0 : index
      %c0_45 = arith.constant 0 : index
      %c3_46 = arith.constant 3 : index
      %c3_47 = arith.constant 3 : index
      %34 = vector.load %arg5[%c0_44, %c0_45, %c3_46, %c3_47] : memref<2x2x22x22xf32, #tpu.memory_space<vmem>>, vector<1x2x16x16xf32>
      %35 = vector.shape_cast %34 : vector<1x2x16x16xf32> to vector<2x16x16xf32>
      %36 = vector.shape_cast %27 : vector<2x16x16xf32> to vector<1x2x16x16xf32>
      tpu.vector_store %arg5[%c0_44, %c0_45, %c3_46, %c3_47], %36 {strides = array<i32>} : memref<2x2x22x22xf32, #tpu.memory_space<vmem>>, vector<1x2x16x16xf32>,
      %c1_48 = arith.constant 1 : index
      %c0_49 = arith.constant 0 : index
      %c3_50 = arith.constant 3 : index
      %c3_51 = arith.constant 3 : index
      %37 = vector.load %arg5[%c1_48, %c0_49, %c3_50, %c3_51] : memref<2x2x22x22xf32, #tpu.memory_space<vmem>>, vector<1x2x16x16xf32>
      %38 = vector.shape_cast %37 : vector<1x2x16x16xf32> to vector<2x16x16xf32>
      %39 = vector.shape_cast %20 : vector<2x16x16xf32> to vector<1x2x16x16xf32>
      tpu.vector_store %arg5[%c1_48, %c0_49, %c3_50, %c3_51], %39 {strides = array<i32>} : memref<2x2x22x22xf32, #tpu.memory_space<vmem>>, vector<1x2x16x16xf32>,
      %cst_52 = arith.constant 0.000000e+00 : f32
      %40 = vector.broadcast %cst_52 : f32 to vector<2x16x16xf32>
      %cst_53 = arith.constant 0.000000e+00 : f32
      %41 = vector.broadcast %cst_53 : f32 to vector<2x16x16xf32>
      %cst_54 = arith.constant 0.000000e+00 : f32
      %42 = vector.broadcast %cst_54 : f32 to vector<2x16x16xf32>
      %cst_55 = arith.constant 0.000000e+00 : f32
      %43 = vector.broadcast %cst_55 : f32 to vector<2x16x16xf32>
      %c0_56 = arith.constant 0 : index
      %c0_57 = arith.constant 0 : index
      %c0_58 = arith.constant 0 : index
      %c0_59 = arith.constant 0 : index
      %44 = vector.load %arg5[%c0_56, %c0_57, %c0_58, %c0_59] : memref<2x2x22x22xf32, #tpu.memory_space<vmem>>, vector<1x2x16x22xf32>
      %45 = vector.shape_cast %44 : vector<1x2x16x22xf32> to vector<2x16x22xf32>
      %c0_60 = arith.constant 0 : index
      %46 = memref.load %arg3[%c0_60] : memref<98xf32, #tpu.memory_space<smem>>
      %47 = vector.extract_strided_slice %45 {offsets = [0, 0, 0], sizes = [2, 16, 16], strides = [1, 1, 1]} : vector<2x16x22xf32> to vector<2x16x16xf32>
      %48 = vector.broadcast %46 : f32 to vector<2x16x16xf32>
      %49 = arith.mulf %48, %47 : vector<2x16x16xf32>
      %50 = arith.addf %40, %49 : vector<2x16x16xf32>
      %c1_61 = arith.constant 1 : index
      %51 = memref.load %arg3[%c1_61] : memref<98xf32, #tpu.memory_space<smem>>
      %52 = vector.extract_strided_slice %45 {offsets = [0, 0, 1], sizes = [2, 16, 16], strides = [1, 1, 1]} : vector<2x16x22xf32> to vector<2x16x16xf32>
      %53 = vector.broadcast %51 : f32 to vector<2x16x16xf32>
      %54 = arith.mulf %53, %52 : vector<2x16x16xf32>
      %55 = arith.addf %50, %54 : vector<2x16x16xf32>
      %c2_62 = arith.constant 2 : index
      %56 = memref.load %arg3[%c2_62] : memref<98xf32, #tpu.memory_space<smem>>
      %57 = vector.extract_strided_slice %45 {offsets = [0, 0, 2], sizes = [2, 16, 16], strides = [1, 1, 1]} : vector<2x16x22xf32> to vector<2x16x16xf32>
      %58 = vector.broadcast %56 : f32 to vector<2x16x16xf32>
      %59 = arith.mulf %58, %57 : vector<2x16x16xf32>
      %60 = arith.addf %55, %59 : vector<2x16x16xf32>
      %c3_63 = arith.constant 3 : index
      %61 = memref.load %arg3[%c3_63] : memref<98xf32, #tpu.memory_space<smem>>
      %62 = vector.extract_strided_slice %45 {offsets = [0, 0, 3], sizes = [2, 16, 16], strides = [1, 1, 1]} : vector<2x16x22xf32> to vector<2x16x16xf32>
      %63 = vector.broadcast %61 : f32 to vector<2x16x16xf32>
      %64 = arith.mulf %63, %62 : vector<2x16x16xf32>
      %65 = arith.addf %60, %64 : vector<2x16x16xf32>
      %c4 = arith.constant 4 : index
      %66 = memref.load %arg3[%c4] : memref<98xf32, #tpu.memory_space<smem>>
      %67 = vector.extract_strided_slice %45 {offsets = [0, 0, 4], sizes = [2, 16, 16], strides = [1, 1, 1]} : vector<2x16x22xf32> to vector<2x16x16xf32>
      %68 = vector.broadcast %66 : f32 to vector<2x16x16xf32>
      %69 = arith.mulf %68, %67 : vector<2x16x16xf32>
      %70 = arith.addf %65, %69 : vector<2x16x16xf32>
      %c5 = arith.constant 5 : index
      %71 = memref.load %arg3[%c5] : memref<98xf32, #tpu.memory_space<smem>>
      %72 = vector.extract_strided_slice %45 {offsets = [0, 0, 5], sizes = [2, 16, 16], strides = [1, 1, 1]} : vector<2x16x22xf32> to vector<2x16x16xf32>
      %73 = vector.broadcast %71 : f32 to vector<2x16x16xf32>
      %74 = arith.mulf %73, %72 : vector<2x16x16xf32>
      %75 = arith.addf %70, %74 : vector<2x16x16xf32>
      %c6 = arith.constant 6 : index
      %76 = memref.load %arg3[%c6] : memref<98xf32, #tpu.memory_space<smem>>
      %77 = vector.extract_strided_slice %45 {offsets = [0, 0, 6], sizes = [2, 16, 16], strides = [1, 1, 1]} : vector<2x16x22xf32> to vector<2x16x16xf32>
      %78 = vector.broadcast %76 : f32 to vector<2x16x16xf32>
      %79 = arith.mulf %78, %77 : vector<2x16x16xf32>
      %80 = arith.addf %75, %79 : vector<2x16x16xf32>
      %c0_64 = arith.constant 0 : index
      %c0_65 = arith.constant 0 : index
      %c1_66 = arith.constant 1 : index
      %c0_67 = arith.constant 0 : index
      %81 = vector.load %arg5[%c0_64, %c0_65, %c1_66, %c0_67] : memref<2x2x22x22xf32, #tpu.memory_space<vmem>>, vector<1x2x16x22xf32>
      %82 = vector.shape_cast %81 : vector<1x2x16x22xf32> to vector<2x16x22xf32>
      %c7 = arith.constant 7 : index
      %83 = memref.load %arg3[%c7] : memref<98xf32, #tpu.memory_space<smem>>
      %84 = vector.extract_strided_slice %82 {offsets = [0, 0, 0], sizes = [2, 16, 16], strides = [1, 1, 1]} : vector<2x16x22xf32> to vector<2x16x16xf32>
      %85 = vector.broadcast %83 : f32 to vector<2x16x16xf32>
      %86 = arith.mulf %85, %84 : vector<2x16x16xf32>
      %87 = arith.addf %41, %86 : vector<2x16x16xf32>
      %c8 = arith.constant 8 : index
      %88 = memref.load %arg3[%c8] : memref<98xf32, #tpu.memory_space<smem>>
      %89 = vector.extract_strided_slice %82 {offsets = [0, 0, 1], sizes = [2, 16, 16], strides = [1, 1, 1]} : vector<2x16x22xf32> to vector<2x16x16xf32>
      %90 = vector.broadcast %88 : f32 to vector<2x16x16xf32>
      %91 = arith.mulf %90, %89 : vector<2x16x16xf32>
      %92 = arith.addf %87, %91 : vector<2x16x16xf32>
      %c9 = arith.constant 9 : index
      %93 = memref.load %arg3[%c9] : memref<98xf32, #tpu.memory_space<smem>>
      %94 = vector.extract_strided_slice %82 {offsets = [0, 0, 2], sizes = [2, 16, 16], strides = [1, 1, 1]} : vector<2x16x22xf32> to vector<2x16x16xf32>
      %95 = vector.broadcast %93 : f32 to vector<2x16x16xf32>
      %96 = arith.mulf %95, %94 : vector<2x16x16xf32>
      %97 = arith.addf %92, %96 : vector<2x16x16xf32>
      %c10 = arith.constant 10 : index
      %98 = memref.load %arg3[%c10] : memref<98xf32, #tpu.memory_space<smem>>
      %99 = vector.extract_strided_slice %82 {offsets = [0, 0, 3], sizes = [2, 16, 16], strides = [1, 1, 1]} : vector<2x16x22xf32> to vector<2x16x16xf32>
      %100 = vector.broadcast %98 : f32 to vector<2x16x16xf32>
      %101 = arith.mulf %100, %99 : vector<2x16x16xf32>
      %102 = arith.addf %97, %101 : vector<2x16x16xf32>
      %c11 = arith.constant 11 : index
      %103 = memref.load %arg3[%c11] : memref<98xf32, #tpu.memory_space<smem>>
      %104 = vector.extract_strided_slice %82 {offsets = [0, 0, 4], sizes = [2, 16, 16], strides = [1, 1, 1]} : vector<2x16x22xf32> to vector<2x16x16xf32>
      %105 = vector.broadcast %103 : f32 to vector<2x16x16xf32>
      %106 = arith.mulf %105, %104 : vector<2x16x16xf32>
      %107 = arith.addf %102, %106 : vector<2x16x16xf32>
      %c12 = arith.constant 12 : index
      %108 = memref.load %arg3[%c12] : memref<98xf32, #tpu.memory_space<smem>>
      %109 = vector.extract_strided_slice %82 {offsets = [0, 0, 5], sizes = [2, 16, 16], strides = [1, 1, 1]} : vector<2x16x22xf32> to vector<2x16x16xf32>
      %110 = vector.broadcast %108 : f32 to vector<2x16x16xf32>
      %111 = arith.mulf %110, %109 : vector<2x16x16xf32>
      %112 = arith.addf %107, %111 : vector<2x16x16xf32>
      %c13 = arith.constant 13 : index
      %113 = memref.load %arg3[%c13] : memref<98xf32, #tpu.memory_space<smem>>
      %114 = vector.extract_strided_slice %82 {offsets = [0, 0, 6], sizes = [2, 16, 16], strides = [1, 1, 1]} : vector<2x16x22xf32> to vector<2x16x16xf32>
      %115 = vector.broadcast %113 : f32 to vector<2x16x16xf32>
      %116 = arith.mulf %115, %114 : vector<2x16x16xf32>
      %117 = arith.addf %112, %116 : vector<2x16x16xf32>
      %c0_68 = arith.constant 0 : index
      %c0_69 = arith.constant 0 : index
      %c2_70 = arith.constant 2 : index
      %c0_71 = arith.constant 0 : index
      %118 = vector.load %arg5[%c0_68, %c0_69, %c2_70, %c0_71] : memref<2x2x22x22xf32, #tpu.memory_space<vmem>>, vector<1x2x16x22xf32>
      %119 = vector.shape_cast %118 : vector<1x2x16x22xf32> to vector<2x16x22xf32>
      %c14 = arith.constant 14 : index
      %120 = memref.load %arg3[%c14] : memref<98xf32, #tpu.memory_space<smem>>
      %121 = vector.extract_strided_slice %119 {offsets = [0, 0, 0], sizes = [2, 16, 16], strides = [1, 1, 1]} : vector<2x16x22xf32> to vector<2x16x16xf32>
      %122 = vector.broadcast %120 : f32 to vector<2x16x16xf32>
      %123 = arith.mulf %122, %121 : vector<2x16x16xf32>
      %124 = arith.addf %80, %123 : vector<2x16x16xf32>
      %c15 = arith.constant 15 : index
      %125 = memref.load %arg3[%c15] : memref<98xf32, #tpu.memory_space<smem>>
      %126 = vector.extract_strided_slice %119 {offsets = [0, 0, 1], sizes = [2, 16, 16], strides = [1, 1, 1]} : vector<2x16x22xf32> to vector<2x16x16xf32>
      %127 = vector.broadcast %125 : f32 to vector<2x16x16xf32>
      %128 = arith.mulf %127, %126 : vector<2x16x16xf32>
      %129 = arith.addf %124, %128 : vector<2x16x16xf32>
      %c16 = arith.constant 16 : index
      %130 = memref.load %arg3[%c16] : memref<98xf32, #tpu.memory_space<smem>>
      %131 = vector.extract_strided_slice %119 {offsets = [0, 0, 2], sizes = [2, 16, 16], strides = [1, 1, 1]} : vector<2x16x22xf32> to vector<2x16x16xf32>
      %132 = vector.broadcast %130 : f32 to vector<2x16x16xf32>
      %133 = arith.mulf %132, %131 : vector<2x16x16xf32>
      %134 = arith.addf %129, %133 : vector<2x16x16xf32>
      %c17 = arith.constant 17 : index
      %135 = memref.load %arg3[%c17] : memref<98xf32, #tpu.memory_space<smem>>
      %136 = vector.extract_strided_slice %119 {offsets = [0, 0, 3], sizes = [2, 16, 16], strides = [1, 1, 1]} : vector<2x16x22xf32> to vector<2x16x16xf32>
      %137 = vector.broadcast %135 : f32 to vector<2x16x16xf32>
      %138 = arith.mulf %137, %136 : vector<2x16x16xf32>
      %139 = arith.addf %134, %138 : vector<2x16x16xf32>
      %c18 = arith.constant 18 : index
      %140 = memref.load %arg3[%c18] : memref<98xf32, #tpu.memory_space<smem>>
      %141 = vector.extract_strided_slice %119 {offsets = [0, 0, 4], sizes = [2, 16, 16], strides = [1, 1, 1]} : vector<2x16x22xf32> to vector<2x16x16xf32>
      %142 = vector.broadcast %140 : f32 to vector<2x16x16xf32>
      %143 = arith.mulf %142, %141 : vector<2x16x16xf32>
      %144 = arith.addf %139, %143 : vector<2x16x16xf32>
      %c19_72 = arith.constant 19 : index
      %145 = memref.load %arg3[%c19_72] : memref<98xf32, #tpu.memory_space<smem>>
      %146 = vector.extract_strided_slice %119 {offsets = [0, 0, 5], sizes = [2, 16, 16], strides = [1, 1, 1]} : vector<2x16x22xf32> to vector<2x16x16xf32>
      %147 = vector.broadcast %145 : f32 to vector<2x16x16xf32>
      %148 = arith.mulf %147, %146 : vector<2x16x16xf32>
      %149 = arith.addf %144, %148 : vector<2x16x16xf32>
      %c20 = arith.constant 20 : index
      %150 = memref.load %arg3[%c20] : memref<98xf32, #tpu.memory_space<smem>>
      %151 = vector.extract_strided_slice %119 {offsets = [0, 0, 6], sizes = [2, 16, 16], strides = [1, 1, 1]} : vector<2x16x22xf32> to vector<2x16x16xf32>
      %152 = vector.broadcast %150 : f32 to vector<2x16x16xf32>
      %153 = arith.mulf %152, %151 : vector<2x16x16xf32>
      %154 = arith.addf %149, %153 : vector<2x16x16xf32>
      %c0_73 = arith.constant 0 : index
      %c0_74 = arith.constant 0 : index
      %c3_75 = arith.constant 3 : index
      %c0_76 = arith.constant 0 : index
      %155 = vector.load %arg5[%c0_73, %c0_74, %c3_75, %c0_76] : memref<2x2x22x22xf32, #tpu.memory_space<vmem>>, vector<1x2x16x22xf32>
      %156 = vector.shape_cast %155 : vector<1x2x16x22xf32> to vector<2x16x22xf32>
      %c21 = arith.constant 21 : index
      %157 = memref.load %arg3[%c21] : memref<98xf32, #tpu.memory_space<smem>>
      %158 = vector.extract_strided_slice %156 {offsets = [0, 0, 0], sizes = [2, 16, 16], strides = [1, 1, 1]} : vector<2x16x22xf32> to vector<2x16x16xf32>
      %159 = vector.broadcast %157 : f32 to vector<2x16x16xf32>
      %160 = arith.mulf %159, %158 : vector<2x16x16xf32>
      %161 = arith.addf %117, %160 : vector<2x16x16xf32>
      %c22 = arith.constant 22 : index
      %162 = memref.load %arg3[%c22] : memref<98xf32, #tpu.memory_space<smem>>
      %163 = vector.extract_strided_slice %156 {offsets = [0, 0, 1], sizes = [2, 16, 16], strides = [1, 1, 1]} : vector<2x16x22xf32> to vector<2x16x16xf32>
      %164 = vector.broadcast %162 : f32 to vector<2x16x16xf32>
      %165 = arith.mulf %164, %163 : vector<2x16x16xf32>
      %166 = arith.addf %161, %165 : vector<2x16x16xf32>
      %c23 = arith.constant 23 : index
      %167 = memref.load %arg3[%c23] : memref<98xf32, #tpu.memory_space<smem>>
      %168 = vector.extract_strided_slice %156 {offsets = [0, 0, 2], sizes = [2, 16, 16], strides = [1, 1, 1]} : vector<2x16x22xf32> to vector<2x16x16xf32>
      %169 = vector.broadcast %167 : f32 to vector<2x16x16xf32>
      %170 = arith.mulf %169, %168 : vector<2x16x16xf32>
      %171 = arith.addf %166, %170 : vector<2x16x16xf32>
      %c24 = arith.constant 24 : index
      %172 = memref.load %arg3[%c24] : memref<98xf32, #tpu.memory_space<smem>>
      %173 = vector.extract_strided_slice %156 {offsets = [0, 0, 3], sizes = [2, 16, 16], strides = [1, 1, 1]} : vector<2x16x22xf32> to vector<2x16x16xf32>
      %174 = vector.broadcast %172 : f32 to vector<2x16x16xf32>
      %175 = arith.mulf %174, %173 : vector<2x16x16xf32>
      %176 = arith.addf %171, %175 : vector<2x16x16xf32>
      %c25 = arith.constant 25 : index
      %177 = memref.load %arg3[%c25] : memref<98xf32, #tpu.memory_space<smem>>
      %178 = vector.extract_strided_slice %156 {offsets = [0, 0, 4], sizes = [2, 16, 16], strides = [1, 1, 1]} : vector<2x16x22xf32> to vector<2x16x16xf32>
      %179 = vector.broadcast %177 : f32 to vector<2x16x16xf32>
      %180 = arith.mulf %179, %178 : vector<2x16x16xf32>
      %181 = arith.addf %176, %180 : vector<2x16x16xf32>
      %c26 = arith.constant 26 : index
      %182 = memref.load %arg3[%c26] : memref<98xf32, #tpu.memory_space<smem>>
      %183 = vector.extract_strided_slice %156 {offsets = [0, 0, 5], sizes = [2, 16, 16], strides = [1, 1, 1]} : vector<2x16x22xf32> to vector<2x16x16xf32>
      %184 = vector.broadcast %182 : f32 to vector<2x16x16xf32>
      %185 = arith.mulf %184, %183 : vector<2x16x16xf32>
      %186 = arith.addf %181, %185 : vector<2x16x16xf32>
      %c27 = arith.constant 27 : index
      %187 = memref.load %arg3[%c27] : memref<98xf32, #tpu.memory_space<smem>>
      %188 = vector.extract_strided_slice %156 {offsets = [0, 0, 6], sizes = [2, 16, 16], strides = [1, 1, 1]} : vector<2x16x22xf32> to vector<2x16x16xf32>
      %189 = vector.broadcast %187 : f32 to vector<2x16x16xf32>
      %190 = arith.mulf %189, %188 : vector<2x16x16xf32>
      %191 = arith.addf %186, %190 : vector<2x16x16xf32>
      %c0_77 = arith.constant 0 : index
      %c0_78 = arith.constant 0 : index
      %c4_79 = arith.constant 4 : index
      %c0_80 = arith.constant 0 : index
      %192 = vector.load %arg5[%c0_77, %c0_78, %c4_79, %c0_80] : memref<2x2x22x22xf32, #tpu.memory_space<vmem>>, vector<1x2x16x22xf32>
      %193 = vector.shape_cast %192 : vector<1x2x16x22xf32> to vector<2x16x22xf32>
      %c28 = arith.constant 28 : index
      %194 = memref.load %arg3[%c28] : memref<98xf32, #tpu.memory_space<smem>>
      %195 = vector.extract_strided_slice %193 {offsets = [0, 0, 0], sizes = [2, 16, 16], strides = [1, 1, 1]} : vector<2x16x22xf32> to vector<2x16x16xf32>
      %196 = vector.broadcast %194 : f32 to vector<2x16x16xf32>
      %197 = arith.mulf %196, %195 : vector<2x16x16xf32>
      %198 = arith.addf %154, %197 : vector<2x16x16xf32>
      %c29 = arith.constant 29 : index
      %199 = memref.load %arg3[%c29] : memref<98xf32, #tpu.memory_space<smem>>
      %200 = vector.extract_strided_slice %193 {offsets = [0, 0, 1], sizes = [2, 16, 16], strides = [1, 1, 1]} : vector<2x16x22xf32> to vector<2x16x16xf32>
      %201 = vector.broadcast %199 : f32 to vector<2x16x16xf32>
      %202 = arith.mulf %201, %200 : vector<2x16x16xf32>
      %203 = arith.addf %198, %202 : vector<2x16x16xf32>
      %c30 = arith.constant 30 : index
      %204 = memref.load %arg3[%c30] : memref<98xf32, #tpu.memory_space<smem>>
      %205 = vector.extract_strided_slice %193 {offsets = [0, 0, 2], sizes = [2, 16, 16], strides = [1, 1, 1]} : vector<2x16x22xf32> to vector<2x16x16xf32>
      %206 = vector.broadcast %204 : f32 to vector<2x16x16xf32>
      %207 = arith.mulf %206, %205 : vector<2x16x16xf32>
      %208 = arith.addf %203, %207 : vector<2x16x16xf32>
      %c31 = arith.constant 31 : index
      %209 = memref.load %arg3[%c31] : memref<98xf32, #tpu.memory_space<smem>>
      %210 = vector.extract_strided_slice %193 {offsets = [0, 0, 3], sizes = [2, 16, 16], strides = [1, 1, 1]} : vector<2x16x22xf32> to vector<2x16x16xf32>
      %211 = vector.broadcast %209 : f32 to vector<2x16x16xf32>
      %212 = arith.mulf %211, %210 : vector<2x16x16xf32>
      %213 = arith.addf %208, %212 : vector<2x16x16xf32>
      %c32 = arith.constant 32 : index
      %214 = memref.load %arg3[%c32] : memref<98xf32, #tpu.memory_space<smem>>
      %215 = vector.extract_strided_slice %193 {offsets = [0, 0, 4], sizes = [2, 16, 16], strides = [1, 1, 1]} : vector<2x16x22xf32> to vector<2x16x16xf32>
      %216 = vector.broadcast %214 : f32 to vector<2x16x16xf32>
      %217 = arith.mulf %216, %215 : vector<2x16x16xf32>
      %218 = arith.addf %213, %217 : vector<2x16x16xf32>
      %c33 = arith.constant 33 : index
      %219 = memref.load %arg3[%c33] : memref<98xf32, #tpu.memory_space<smem>>
      %220 = vector.extract_strided_slice %193 {offsets = [0, 0, 5], sizes = [2, 16, 16], strides = [1, 1, 1]} : vector<2x16x22xf32> to vector<2x16x16xf32>
      %221 = vector.broadcast %219 : f32 to vector<2x16x16xf32>
      %222 = arith.mulf %221, %220 : vector<2x16x16xf32>
      %223 = arith.addf %218, %222 : vector<2x16x16xf32>
      %c34 = arith.constant 34 : index
      %224 = memref.load %arg3[%c34] : memref<98xf32, #tpu.memory_space<smem>>
      %225 = vector.extract_strided_slice %193 {offsets = [0, 0, 6], sizes = [2, 16, 16], strides = [1, 1, 1]} : vector<2x16x22xf32> to vector<2x16x16xf32>
      %226 = vector.broadcast %224 : f32 to vector<2x16x16xf32>
      %227 = arith.mulf %226, %225 : vector<2x16x16xf32>
      %228 = arith.addf %223, %227 : vector<2x16x16xf32>
      %c0_81 = arith.constant 0 : index
      %c0_82 = arith.constant 0 : index
      %c5_83 = arith.constant 5 : index
      %c0_84 = arith.constant 0 : index
      %229 = vector.load %arg5[%c0_81, %c0_82, %c5_83, %c0_84] : memref<2x2x22x22xf32, #tpu.memory_space<vmem>>, vector<1x2x16x22xf32>
      %230 = vector.shape_cast %229 : vector<1x2x16x22xf32> to vector<2x16x22xf32>
      %c35 = arith.constant 35 : index
      %231 = memref.load %arg3[%c35] : memref<98xf32, #tpu.memory_space<smem>>
      %232 = vector.extract_strided_slice %230 {offsets = [0, 0, 0], sizes = [2, 16, 16], strides = [1, 1, 1]} : vector<2x16x22xf32> to vector<2x16x16xf32>
      %233 = vector.broadcast %231 : f32 to vector<2x16x16xf32>
      %234 = arith.mulf %233, %232 : vector<2x16x16xf32>
      %235 = arith.addf %191, %234 : vector<2x16x16xf32>
      %c36 = arith.constant 36 : index
      %236 = memref.load %arg3[%c36] : memref<98xf32, #tpu.memory_space<smem>>
      %237 = vector.extract_strided_slice %230 {offsets = [0, 0, 1], sizes = [2, 16, 16], strides = [1, 1, 1]} : vector<2x16x22xf32> to vector<2x16x16xf32>
      %238 = vector.broadcast %236 : f32 to vector<2x16x16xf32>
      %239 = arith.mulf %238, %237 : vector<2x16x16xf32>
      %240 = arith.addf %235, %239 : vector<2x16x16xf32>
      %c37 = arith.constant 37 : index
      %241 = memref.load %arg3[%c37] : memref<98xf32, #tpu.memory_space<smem>>
      %242 = vector.extract_strided_slice %230 {offsets = [0, 0, 2], sizes = [2, 16, 16], strides = [1, 1, 1]} : vector<2x16x22xf32> to vector<2x16x16xf32>
      %243 = vector.broadcast %241 : f32 to vector<2x16x16xf32>
      %244 = arith.mulf %243, %242 : vector<2x16x16xf32>
      %245 = arith.addf %240, %244 : vector<2x16x16xf32>
      %c38 = arith.constant 38 : index
      %246 = memref.load %arg3[%c38] : memref<98xf32, #tpu.memory_space<smem>>
      %247 = vector.extract_strided_slice %230 {offsets = [0, 0, 3], sizes = [2, 16, 16], strides = [1, 1, 1]} : vector<2x16x22xf32> to vector<2x16x16xf32>
      %248 = vector.broadcast %246 : f32 to vector<2x16x16xf32>
      %249 = arith.mulf %248, %247 : vector<2x16x16xf32>
      %250 = arith.addf %245, %249 : vector<2x16x16xf32>
      %c39 = arith.constant 39 : index
      %251 = memref.load %arg3[%c39] : memref<98xf32, #tpu.memory_space<smem>>
      %252 = vector.extract_strided_slice %230 {offsets = [0, 0, 4], sizes = [2, 16, 16], strides = [1, 1, 1]} : vector<2x16x22xf32> to vector<2x16x16xf32>
      %253 = vector.broadcast %251 : f32 to vector<2x16x16xf32>
      %254 = arith.mulf %253, %252 : vector<2x16x16xf32>
      %255 = arith.addf %250, %254 : vector<2x16x16xf32>
      %c40 = arith.constant 40 : index
      %256 = memref.load %arg3[%c40] : memref<98xf32, #tpu.memory_space<smem>>
      %257 = vector.extract_strided_slice %230 {offsets = [0, 0, 5], sizes = [2, 16, 16], strides = [1, 1, 1]} : vector<2x16x22xf32> to vector<2x16x16xf32>
      %258 = vector.broadcast %256 : f32 to vector<2x16x16xf32>
      %259 = arith.mulf %258, %257 : vector<2x16x16xf32>
      %260 = arith.addf %255, %259 : vector<2x16x16xf32>
      %c41 = arith.constant 41 : index
      %261 = memref.load %arg3[%c41] : memref<98xf32, #tpu.memory_space<smem>>
      %262 = vector.extract_strided_slice %230 {offsets = [0, 0, 6], sizes = [2, 16, 16], strides = [1, 1, 1]} : vector<2x16x22xf32> to vector<2x16x16xf32>
      %263 = vector.broadcast %261 : f32 to vector<2x16x16xf32>
      %264 = arith.mulf %263, %262 : vector<2x16x16xf32>
      %265 = arith.addf %260, %264 : vector<2x16x16xf32>
      %c0_85 = arith.constant 0 : index
      %c0_86 = arith.constant 0 : index
      %c6_87 = arith.constant 6 : index
      %c0_88 = arith.constant 0 : index
      %266 = vector.load %arg5[%c0_85, %c0_86, %c6_87, %c0_88] : memref<2x2x22x22xf32, #tpu.memory_space<vmem>>, vector<1x2x16x22xf32>
      %267 = vector.shape_cast %266 : vector<1x2x16x22xf32> to vector<2x16x22xf32>
      %c42 = arith.constant 42 : index
      %268 = memref.load %arg3[%c42] : memref<98xf32, #tpu.memory_space<smem>>
      %269 = vector.extract_strided_slice %267 {offsets = [0, 0, 0], sizes = [2, 16, 16], strides = [1, 1, 1]} : vector<2x16x22xf32> to vector<2x16x16xf32>
      %270 = vector.broadcast %268 : f32 to vector<2x16x16xf32>
      %271 = arith.mulf %270, %269 : vector<2x16x16xf32>
      %272 = arith.addf %228, %271 : vector<2x16x16xf32>
      %c43 = arith.constant 43 : index
      %273 = memref.load %arg3[%c43] : memref<98xf32, #tpu.memory_space<smem>>
      %274 = vector.extract_strided_slice %267 {offsets = [0, 0, 1], sizes = [2, 16, 16], strides = [1, 1, 1]} : vector<2x16x22xf32> to vector<2x16x16xf32>
      %275 = vector.broadcast %273 : f32 to vector<2x16x16xf32>
      %276 = arith.mulf %275, %274 : vector<2x16x16xf32>
      %277 = arith.addf %272, %276 : vector<2x16x16xf32>
      %c44 = arith.constant 44 : index
      %278 = memref.load %arg3[%c44] : memref<98xf32, #tpu.memory_space<smem>>
      %279 = vector.extract_strided_slice %267 {offsets = [0, 0, 2], sizes = [2, 16, 16], strides = [1, 1, 1]} : vector<2x16x22xf32> to vector<2x16x16xf32>
      %280 = vector.broadcast %278 : f32 to vector<2x16x16xf32>
      %281 = arith.mulf %280, %279 : vector<2x16x16xf32>
      %282 = arith.addf %277, %281 : vector<2x16x16xf32>
      %c45 = arith.constant 45 : index
      %283 = memref.load %arg3[%c45] : memref<98xf32, #tpu.memory_space<smem>>
      %284 = vector.extract_strided_slice %267 {offsets = [0, 0, 3], sizes = [2, 16, 16], strides = [1, 1, 1]} : vector<2x16x22xf32> to vector<2x16x16xf32>
      %285 = vector.broadcast %283 : f32 to vector<2x16x16xf32>
      %286 = arith.mulf %285, %284 : vector<2x16x16xf32>
      %287 = arith.addf %282, %286 : vector<2x16x16xf32>
      %c46 = arith.constant 46 : index
      %288 = memref.load %arg3[%c46] : memref<98xf32, #tpu.memory_space<smem>>
      %289 = vector.extract_strided_slice %267 {offsets = [0, 0, 4], sizes = [2, 16, 16], strides = [1, 1, 1]} : vector<2x16x22xf32> to vector<2x16x16xf32>
      %290 = vector.broadcast %288 : f32 to vector<2x16x16xf32>
      %291 = arith.mulf %290, %289 : vector<2x16x16xf32>
      %292 = arith.addf %287, %291 : vector<2x16x16xf32>
      %c47 = arith.constant 47 : index
      %293 = memref.load %arg3[%c47] : memref<98xf32, #tpu.memory_space<smem>>
      %294 = vector.extract_strided_slice %267 {offsets = [0, 0, 5], sizes = [2, 16, 16], strides = [1, 1, 1]} : vector<2x16x22xf32> to vector<2x16x16xf32>
      %295 = vector.broadcast %293 : f32 to vector<2x16x16xf32>
      %296 = arith.mulf %295, %294 : vector<2x16x16xf32>
      %297 = arith.addf %292, %296 : vector<2x16x16xf32>
      %c48 = arith.constant 48 : index
      %298 = memref.load %arg3[%c48] : memref<98xf32, #tpu.memory_space<smem>>
      %299 = vector.extract_strided_slice %267 {offsets = [0, 0, 6], sizes = [2, 16, 16], strides = [1, 1, 1]} : vector<2x16x22xf32> to vector<2x16x16xf32>
      %300 = vector.broadcast %298 : f32 to vector<2x16x16xf32>
      %301 = arith.mulf %300, %299 : vector<2x16x16xf32>
      %302 = arith.addf %297, %301 : vector<2x16x16xf32>
      %c1_89 = arith.constant 1 : index
      %c0_90 = arith.constant 0 : index
      %c0_91 = arith.constant 0 : index
      %c0_92 = arith.constant 0 : index
      %303 = vector.load %arg5[%c1_89, %c0_90, %c0_91, %c0_92] : memref<2x2x22x22xf32, #tpu.memory_space<vmem>>, vector<1x2x16x22xf32>
      %304 = vector.shape_cast %303 : vector<1x2x16x22xf32> to vector<2x16x22xf32>
      %c49 = arith.constant 49 : index
      %305 = memref.load %arg3[%c49] : memref<98xf32, #tpu.memory_space<smem>>
      %306 = vector.extract_strided_slice %304 {offsets = [0, 0, 0], sizes = [2, 16, 16], strides = [1, 1, 1]} : vector<2x16x22xf32> to vector<2x16x16xf32>
      %307 = vector.broadcast %305 : f32 to vector<2x16x16xf32>
      %308 = arith.mulf %307, %306 : vector<2x16x16xf32>
      %309 = arith.addf %42, %308 : vector<2x16x16xf32>
      %c50 = arith.constant 50 : index
      %310 = memref.load %arg3[%c50] : memref<98xf32, #tpu.memory_space<smem>>
      %311 = vector.extract_strided_slice %304 {offsets = [0, 0, 1], sizes = [2, 16, 16], strides = [1, 1, 1]} : vector<2x16x22xf32> to vector<2x16x16xf32>
      %312 = vector.broadcast %310 : f32 to vector<2x16x16xf32>
      %313 = arith.mulf %312, %311 : vector<2x16x16xf32>
      %314 = arith.addf %309, %313 : vector<2x16x16xf32>
      %c51 = arith.constant 51 : index
      %315 = memref.load %arg3[%c51] : memref<98xf32, #tpu.memory_space<smem>>
      %316 = vector.extract_strided_slice %304 {offsets = [0, 0, 2], sizes = [2, 16, 16], strides = [1, 1, 1]} : vector<2x16x22xf32> to vector<2x16x16xf32>
      %317 = vector.broadcast %315 : f32 to vector<2x16x16xf32>
      %318 = arith.mulf %317, %316 : vector<2x16x16xf32>
      %319 = arith.addf %314, %318 : vector<2x16x16xf32>
      %c52 = arith.constant 52 : index
      %320 = memref.load %arg3[%c52] : memref<98xf32, #tpu.memory_space<smem>>
      %321 = vector.extract_strided_slice %304 {offsets = [0, 0, 3], sizes = [2, 16, 16], strides = [1, 1, 1]} : vector<2x16x22xf32> to vector<2x16x16xf32>
      %322 = vector.broadcast %320 : f32 to vector<2x16x16xf32>
      %323 = arith.mulf %322, %321 : vector<2x16x16xf32>
      %324 = arith.addf %319, %323 : vector<2x16x16xf32>
      %c53 = arith.constant 53 : index
      %325 = memref.load %arg3[%c53] : memref<98xf32, #tpu.memory_space<smem>>
      %326 = vector.extract_strided_slice %304 {offsets = [0, 0, 4], sizes = [2, 16, 16], strides = [1, 1, 1]} : vector<2x16x22xf32> to vector<2x16x16xf32>
      %327 = vector.broadcast %325 : f32 to vector<2x16x16xf32>
      %328 = arith.mulf %327, %326 : vector<2x16x16xf32>
      %329 = arith.addf %324, %328 : vector<2x16x16xf32>
      %c54 = arith.constant 54 : index
      %330 = memref.load %arg3[%c54] : memref<98xf32, #tpu.memory_space<smem>>
      %331 = vector.extract_strided_slice %304 {offsets = [0, 0, 5], sizes = [2, 16, 16], strides = [1, 1, 1]} : vector<2x16x22xf32> to vector<2x16x16xf32>
      %332 = vector.broadcast %330 : f32 to vector<2x16x16xf32>
      %333 = arith.mulf %332, %331 : vector<2x16x16xf32>
      %334 = arith.addf %329, %333 : vector<2x16x16xf32>
      %c55 = arith.constant 55 : index
      %335 = memref.load %arg3[%c55] : memref<98xf32, #tpu.memory_space<smem>>
      %336 = vector.extract_strided_slice %304 {offsets = [0, 0, 6], sizes = [2, 16, 16], strides = [1, 1, 1]} : vector<2x16x22xf32> to vector<2x16x16xf32>
      %337 = vector.broadcast %335 : f32 to vector<2x16x16xf32>
      %338 = arith.mulf %337, %336 : vector<2x16x16xf32>
      %339 = arith.addf %334, %338 : vector<2x16x16xf32>
      %c1_93 = arith.constant 1 : index
      %c0_94 = arith.constant 0 : index
      %c1_95 = arith.constant 1 : index
      %c0_96 = arith.constant 0 : index
      %340 = vector.load %arg5[%c1_93, %c0_94, %c1_95, %c0_96] : memref<2x2x22x22xf32, #tpu.memory_space<vmem>>, vector<1x2x16x22xf32>
      %341 = vector.shape_cast %340 : vector<1x2x16x22xf32> to vector<2x16x22xf32>
      %c56 = arith.constant 56 : index
      %342 = memref.load %arg3[%c56] : memref<98xf32, #tpu.memory_space<smem>>
      %343 = vector.extract_strided_slice %341 {offsets = [0, 0, 0], sizes = [2, 16, 16], strides = [1, 1, 1]} : vector<2x16x22xf32> to vector<2x16x16xf32>
      %344 = vector.broadcast %342 : f32 to vector<2x16x16xf32>
      %345 = arith.mulf %344, %343 : vector<2x16x16xf32>
      %346 = arith.addf %43, %345 : vector<2x16x16xf32>
      %c57 = arith.constant 57 : index
      %347 = memref.load %arg3[%c57] : memref<98xf32, #tpu.memory_space<smem>>
      %348 = vector.extract_strided_slice %341 {offsets = [0, 0, 1], sizes = [2, 16, 16], strides = [1, 1, 1]} : vector<2x16x22xf32> to vector<2x16x16xf32>
      %349 = vector.broadcast %347 : f32 to vector<2x16x16xf32>
      %350 = arith.mulf %349, %348 : vector<2x16x16xf32>
      %351 = arith.addf %346, %350 : vector<2x16x16xf32>
      %c58 = arith.constant 58 : index
      %352 = memref.load %arg3[%c58] : memref<98xf32, #tpu.memory_space<smem>>
      %353 = vector.extract_strided_slice %341 {offsets = [0, 0, 2], sizes = [2, 16, 16], strides = [1, 1, 1]} : vector<2x16x22xf32> to vector<2x16x16xf32>
      %354 = vector.broadcast %352 : f32 to vector<2x16x16xf32>
      %355 = arith.mulf %354, %353 : vector<2x16x16xf32>
      %356 = arith.addf %351, %355 : vector<2x16x16xf32>
      %c59 = arith.constant 59 : index
      %357 = memref.load %arg3[%c59] : memref<98xf32, #tpu.memory_space<smem>>
      %358 = vector.extract_strided_slice %341 {offsets = [0, 0, 3], sizes = [2, 16, 16], strides = [1, 1, 1]} : vector<2x16x22xf32> to vector<2x16x16xf32>
      %359 = vector.broadcast %357 : f32 to vector<2x16x16xf32>
      %360 = arith.mulf %359, %358 : vector<2x16x16xf32>
      %361 = arith.addf %356, %360 : vector<2x16x16xf32>
      %c60 = arith.constant 60 : index
      %362 = memref.load %arg3[%c60] : memref<98xf32, #tpu.memory_space<smem>>
      %363 = vector.extract_strided_slice %341 {offsets = [0, 0, 4], sizes = [2, 16, 16], strides = [1, 1, 1]} : vector<2x16x22xf32> to vector<2x16x16xf32>
      %364 = vector.broadcast %362 : f32 to vector<2x16x16xf32>
      %365 = arith.mulf %364, %363 : vector<2x16x16xf32>
      %366 = arith.addf %361, %365 : vector<2x16x16xf32>
      %c61 = arith.constant 61 : index
      %367 = memref.load %arg3[%c61] : memref<98xf32, #tpu.memory_space<smem>>
      %368 = vector.extract_strided_slice %341 {offsets = [0, 0, 5], sizes = [2, 16, 16], strides = [1, 1, 1]} : vector<2x16x22xf32> to vector<2x16x16xf32>
      %369 = vector.broadcast %367 : f32 to vector<2x16x16xf32>
      %370 = arith.mulf %369, %368 : vector<2x16x16xf32>
      %371 = arith.addf %366, %370 : vector<2x16x16xf32>
      %c62 = arith.constant 62 : index
      %372 = memref.load %arg3[%c62] : memref<98xf32, #tpu.memory_space<smem>>
      %373 = vector.extract_strided_slice %341 {offsets = [0, 0, 6], sizes = [2, 16, 16], strides = [1, 1, 1]} : vector<2x16x22xf32> to vector<2x16x16xf32>
      %374 = vector.broadcast %372 : f32 to vector<2x16x16xf32>
      %375 = arith.mulf %374, %373 : vector<2x16x16xf32>
      %376 = arith.addf %371, %375 : vector<2x16x16xf32>
      %c1_97 = arith.constant 1 : index
      %c0_98 = arith.constant 0 : index
      %c2_99 = arith.constant 2 : index
      %c0_100 = arith.constant 0 : index
      %377 = vector.load %arg5[%c1_97, %c0_98, %c2_99, %c0_100] : memref<2x2x22x22xf32, #tpu.memory_space<vmem>>, vector<1x2x16x22xf32>
      %378 = vector.shape_cast %377 : vector<1x2x16x22xf32> to vector<2x16x22xf32>
      %c63 = arith.constant 63 : index
      %379 = memref.load %arg3[%c63] : memref<98xf32, #tpu.memory_space<smem>>
      %380 = vector.extract_strided_slice %378 {offsets = [0, 0, 0], sizes = [2, 16, 16], strides = [1, 1, 1]} : vector<2x16x22xf32> to vector<2x16x16xf32>
      %381 = vector.broadcast %379 : f32 to vector<2x16x16xf32>
      %382 = arith.mulf %381, %380 : vector<2x16x16xf32>
      %383 = arith.addf %339, %382 : vector<2x16x16xf32>
      %c64 = arith.constant 64 : index
      %384 = memref.load %arg3[%c64] : memref<98xf32, #tpu.memory_space<smem>>
      %385 = vector.extract_strided_slice %378 {offsets = [0, 0, 1], sizes = [2, 16, 16], strides = [1, 1, 1]} : vector<2x16x22xf32> to vector<2x16x16xf32>
      %386 = vector.broadcast %384 : f32 to vector<2x16x16xf32>
      %387 = arith.mulf %386, %385 : vector<2x16x16xf32>
      %388 = arith.addf %383, %387 : vector<2x16x16xf32>
      %c65 = arith.constant 65 : index
      %389 = memref.load %arg3[%c65] : memref<98xf32, #tpu.memory_space<smem>>
      %390 = vector.extract_strided_slice %378 {offsets = [0, 0, 2], sizes = [2, 16, 16], strides = [1, 1, 1]} : vector<2x16x22xf32> to vector<2x16x16xf32>
      %391 = vector.broadcast %389 : f32 to vector<2x16x16xf32>
      %392 = arith.mulf %391, %390 : vector<2x16x16xf32>
      %393 = arith.addf %388, %392 : vector<2x16x16xf32>
      %c66 = arith.constant 66 : index
      %394 = memref.load %arg3[%c66] : memref<98xf32, #tpu.memory_space<smem>>
      %395 = vector.extract_strided_slice %378 {offsets = [0, 0, 3], sizes = [2, 16, 16], strides = [1, 1, 1]} : vector<2x16x22xf32> to vector<2x16x16xf32>
      %396 = vector.broadcast %394 : f32 to vector<2x16x16xf32>
      %397 = arith.mulf %396, %395 : vector<2x16x16xf32>
      %398 = arith.addf %393, %397 : vector<2x16x16xf32>
      %c67 = arith.constant 67 : index
      %399 = memref.load %arg3[%c67] : memref<98xf32, #tpu.memory_space<smem>>
      %400 = vector.extract_strided_slice %378 {offsets = [0, 0, 4], sizes = [2, 16, 16], strides = [1, 1, 1]} : vector<2x16x22xf32> to vector<2x16x16xf32>
      %401 = vector.broadcast %399 : f32 to vector<2x16x16xf32>
      %402 = arith.mulf %401, %400 : vector<2x16x16xf32>
      %403 = arith.addf %398, %402 : vector<2x16x16xf32>
      %c68 = arith.constant 68 : index
      %404 = memref.load %arg3[%c68] : memref<98xf32, #tpu.memory_space<smem>>
      %405 = vector.extract_strided_slice %378 {offsets = [0, 0, 5], sizes = [2, 16, 16], strides = [1, 1, 1]} : vector<2x16x22xf32> to vector<2x16x16xf32>
      %406 = vector.broadcast %404 : f32 to vector<2x16x16xf32>
      %407 = arith.mulf %406, %405 : vector<2x16x16xf32>
      %408 = arith.addf %403, %407 : vector<2x16x16xf32>
      %c69 = arith.constant 69 : index
      %409 = memref.load %arg3[%c69] : memref<98xf32, #tpu.memory_space<smem>>
      %410 = vector.extract_strided_slice %378 {offsets = [0, 0, 6], sizes = [2, 16, 16], strides = [1, 1, 1]} : vector<2x16x22xf32> to vector<2x16x16xf32>
      %411 = vector.broadcast %409 : f32 to vector<2x16x16xf32>
      %412 = arith.mulf %411, %410 : vector<2x16x16xf32>
      %413 = arith.addf %408, %412 : vector<2x16x16xf32>
      %c1_101 = arith.constant 1 : index
      %c0_102 = arith.constant 0 : index
      %c3_103 = arith.constant 3 : index
      %c0_104 = arith.constant 0 : index
      %414 = vector.load %arg5[%c1_101, %c0_102, %c3_103, %c0_104] : memref<2x2x22x22xf32, #tpu.memory_space<vmem>>, vector<1x2x16x22xf32>
      %415 = vector.shape_cast %414 : vector<1x2x16x22xf32> to vector<2x16x22xf32>
      %c70 = arith.constant 70 : index
      %416 = memref.load %arg3[%c70] : memref<98xf32, #tpu.memory_space<smem>>
      %417 = vector.extract_strided_slice %415 {offsets = [0, 0, 0], sizes = [2, 16, 16], strides = [1, 1, 1]} : vector<2x16x22xf32> to vector<2x16x16xf32>
      %418 = vector.broadcast %416 : f32 to vector<2x16x16xf32>
      %419 = arith.mulf %418, %417 : vector<2x16x16xf32>
      %420 = arith.addf %376, %419 : vector<2x16x16xf32>
      %c71 = arith.constant 71 : index
      %421 = memref.load %arg3[%c71] : memref<98xf32, #tpu.memory_space<smem>>
      %422 = vector.extract_strided_slice %415 {offsets = [0, 0, 1], sizes = [2, 16, 16], strides = [1, 1, 1]} : vector<2x16x22xf32> to vector<2x16x16xf32>
      %423 = vector.broadcast %421 : f32 to vector<2x16x16xf32>
      %424 = arith.mulf %423, %422 : vector<2x16x16xf32>
      %425 = arith.addf %420, %424 : vector<2x16x16xf32>
      %c72 = arith.constant 72 : index
      %426 = memref.load %arg3[%c72] : memref<98xf32, #tpu.memory_space<smem>>
      %427 = vector.extract_strided_slice %415 {offsets = [0, 0, 2], sizes = [2, 16, 16], strides = [1, 1, 1]} : vector<2x16x22xf32> to vector<2x16x16xf32>
      %428 = vector.broadcast %426 : f32 to vector<2x16x16xf32>
      %429 = arith.mulf %428, %427 : vector<2x16x16xf32>
      %430 = arith.addf %425, %429 : vector<2x16x16xf32>
      %c73 = arith.constant 73 : index
      %431 = memref.load %arg3[%c73] : memref<98xf32, #tpu.memory_space<smem>>
      %432 = vector.extract_strided_slice %415 {offsets = [0, 0, 3], sizes = [2, 16, 16], strides = [1, 1, 1]} : vector<2x16x22xf32> to vector<2x16x16xf32>
      %433 = vector.broadcast %431 : f32 to vector<2x16x16xf32>
      %434 = arith.mulf %433, %432 : vector<2x16x16xf32>
      %435 = arith.addf %430, %434 : vector<2x16x16xf32>
      %c74 = arith.constant 74 : index
      %436 = memref.load %arg3[%c74] : memref<98xf32, #tpu.memory_space<smem>>
      %437 = vector.extract_strided_slice %415 {offsets = [0, 0, 4], sizes = [2, 16, 16], strides = [1, 1, 1]} : vector<2x16x22xf32> to vector<2x16x16xf32>
      %438 = vector.broadcast %436 : f32 to vector<2x16x16xf32>
      %439 = arith.mulf %438, %437 : vector<2x16x16xf32>
      %440 = arith.addf %435, %439 : vector<2x16x16xf32>
      %c75 = arith.constant 75 : index
      %441 = memref.load %arg3[%c75] : memref<98xf32, #tpu.memory_space<smem>>
      %442 = vector.extract_strided_slice %415 {offsets = [0, 0, 5], sizes = [2, 16, 16], strides = [1, 1, 1]} : vector<2x16x22xf32> to vector<2x16x16xf32>
      %443 = vector.broadcast %441 : f32 to vector<2x16x16xf32>
      %444 = arith.mulf %443, %442 : vector<2x16x16xf32>
      %445 = arith.addf %440, %444 : vector<2x16x16xf32>
      %c76 = arith.constant 76 : index
      %446 = memref.load %arg3[%c76] : memref<98xf32, #tpu.memory_space<smem>>
      %447 = vector.extract_strided_slice %415 {offsets = [0, 0, 6], sizes = [2, 16, 16], strides = [1, 1, 1]} : vector<2x16x22xf32> to vector<2x16x16xf32>
      %448 = vector.broadcast %446 : f32 to vector<2x16x16xf32>
      %449 = arith.mulf %448, %447 : vector<2x16x16xf32>
      %450 = arith.addf %445, %449 : vector<2x16x16xf32>
      %c1_105 = arith.constant 1 : index
      %c0_106 = arith.constant 0 : index
      %c4_107 = arith.constant 4 : index
      %c0_108 = arith.constant 0 : index
      %451 = vector.load %arg5[%c1_105, %c0_106, %c4_107, %c0_108] : memref<2x2x22x22xf32, #tpu.memory_space<vmem>>, vector<1x2x16x22xf32>
      %452 = vector.shape_cast %451 : vector<1x2x16x22xf32> to vector<2x16x22xf32>
      %c77 = arith.constant 77 : index
      %453 = memref.load %arg3[%c77] : memref<98xf32, #tpu.memory_space<smem>>
      %454 = vector.extract_strided_slice %452 {offsets = [0, 0, 0], sizes = [2, 16, 16], strides = [1, 1, 1]} : vector<2x16x22xf32> to vector<2x16x16xf32>
      %455 = vector.broadcast %453 : f32 to vector<2x16x16xf32>
      %456 = arith.mulf %455, %454 : vector<2x16x16xf32>
      %457 = arith.addf %413, %456 : vector<2x16x16xf32>
      %c78 = arith.constant 78 : index
      %458 = memref.load %arg3[%c78] : memref<98xf32, #tpu.memory_space<smem>>
      %459 = vector.extract_strided_slice %452 {offsets = [0, 0, 1], sizes = [2, 16, 16], strides = [1, 1, 1]} : vector<2x16x22xf32> to vector<2x16x16xf32>
      %460 = vector.broadcast %458 : f32 to vector<2x16x16xf32>
      %461 = arith.mulf %460, %459 : vector<2x16x16xf32>
      %462 = arith.addf %457, %461 : vector<2x16x16xf32>
      %c79 = arith.constant 79 : index
      %463 = memref.load %arg3[%c79] : memref<98xf32, #tpu.memory_space<smem>>
      %464 = vector.extract_strided_slice %452 {offsets = [0, 0, 2], sizes = [2, 16, 16], strides = [1, 1, 1]} : vector<2x16x22xf32> to vector<2x16x16xf32>
      %465 = vector.broadcast %463 : f32 to vector<2x16x16xf32>
      %466 = arith.mulf %465, %464 : vector<2x16x16xf32>
      %467 = arith.addf %462, %466 : vector<2x16x16xf32>
      %c80 = arith.constant 80 : index
      %468 = memref.load %arg3[%c80] : memref<98xf32, #tpu.memory_space<smem>>
      %469 = vector.extract_strided_slice %452 {offsets = [0, 0, 3], sizes = [2, 16, 16], strides = [1, 1, 1]} : vector<2x16x22xf32> to vector<2x16x16xf32>
      %470 = vector.broadcast %468 : f32 to vector<2x16x16xf32>
      %471 = arith.mulf %470, %469 : vector<2x16x16xf32>
      %472 = arith.addf %467, %471 : vector<2x16x16xf32>
      %c81 = arith.constant 81 : index
      %473 = memref.load %arg3[%c81] : memref<98xf32, #tpu.memory_space<smem>>
      %474 = vector.extract_strided_slice %452 {offsets = [0, 0, 4], sizes = [2, 16, 16], strides = [1, 1, 1]} : vector<2x16x22xf32> to vector<2x16x16xf32>
      %475 = vector.broadcast %473 : f32 to vector<2x16x16xf32>
      %476 = arith.mulf %475, %474 : vector<2x16x16xf32>
      %477 = arith.addf %472, %476 : vector<2x16x16xf32>
      %c82 = arith.constant 82 : index
      %478 = memref.load %arg3[%c82] : memref<98xf32, #tpu.memory_space<smem>>
      %479 = vector.extract_strided_slice %452 {offsets = [0, 0, 5], sizes = [2, 16, 16], strides = [1, 1, 1]} : vector<2x16x22xf32> to vector<2x16x16xf32>
      %480 = vector.broadcast %478 : f32 to vector<2x16x16xf32>
      %481 = arith.mulf %480, %479 : vector<2x16x16xf32>
      %482 = arith.addf %477, %481 : vector<2x16x16xf32>
      %c83 = arith.constant 83 : index
      %483 = memref.load %arg3[%c83] : memref<98xf32, #tpu.memory_space<smem>>
      %484 = vector.extract_strided_slice %452 {offsets = [0, 0, 6], sizes = [2, 16, 16], strides = [1, 1, 1]} : vector<2x16x22xf32> to vector<2x16x16xf32>
      %485 = vector.broadcast %483 : f32 to vector<2x16x16xf32>
      %486 = arith.mulf %485, %484 : vector<2x16x16xf32>
      %487 = arith.addf %482, %486 : vector<2x16x16xf32>
      %c1_109 = arith.constant 1 : index
      %c0_110 = arith.constant 0 : index
      %c5_111 = arith.constant 5 : index
      %c0_112 = arith.constant 0 : index
      %488 = vector.load %arg5[%c1_109, %c0_110, %c5_111, %c0_112] : memref<2x2x22x22xf32, #tpu.memory_space<vmem>>, vector<1x2x16x22xf32>
      %489 = vector.shape_cast %488 : vector<1x2x16x22xf32> to vector<2x16x22xf32>
      %c84 = arith.constant 84 : index
      %490 = memref.load %arg3[%c84] : memref<98xf32, #tpu.memory_space<smem>>
      %491 = vector.extract_strided_slice %489 {offsets = [0, 0, 0], sizes = [2, 16, 16], strides = [1, 1, 1]} : vector<2x16x22xf32> to vector<2x16x16xf32>
      %492 = vector.broadcast %490 : f32 to vector<2x16x16xf32>
      %493 = arith.mulf %492, %491 : vector<2x16x16xf32>
      %494 = arith.addf %450, %493 : vector<2x16x16xf32>
      %c85 = arith.constant 85 : index
      %495 = memref.load %arg3[%c85] : memref<98xf32, #tpu.memory_space<smem>>
      %496 = vector.extract_strided_slice %489 {offsets = [0, 0, 1], sizes = [2, 16, 16], strides = [1, 1, 1]} : vector<2x16x22xf32> to vector<2x16x16xf32>
      %497 = vector.broadcast %495 : f32 to vector<2x16x16xf32>
      %498 = arith.mulf %497, %496 : vector<2x16x16xf32>
      %499 = arith.addf %494, %498 : vector<2x16x16xf32>
      %c86 = arith.constant 86 : index
      %500 = memref.load %arg3[%c86] : memref<98xf32, #tpu.memory_space<smem>>
      %501 = vector.extract_strided_slice %489 {offsets = [0, 0, 2], sizes = [2, 16, 16], strides = [1, 1, 1]} : vector<2x16x22xf32> to vector<2x16x16xf32>
      %502 = vector.broadcast %500 : f32 to vector<2x16x16xf32>
      %503 = arith.mulf %502, %501 : vector<2x16x16xf32>
      %504 = arith.addf %499, %503 : vector<2x16x16xf32>
      %c87 = arith.constant 87 : index
      %505 = memref.load %arg3[%c87] : memref<98xf32, #tpu.memory_space<smem>>
      %506 = vector.extract_strided_slice %489 {offsets = [0, 0, 3], sizes = [2, 16, 16], strides = [1, 1, 1]} : vector<2x16x22xf32> to vector<2x16x16xf32>
      %507 = vector.broadcast %505 : f32 to vector<2x16x16xf32>
      %508 = arith.mulf %507, %506 : vector<2x16x16xf32>
      %509 = arith.addf %504, %508 : vector<2x16x16xf32>
      %c88 = arith.constant 88 : index
      %510 = memref.load %arg3[%c88] : memref<98xf32, #tpu.memory_space<smem>>
      %511 = vector.extract_strided_slice %489 {offsets = [0, 0, 4], sizes = [2, 16, 16], strides = [1, 1, 1]} : vector<2x16x22xf32> to vector<2x16x16xf32>
      %512 = vector.broadcast %510 : f32 to vector<2x16x16xf32>
      %513 = arith.mulf %512, %511 : vector<2x16x16xf32>
      %514 = arith.addf %509, %513 : vector<2x16x16xf32>
      %c89 = arith.constant 89 : index
      %515 = memref.load %arg3[%c89] : memref<98xf32, #tpu.memory_space<smem>>
      %516 = vector.extract_strided_slice %489 {offsets = [0, 0, 5], sizes = [2, 16, 16], strides = [1, 1, 1]} : vector<2x16x22xf32> to vector<2x16x16xf32>
      %517 = vector.broadcast %515 : f32 to vector<2x16x16xf32>
      %518 = arith.mulf %517, %516 : vector<2x16x16xf32>
      %519 = arith.addf %514, %518 : vector<2x16x16xf32>
      %c90 = arith.constant 90 : index
      %520 = memref.load %arg3[%c90] : memref<98xf32, #tpu.memory_space<smem>>
      %521 = vector.extract_strided_slice %489 {offsets = [0, 0, 6], sizes = [2, 16, 16], strides = [1, 1, 1]} : vector<2x16x22xf32> to vector<2x16x16xf32>
      %522 = vector.broadcast %520 : f32 to vector<2x16x16xf32>
      %523 = arith.mulf %522, %521 : vector<2x16x16xf32>
      %524 = arith.addf %519, %523 : vector<2x16x16xf32>
      %c1_113 = arith.constant 1 : index
      %c0_114 = arith.constant 0 : index
      %c6_115 = arith.constant 6 : index
      %c0_116 = arith.constant 0 : index
      %525 = vector.load %arg5[%c1_113, %c0_114, %c6_115, %c0_116] : memref<2x2x22x22xf32, #tpu.memory_space<vmem>>, vector<1x2x16x22xf32>
      %526 = vector.shape_cast %525 : vector<1x2x16x22xf32> to vector<2x16x22xf32>
      %c91 = arith.constant 91 : index
      %527 = memref.load %arg3[%c91] : memref<98xf32, #tpu.memory_space<smem>>
      %528 = vector.extract_strided_slice %526 {offsets = [0, 0, 0], sizes = [2, 16, 16], strides = [1, 1, 1]} : vector<2x16x22xf32> to vector<2x16x16xf32>
      %529 = vector.broadcast %527 : f32 to vector<2x16x16xf32>
      %530 = arith.mulf %529, %528 : vector<2x16x16xf32>
      %531 = arith.addf %487, %530 : vector<2x16x16xf32>
      %c92 = arith.constant 92 : index
      %532 = memref.load %arg3[%c92] : memref<98xf32, #tpu.memory_space<smem>>
      %533 = vector.extract_strided_slice %526 {offsets = [0, 0, 1], sizes = [2, 16, 16], strides = [1, 1, 1]} : vector<2x16x22xf32> to vector<2x16x16xf32>
      %534 = vector.broadcast %532 : f32 to vector<2x16x16xf32>
      %535 = arith.mulf %534, %533 : vector<2x16x16xf32>
      %536 = arith.addf %531, %535 : vector<2x16x16xf32>
      %c93 = arith.constant 93 : index
      %537 = memref.load %arg3[%c93] : memref<98xf32, #tpu.memory_space<smem>>
      %538 = vector.extract_strided_slice %526 {offsets = [0, 0, 2], sizes = [2, 16, 16], strides = [1, 1, 1]} : vector<2x16x22xf32> to vector<2x16x16xf32>
      %539 = vector.broadcast %537 : f32 to vector<2x16x16xf32>
      %540 = arith.mulf %539, %538 : vector<2x16x16xf32>
      %541 = arith.addf %536, %540 : vector<2x16x16xf32>
      %c94 = arith.constant 94 : index
      %542 = memref.load %arg3[%c94] : memref<98xf32, #tpu.memory_space<smem>>
      %543 = vector.extract_strided_slice %526 {offsets = [0, 0, 3], sizes = [2, 16, 16], strides = [1, 1, 1]} : vector<2x16x22xf32> to vector<2x16x16xf32>
      %544 = vector.broadcast %542 : f32 to vector<2x16x16xf32>
      %545 = arith.mulf %544, %543 : vector<2x16x16xf32>
      %546 = arith.addf %541, %545 : vector<2x16x16xf32>
      %c95 = arith.constant 95 : index
      %547 = memref.load %arg3[%c95] : memref<98xf32, #tpu.memory_space<smem>>
      %548 = vector.extract_strided_slice %526 {offsets = [0, 0, 4], sizes = [2, 16, 16], strides = [1, 1, 1]} : vector<2x16x22xf32> to vector<2x16x16xf32>
      %549 = vector.broadcast %547 : f32 to vector<2x16x16xf32>
      %550 = arith.mulf %549, %548 : vector<2x16x16xf32>
      %551 = arith.addf %546, %550 : vector<2x16x16xf32>
      %c96 = arith.constant 96 : index
      %552 = memref.load %arg3[%c96] : memref<98xf32, #tpu.memory_space<smem>>
      %553 = vector.extract_strided_slice %526 {offsets = [0, 0, 5], sizes = [2, 16, 16], strides = [1, 1, 1]} : vector<2x16x22xf32> to vector<2x16x16xf32>
      %554 = vector.broadcast %552 : f32 to vector<2x16x16xf32>
      %555 = arith.mulf %554, %553 : vector<2x16x16xf32>
      %556 = arith.addf %551, %555 : vector<2x16x16xf32>
      %c97 = arith.constant 97 : index
      %557 = memref.load %arg3[%c97] : memref<98xf32, #tpu.memory_space<smem>>
      %558 = vector.extract_strided_slice %526 {offsets = [0, 0, 6], sizes = [2, 16, 16], strides = [1, 1, 1]} : vector<2x16x22xf32> to vector<2x16x16xf32>
      %559 = vector.broadcast %557 : f32 to vector<2x16x16xf32>
      %560 = arith.mulf %559, %558 : vector<2x16x16xf32>
      %561 = arith.addf %556, %560 : vector<2x16x16xf32>
      %562 = arith.addf %302, %265 : vector<2x16x16xf32>
      %563 = arith.addf %561, %524 : vector<2x16x16xf32>
      %564 = arith.addf %562, %563 : vector<2x16x16xf32>
      %565 = math.tanh %564 : vector<2x16x16xf32>
      %cst_117 = arith.constant 1.000000e+00 : f32
      %566 = vector.broadcast %cst_117 : f32 to vector<2x16x16xf32>
      %567 = arith.addf %565, %566 : vector<2x16x16xf32>
      %c0_118 = arith.constant 0 : index
      %c0_119 = arith.constant 0 : index
      %c0_120 = arith.constant 0 : index
      %c0_121 = arith.constant 0 : index
      %568 = vector.load %arg4[%c0_118, %c0_119, %c0_120, %c0_121] : memref<2x1x16x16xf32, #tpu.memory_space<vmem>>, vector<2x1x16x16xf32>
      %569 = vector.shape_cast %568 : vector<2x1x16x16xf32> to vector<2x16x16xf32>
      %570 = vector.shape_cast %567 : vector<2x16x16xf32> to vector<2x1x16x16xf32>
      tpu.vector_store %arg4[%c0_118, %c0_119, %c0_120, %c0_121], %570 {strides = array<i32>} : memref<2x1x16x16xf32, #tpu.memory_space<vmem>>, vector<2x1x16x16xf32>,
    } else {
    }
    return
  }
  func.func @transform_0(%arg0: i32, %arg1: i32) -> (i32, i32, i32, i32) {
    %c0_i32 = arith.constant 0 : i32
    %c0_i32_0 = arith.constant 0 : i32
    %c0_i32_1 = arith.constant 0 : i32
    return %arg0, %arg1, %c0_i32, %c0_i32_0 : i32, i32, i32, i32
  }
  func.func @transform_1(%arg0: i32, %arg1: i32) -> i32 {
    %c0_i32 = arith.constant 0 : i32
    %c0_i32_0 = arith.constant 0 : i32
    return %c0_i32 : i32
  }
  func.func @transform_2(%arg0: i32, %arg1: i32) -> (i32, i32, i32, i32) {
    %c0_i32 = arith.constant 0 : i32
    %c0_i32_0 = arith.constant 0 : i32
    %c0_i32_1 = arith.constant 0 : i32
    %c0_i32_2 = arith.constant 0 : i32
    return %arg0, %c0_i32, %c0_i32_0, %c0_i32_1 : i32, i32, i32, i32
  }
}

</mosaic_0001>

<bundles_post_ra>
// kernel: tpu_custom_call.1
= control target key start
LH: loop header
LB: loop body
LE: loop exit
PB: predicated region body
PF: predicated region fallthrough
CT: control target
= control target key end

     0   :  { %7 = vsyncpa [#allocation6], 0  ;;  %s4229_s0 = inlined_call_operand.hbm [shape: f32[2,4,16,16], index: 0, kind: input, shape index: {}]   ;;  %s4230_s1 = inlined_call_operand.vmem [shape: f32[98], index: 1, kind: input, shape index: {}]   ;;  %s4231_s2 = inlined_call_operand.hbm [shape: f32[2,1,16,16], index: 2, kind: output, shape index: {}]  }
   0x1   :  { %8 = vsyncpa [#allocation8], 0 }
   0x2   :  { %9 = vsyncpa [#allocation7], 0  ;;  %s2801_s9 = smov [#allocation5]   ;;  %s28_s13 = sshll.u32 %s4230_s1, 4  ;;  %s29_s13 = int_to_ptr.vmem [resolvable:$true] %s28_s13 }
   0x3   :  { %s15_s10 = sshll.u32 %s2801_s9, 4  ;;  %s2739_s16 = scalar_lea.hbm %s4229_s0, 2048  ;;  %s16_s10 = int_to_ptr.vmem [resolvable:$true] %s15_s10 }
   0x4   :  { %p2740_p0 = scmp.ne.s32.totalorder %s4229_s0, %s2739_s16  ;;  %p2743_p1 = scmp.lt.u32.totalorder %s2739_s16, %s4229_s0 }
   0x6   :  { %p2745_p2 = pnand %p2743_p1, %p2740_p0 }
   0x8   :  { %2748 = shalt.err (!%p2745_p2)
}
   0x9   :  { %s2749_s21 = scalar_lea.vmem %s16_s10, 2048  ;;  %p2754_p4 = scmp.lt.s32.totalorder %s16_s10, %s16_s10 }
   0xa   :  { %p2750_p3 = scmp.ne.s32.totalorder %s16_s10, %s2749_s21  ;;  %p2755_p5 = scmp.lt.s32.totalorder %s2749_s21, %s2749_s21 }
   0xc   :  { %p2756_p6 = por %p2755_p5, %p2754_p4 }
   0xe   :  { %p2757_p7 = pnand %p2756_p6, %p2750_p3 }
  0x10   :  { %2760 = shalt.err (!%p2757_p7)
}
  0x11   :  { %s2802_s1 = smov 128   ;;  %s2803_s22 = smov 8  }
  0x12   :  { %21 = dma.hbm_to_vmem [thread:$0]  %s4229_s0, 2048, %s16_s10, [#allocation6], %s2802_s1, %s2802_s1, %s2803_s22  }
  0x13   :  { %s2761_s25 = scalar_lea.vmem %s29_s13, 16  ;;  %p2766_p9 = scmp.lt.s32.totalorder %s29_s13, %s29_s13 }
  0x14   :  { %p2762_p8 = scmp.ne.s32.totalorder %s29_s13, %s2761_s25  ;;  %p2767_p10 = scmp.lt.s32.totalorder %s2761_s25, %s2761_s25 }
  0x16   :  { %p2768_p11 = por %p2767_p10, %p2766_p9 }
  0x18   :  { %p2769_p12 = pnand %p2768_p11, %p2762_p8 }
  0x1a   :  { %2772 = shalt.err (!%p2769_p12)
}
  0x1b   :  { %s2804_s26 = smov [#allocation9]  }
  0x1c   :  { %31 = dma.vmem_to_smem %s29_s13, 16, %s2804_s26, [#allocation8]  }
  0x1d   :  { %2795 = dma.done.wait [#allocation6], 2048  }
  0x1e   :  { %2796 = vsyncadd [#allocation6], 4294965248 }
  0x1f   :  { %2797 = dma.done.wait [#allocation8], 16  }
  0x20   :  { %2798 = vsyncadd [#allocation8], 4294967280 }
  0x21   :  { %38 = sfence }
  0x22   :  { %vm43_vm0 = vcmask 130048   ;;  %v2805_v0 = vmov -inf   ;;  %v2806_v1 = vmov 0.0   ;;  %vm136_vm1 = vcmask 23552   ;;  %v61_v2 = vld [vmem:[#allocation5 + $0x8] sm:$0xff]  ;;  %v74_v3 = vld [vmem:[#allocation5 + $0x18] sm:$0xff] }
  0x23   :  { %49 = vst.msk [vmem:[#allocation4 + $0x8] sm:$0xff] %vm43_vm0, %v2805_v0  ;;  %45 = vst.msk [vmem:[#allocation3 + $0x8] sm:$0xff] %vm43_vm0, %v2806_v1  ;;  %vm145_vm2 = vcmask 179352   ;;  %vm127_vm3 = vcmask 174080   ;;  %v60_v4 = vld [vmem:[#allocation5] sm:$0xff]  ;;  %v73_v5 = vld [vmem:[#allocation5 + $0x10] sm:$0xff] }
  0x24   :  { %44 = vst.msk [vmem:[#allocation3] sm:$0xff] %vm43_vm0, %v2806_v1  ;;  %46 = vst.msk [vmem:[#allocation3 + $0x10] sm:$0xff] %vm43_vm0, %v2806_v1  ;;  %v63_v6 = vld [vmem:[#allocation5 + $0x48] sm:$0xff]  ;;  %v76_v7 = vld [vmem:[#allocation5 + $0x58] sm:$0xff]  ;;  %s2807_s0 = smov 3   ;;  %vm170_vm4 = vcmask 154648  }
  0x25   :  { %47 = vst.msk [vmem:[#allocation3 + $0x18] sm:$0xff] %vm43_vm0, %v2806_v1  ;;  %48 = vst.msk [vmem:[#allocation4] sm:$0xff] %vm43_vm0, %v2805_v0  ;;  %v62_v8 = vld [vmem:[#allocation5 + $0x40] sm:$0xff]  ;;  %v75_v9 = vld [vmem:[#allocation5 + $0x50] sm:$0xff]  ;;  %s2618_s27 = sld [smem:[#allocation9 + $0x1]]  ;;  %s2619_s28 = sld [smem:[#allocation9 + $0x2]] }
  0x26   :  { %50 = vst.msk [vmem:[#allocation4 + $0x10] sm:$0xff] %vm43_vm0, %v2805_v0  ;;  %51 = vst.msk [vmem:[#allocation4 + $0x18] sm:$0xff] %vm43_vm0, %v2805_v0  ;;  %v87_v11 = vld [vmem:[#allocation5 + $0x28] sm:$0xff]  ;;  %v86_v20 = vld [vmem:[#allocation5 + $0x20] sm:$0xff]  ;;  %s2808_s29 = smov 127   ;;  %s2620_s30 = sld [smem:[#allocation9 + $0x3]] }
  0x27   :  { %142 = vst.msk [vmem:[#allocation2 + $0x3b] sm:$0xff] %vm136_vm1, %v2806_v1  ;;  %137 = vst.msk [vmem:[#allocation2 + $0x3] sm:$0xff] %vm136_vm1, %v2806_v1  ;;  %v89_v29 = vld [vmem:[#allocation5 + $0x68] sm:$0xff]  ;;  %v88_v30 = vld [vmem:[#allocation5 + $0x60] sm:$0xff]  ;;  %s2809_s3 = smov 126   ;;  %s2621_s4 = sld [smem:[#allocation9 + $0x4]] }
  0x28   :  { %138 = vst.msk [vmem:[#allocation2 + $0xb] sm:$0xff] %vm136_vm1, %v2806_v1  ;;  %139 = vst.msk [vmem:[#allocation2 + $0x1b] sm:$0xff] %vm136_vm1, %v2806_v1  ;;  %v100_v32 = vld [vmem:[#allocation5 + $0x38] sm:$0xff]  ;;  %v99_v33 = vld [vmem:[#allocation5 + $0x30] sm:$0xff]  ;;  %s2810_s5 = smov 125   ;;  %s2622_s6 = sld [smem:[#allocation9 + $0x5]] }
  0x29   :  { %140 = vst.msk [vmem:[#allocation2 + $0x23] sm:$0xff] %vm136_vm1, %v2806_v1  ;;  %141 = vst.msk [vmem:[#allocation2 + $0x33] sm:$0xff] %vm136_vm1, %v2806_v1  ;;  %v102_v41 = vld [vmem:[#allocation5 + $0x78] sm:$0xff]  ;;  %v101_v42 = vld [vmem:[#allocation5 + $0x70] sm:$0xff]  ;;  %s2811_s7 = smov 124   ;;  %s2623_s8 = sld [smem:[#allocation9 + $0x6]] }
  0x2a   :  { %143 = vst.msk [vmem:[#allocation2 + $0x4b] sm:$0xff] %vm136_vm1, %v2806_v1  ;;  %144 = vst.msk [vmem:[#allocation2 + $0x53] sm:$0xff] %vm136_vm1, %v2806_v1  ;;  %v57_v10 = vld [vmem:[#allocation4 + $0x8] sm:$0xff]  ;;  %s2812_s9 = smov 123   ;;  %s2625_s10 = sld [smem:[#allocation9 + $0x8]] }
  0x2b   :  { %151 = vst.msk [vmem:[#allocation2 + $0x3b] sm:$0xff] %vm145_vm2, %v2806_v1  ;;  %150 = vst.msk [vmem:[#allocation2 + $0x33] sm:$0xff] %vm145_vm2, %v2806_v1  ;;  %v53_v12 = vld [vmem:[#allocation3 + $0x8] sm:$0xff]  ;;  %v69_v14 = vmax.f32 %v57_v10, %v61_v2  ;;  %v52_v17 = vld [vmem:[#allocation3] sm:$0xff]  ;;  %s2813_s11 = smov 122   ;;  %s2626_s12 = sld [smem:[#allocation9 + $0x9]] }
  0x2c   :  { %146 = vst.msk [vmem:[#allocation2 + $0x3] sm:$0xff] %vm145_vm2, %v2806_v1  ;;  %147 = vst.msk [vmem:[#allocation2 + $0xb] sm:$0xff] %vm145_vm2, %v2806_v1  ;;  %v56_v13 = vld [vmem:[#allocation4] sm:$0xff]  ;;  %v65_v15 = vadd.f32 %v61_v2, %v53_v12  ;;  %v64_v21 = vadd.f32 %v60_v4, %v52_v17  ;;  %v54_v24 = vld [vmem:[#allocation3 + $0x10] sm:$0xff]  ;;  %s2627_s13 = sld [smem:[#allocation9 + $0xa]]  ;;  %s2628_s14 = sld [smem:[#allocation9 + $0xb]] }
  0x2d   :  { %148 = vst.msk [vmem:[#allocation2 + $0x1b] sm:$0xff] %vm145_vm2, %v2806_v1  ;;  %149 = vst.msk [vmem:[#allocation2 + $0x23] sm:$0xff] %vm145_vm2, %v2806_v1  ;;  %v68_v16 = vmax.f32 %v56_v13, %v60_v4  ;;  %v59_v18 = vld [vmem:[#allocation4 + $0x18] sm:$0xff]  ;;  %v58_v19 = vld [vmem:[#allocation4 + $0x10] sm:$0xff]  ;;  %v82_v26 = vmax.f32 %v69_v14, %v74_v3  ;;  %v66_v31 = vadd.f32 %v62_v8, %v54_v24  ;;  %v237_v13 = vstv %s2619_s28  ;;  %s2629_s15 = sld [smem:[#allocation9 + $0xc]]  ;;  %s2630_s16 = sld [smem:[#allocation9 + $0xd]] }
  0x2e   :  { %152 = vst.msk [vmem:[#allocation2 + $0x4b] sm:$0xff] %vm145_vm2, %v2806_v1  ;;  %153 = vst.msk [vmem:[#allocation2 + $0x53] sm:$0xff] %vm145_vm2, %v2806_v1  ;;  %v71_v22 = vmax.f32 %v59_v18, %v63_v6  ;;  %v70_v23 = vmax.f32 %v58_v19, %v62_v8  ;;  %v55_v25 = vld [vmem:[#allocation3 + $0x18] sm:$0xff]  ;;  %v78_v27 = vadd.f32 %v74_v3, %v65_v15  ;;  %v263_v19 = vstv %s2620_s30  ;;  %s2632_s17 = sld [smem:[#allocation9 + $0xf]]  ;;  %s2633_s18 = sld [smem:[#allocation9 + $0x10]] }
  0x2f   :  { %128 = vst.msk [vmem:[#allocation2] sm:$0x7] %vm127_vm3, %v2806_v1  ;;  %129 = vst.msk [vmem:[#allocation2 + $0x18] sm:$0x7] %vm127_vm3, %v2806_v1  ;;  %v81_v28 = vmax.f32 %v68_v16, %v73_v5  ;;  %v77_v34 = vadd.f32 %v73_v5, %v64_v21  ;;  %v67_v37 = vadd.f32 %v63_v6, %v55_v25  ;;  %v211_v6 = vstv %s2618_s27  ;;  %s2634_s19 = sld [smem:[#allocation9 + $0x11]]  ;;  %s2635_s20 = sld [smem:[#allocation9 + $0x12]] }
  0x30   :  { %130 = vst.msk [vmem:[#allocation2 + $0x30] sm:$0x7] %vm127_vm3, %v2806_v1  ;;  %131 = vst.msk [vmem:[#allocation2 + $0x48] sm:$0x7] %vm127_vm3, %v2806_v1  ;;  %v84_v35 = vmax.f32 %v71_v22, %v76_v7  ;;  %v83_v36 = vmax.f32 %v70_v23, %v75_v9  ;;  %v95_v38 = vmax.f32 %v82_v26, %v87_v11  ;;  %v289_v24 = vstv %s2621_s4  ;;  %s2636_s21 = sld [smem:[#allocation9 + $0x13]]  ;;  %s2637_s23 = sld [smem:[#allocation9 + $0x14]] }
  0x31   :  { %132 = vst.msk [vmem:[#allocation2 + $0x13] sm:$0x7] %vm127_vm3, %v2806_v1  ;;  %133 = vst.msk [vmem:[#allocation2 + $0x2b] sm:$0x7] %vm127_vm3, %v2806_v1  ;;  %v91_v39 = vadd.f32 %v87_v11, %v78_v27  ;;  %v94_v40 = vmax.f32 %v81_v28, %v86_v20  ;;  %v79_v43 = vadd.f32 %v75_v9, %v66_v31  ;;  %s2639_s24 = sld [smem:[#allocation9 + $0x16]]  ;;  %s200_s25 = sld [smem:[#allocation9]] }
  0x32   :  { %134 = vst.msk [vmem:[#allocation2 + $0x43] sm:$0x7] %vm127_vm3, %v2806_v1  ;;  %135 = vst.msk [vmem:[#allocation2 + $0x5b] sm:$0x7] %vm127_vm3, %v2806_v1  ;;  %v90_v44 = vadd.f32 %v86_v20, %v77_v34  ;;  %v97_v45 = vmax.f32 %v84_v35, %v89_v29  ;;  %v96_v46 = vmax.f32 %v83_v36, %v88_v30  ;;  %v341_v34 = vstv %s2623_s8  ;;  %s2640_s26 = sld [smem:[#allocation9 + $0x17]]  ;;  %s2641_s27 = sld [smem:[#allocation9 + $0x18]] }
  0x33   :  { %v80_v47 = vadd.f32 %v76_v7, %v67_v37  ;;  %v108_v48 = vmax.f32 %v95_v38, %v100_v32  ;;  %v104_v49 = vadd.f32 %v100_v32, %v91_v39  ;;  %v107_v50 = vmax.f32 %v94_v40, %v99_v33  ;;  %s2642_s28 = sld [smem:[#allocation9 + $0x19]]  ;;  %s2643_s30 = sld [smem:[#allocation9 + $0x1a]] }
  0x34   :  { %v92_v51 = vadd.f32 %v88_v30, %v79_v43  ;;  %v103_v52 = vadd.f32 %v99_v33, %v90_v44  ;;  %v110_v53 = vmax.f32 %v97_v45, %v102_v41  ;;  %v109_v54 = vmax.f32 %v96_v46, %v101_v42  ;;  %s2644_s4 = sld [smem:[#allocation9 + $0x1b]]  ;;  %s2624_s8 = sld [smem:[#allocation9 + $0x7]] }
  0x35   :  { %v93_v55 = vadd.f32 %v89_v29, %v80_v47  ;;  %181 = vrot.lane.b32.xlu1 %v108_v48, %s2807_s0  ;;  %113 = vst.msk [vmem:[#allocation3 + $0x8] sm:$0xff] %vm43_vm0, %v104_v49  ;;  %117 = vst.msk [vmem:[#allocation4 + $0x8] sm:$0xff] %vm43_vm0, %v108_v48  ;;  %179 = vrot.lane.b32.xlu0 %v107_v50, %s2807_s0  ;;  %v124_v61 = vmul.f32 0.25, %v104_v49  ;;  %v315_v29 = vstv %s2622_s6  ;;  %v381_v40 = vstv %s2625_s10  ;;  %s2646_s6 = sld [smem:[#allocation9 + $0x1d]]  ;;  %s2647_s10 = sld [smem:[#allocation9 + $0x1e]] }
  0x36   :  { %116 = vst.msk [vmem:[#allocation4] sm:$0xff] %vm43_vm0, %v107_v50  ;;  %v105_v56 = vadd.f32 %v101_v42, %v92_v51  ;;  %112 = vst.msk [vmem:[#allocation3] sm:$0xff] %vm43_vm0, %v103_v52  ;;  %v123_v59 = vmul.f32 0.25, %v103_v52  ;;  %v407_v47 = vstv %s2626_s12  ;;  %s2638_s12 = sld [smem:[#allocation9 + $0x15]] }
  0x37   :  { %119 = vst.msk [vmem:[#allocation4 + $0x18] sm:$0xff] %vm43_vm0, %v110_v53  ;;  %118 = vst.msk [vmem:[#allocation4 + $0x10] sm:$0xff] %vm43_vm0, %v109_v54  ;;  %v106_v57 = vadd.f32 %v102_v41, %v93_v55 }
  0x38   :  { %114 = vst.msk [vmem:[#allocation3 + $0x10] sm:$0xff] %vm43_vm0, %v105_v56  ;;  %v125_v58 = vmul.f32 0.25, %v105_v56 }
  0x39   :  { %115 = vst.msk [vmem:[#allocation3 + $0x18] sm:$0xff] %vm43_vm0, %v106_v57  ;;  %185 = vrot.lane.b32.xlu1 %v110_v53, %s2807_s0  ;;  %183 = vrot.lane.b32.xlu0 %v109_v54, %s2807_s0  ;;  %v126_v60 = vmul.f32 0.25, %v106_v57  ;;  %v433_v53 = vstv %s2627_s13  ;;  %s2648_s13 = sld [smem:[#allocation9 + $0x1f]] }
  0x3d   :  { %162 = vrot.lane.b32.xlu1 %v125_v58, %s2807_s0  ;;  %158 = vrot.lane.b32.xlu0 %v123_v59, %s2807_s0  ;;  %v459_v58 = vstv %s2628_s14  ;;  %s2649_s14 = sld [smem:[#allocation9 + $0x20]] }
  0x41   :  { %164 = vrot.lane.b32.xlu1 %v126_v60, %s2807_s0  ;;  %160 = vrot.lane.b32.xlu0 %v124_v61, %s2807_s0  ;;  %s2631_s0 = sld [smem:[#allocation9 + $0xe]] }
  0xa7   :  { %v182_v62 = vpop.permute.xlu1 %181  ;;  %v180_v63 = vpop.permute.xlu0 %179 }
  0xa8   :  { %193 = vst.msk [vmem:[#allocation2 + $0x3b] sm:$0xff] %vm170_vm4, %v182_v62  ;;  %192 = vst.msk [vmem:[#allocation2 + $0x33] sm:$0xff] %vm170_vm4, %v180_v63  ;;  %v485_v63 = vstv %s2629_s15  ;;  %s2650_s15 = sld [smem:[#allocation9 + $0x21]] }
  0xab   :  { %v186_v0 = vpop.permute.xlu1 %185  ;;  %v184_v1 = vpop.permute.xlu0 %183 }
  0xac   :  { %195 = vst.msk [vmem:[#allocation2 + $0x53] sm:$0xff] %vm170_vm4, %v186_v0  ;;  %194 = vst.msk [vmem:[#allocation2 + $0x4b] sm:$0xff] %vm170_vm4, %v184_v1 }
  0xaf   :  { %v163_v2 = vpop.permute.xlu1 %162  ;;  %v159_v3 = vpop.permute.xlu0 %158 }
  0xb0   :  { %173 = vst.msk [vmem:[#allocation2 + $0x1b] sm:$0xff] %vm170_vm4, %v163_v2  ;;  %171 = vst.msk [vmem:[#allocation2 + $0x3] sm:$0xff] %vm170_vm4, %v159_v3 }
  0xb3   :  { %v165_v4 = vpop.permute.xlu1 %164  ;;  %v161_v5 = vpop.permute.xlu0 %160 }
  0xb4   :  { %174 = vst.msk [vmem:[#allocation2 + $0x23] sm:$0xff] %vm170_vm4, %v165_v4  ;;  %172 = vst.msk [vmem:[#allocation2 + $0xb] sm:$0xff] %vm170_vm4, %v161_v5  ;;  %v511_v4 = vstv %s2630_s16  ;;  %s2651_s16 = sld [smem:[#allocation9 + $0x22]] }
  0xb7   :  { %v2880_v7 = vld [vmem:[#allocation2] sm:$0xff]  ;;  %v2882_v8 = vld [vmem:[#allocation2 + $0x18] sm:$0xff] }
  0xb8   :  { %v212_v9 = vmul.f32 %v211_v6, %v2880_v7  ;;  %v214_v10 = vmul.f32 %v211_v6, %v2882_v8  ;;  %v238_v15 = vmul.f32 %v237_v13, %v2880_v7  ;;  %v240_v17 = vmul.f32 %v237_v13, %v2882_v8  ;;  %v2932_v39 = vld [vmem:[#allocation2 + $0x1] sm:$0xff]  ;;  %v2938_v43 = vld [vmem:[#allocation2 + $0x19] sm:$0xff] }
  0xb9   :  { %v264_v20 = vmul.f32 %v263_v19, %v2880_v7  ;;  %v266_v22 = vmul.f32 %v263_v19, %v2882_v8  ;;  %v290_v25 = vmul.f32 %v289_v24, %v2880_v7  ;;  %v292_v27 = vmul.f32 %v289_v24, %v2882_v8 }
  0xba   :  { %220 = vrot.lane.b32.xlu0 %v212_v9, %s2808_s29  ;;  %v316_v30 = vmul.f32 %v315_v29, %v2880_v7  ;;  %v318_v32 = vmul.f32 %v315_v29, %v2882_v8  ;;  %v342_v35 = vmul.f32 %v341_v34, %v2880_v7  ;;  %v344_v37 = vmul.f32 %v341_v34, %v2882_v8 }
  0xbb   :  { %v2887_v11 = vld [vmem:[#allocation2 + $0x8] sm:$0xff]  ;;  %v2890_v14 = vld [vmem:[#allocation2 + $0x20] sm:$0xff]  ;;  %v382_v41 = vmul.f32 %v381_v40, %v2932_v39  ;;  %v384_v45 = vmul.f32 %v381_v40, %v2938_v43  ;;  %v408_v49 = vmul.f32 %v407_v47, %v2932_v39  ;;  %v410_v51 = vmul.f32 %v407_v47, %v2938_v43 }
  0xbc   :  { %v213_v12 = vmul.f32 %v211_v6, %v2887_v11  ;;  %v215_v16 = vmul.f32 %v211_v6, %v2890_v14  ;;  %v239_v18 = vmul.f32 %v237_v13, %v2887_v11  ;;  %v241_v21 = vmul.f32 %v237_v13, %v2890_v14  ;;  %v2940_v44 = vld [vmem:[#allocation2 + $0x9] sm:$0xff]  ;;  %v2946_v48 = vld [vmem:[#allocation2 + $0x21] sm:$0xff] }
  0xbd   :  { %v265_v23 = vmul.f32 %v263_v19, %v2887_v11  ;;  %v267_v26 = vmul.f32 %v263_v19, %v2890_v14  ;;  %v291_v28 = vmul.f32 %v289_v24, %v2887_v11  ;;  %v293_v31 = vmul.f32 %v289_v24, %v2890_v14 }
  0xbe   :  { %224 = vrot.lane.b32.xlu0 %v214_v10, %s2808_s29  ;;  %222 = vrot.lane.b32.xlu1 %v213_v12, %s2808_s29  ;;  %v317_v33 = vmul.f32 %v315_v29, %v2887_v11  ;;  %v319_v36 = vmul.f32 %v315_v29, %v2890_v14  ;;  %v343_v38 = vmul.f32 %v341_v34, %v2887_v11  ;;  %v2988_v12 = vld [vmem:[#allocation2 + $0x2] sm:$0xff]  ;;  %v551_v13 = vstv %s2632_s17  ;;  %s2653_s17 = sld [smem:[#allocation9 + $0x24]] }
  0xbf   :  { %v345_v42 = vmul.f32 %v341_v34, %v2890_v14  ;;  %v383_v46 = vmul.f32 %v381_v40, %v2940_v44  ;;  %v385_v50 = vmul.f32 %v381_v40, %v2946_v48  ;;  %v409_v52 = vmul.f32 %v407_v47, %v2940_v44 }
  0xc0   :  { %v434_v54 = vmul.f32 %v433_v53, %v2932_v39  ;;  %v411_v55 = vmul.f32 %v407_v47, %v2946_v48  ;;  %v436_v56 = vmul.f32 %v433_v53, %v2938_v43  ;;  %v435_v57 = vmul.f32 %v433_v53, %v2940_v44 }
  0xc1   :  { %v460_v59 = vmul.f32 %v459_v58, %v2932_v39  ;;  %v437_v60 = vmul.f32 %v433_v53, %v2946_v48  ;;  %v462_v61 = vmul.f32 %v459_v58, %v2938_v43  ;;  %v461_v62 = vmul.f32 %v459_v58, %v2940_v44 }
  0xc2   :  { %246 = vrot.lane.b32.xlu0 %v238_v15, %s2809_s3  ;;  %226 = vrot.lane.b32.xlu1 %v215_v16, %s2808_s29  ;;  %v486_v0 = vmul.f32 %v485_v63, %v2932_v39  ;;  %v463_v1 = vmul.f32 %v459_v58, %v2946_v48  ;;  %v488_v2 = vmul.f32 %v485_v63, %v2938_v43 }
  0xc3   :  { %v487_v3 = vmul.f32 %v485_v63, %v2940_v44  ;;  %v512_v5 = vmul.f32 %v511_v4, %v2932_v39  ;;  %v489_v6 = vmul.f32 %v485_v63, %v2946_v48  ;;  %v514_v9 = vmul.f32 %v511_v4, %v2938_v43 }
  0xc4   :  { %v513_v10 = vmul.f32 %v511_v4, %v2940_v44  ;;  %v552_v15 = vmul.f32 %v551_v13, %v2988_v12  ;;  %v515_v16 = vmul.f32 %v511_v4, %v2946_v48 }
  0xc6   :  { %250 = vrot.lane.b32.xlu0 %v240_v17, %s2809_s3  ;;  %248 = vrot.lane.b32.xlu1 %v239_v18, %s2809_s3  ;;  %v2994_v17 = vld [vmem:[#allocation2 + $0x1a] sm:$0xff]  ;;  %v2996_v18 = vld [vmem:[#allocation2 + $0xa] sm:$0xff] }
  0xc7   :  { %v554_v19 = vmul.f32 %v551_v13, %v2994_v17 }
  0xca   :  { %272 = vrot.lane.b32.xlu0 %v264_v20, %s2810_s5  ;;  %252 = vrot.lane.b32.xlu1 %v241_v21, %s2809_s3  ;;  %v553_v20 = vmul.f32 %v551_v13, %v2996_v18  ;;  %v577_v21 = vstv %s2633_s18  ;;  %s2654_s18 = sld [smem:[#allocation9 + $0x25]] }
  0xce   :  { %276 = vrot.lane.b32.xlu0 %v266_v22, %s2810_s5  ;;  %274 = vrot.lane.b32.xlu1 %v265_v23, %s2810_s5  ;;  %v3002_v22 = vld [vmem:[#allocation2 + $0x22] sm:$0xff]  ;;  %v578_v23 = vmul.f32 %v577_v21, %v2988_v12 }
  0xcf   :  { %v555_v24 = vmul.f32 %v551_v13, %v3002_v22  ;;  %v581_v29 = vmul.f32 %v577_v21, %v3002_v22  ;;  %v3067_v13 = vld [vmem:[#allocation2 + $0xb] sm:$0xff] }
  0xd2   :  { %298 = vrot.lane.b32.xlu0 %v290_v25, %s2811_s7  ;;  %278 = vrot.lane.b32.xlu1 %v267_v26, %s2810_s5  ;;  %v580_v25 = vmul.f32 %v577_v21, %v2994_v17  ;;  %v579_v26 = vmul.f32 %v577_v21, %v2996_v18 }
  0xd6   :  { %302 = vrot.lane.b32.xlu0 %v292_v27, %s2811_s7  ;;  %300 = vrot.lane.b32.xlu1 %v291_v28, %s2811_s7  ;;  %v603_v27 = vstv %s2634_s19  ;;  %s2645_s19 = sld [smem:[#allocation9 + $0x1c]] }
  0xd7   :  { %v604_v28 = vmul.f32 %v603_v27, %v2988_v12 }
  0xda   :  { %324 = vrot.lane.b32.xlu0 %v316_v30, %s2812_s9  ;;  %304 = vrot.lane.b32.xlu1 %v293_v31, %s2811_s7  ;;  %v606_v31 = vmul.f32 %v603_v27, %v2994_v17 }
  0xde   :  { %328 = vrot.lane.b32.xlu0 %v318_v32, %s2812_s9  ;;  %326 = vrot.lane.b32.xlu1 %v317_v33, %s2812_s9  ;;  %v605_v32 = vmul.f32 %v603_v27, %v2996_v18  ;;  %v629_v33 = vstv %s2635_s20  ;;  %s2655_s20 = sld [smem:[#allocation9 + $0x26]] }
  0xe2   :  { %350 = vrot.lane.b32.xlu0 %v342_v35, %s2813_s11  ;;  %330 = vrot.lane.b32.xlu1 %v319_v36, %s2812_s9  ;;  %v630_v36 = vmul.f32 %v629_v33, %v2988_v12 }
  0xe6   :  { %354 = vrot.lane.b32.xlu0 %v344_v37, %s2813_s11  ;;  %352 = vrot.lane.b32.xlu1 %v343_v38, %s2813_s11  ;;  %v607_v37 = vmul.f32 %v603_v27, %v3002_v22 }
  0xea   :  { %390 = vrot.lane.b32.xlu0 %v382_v41, %s2808_s29  ;;  %356 = vrot.lane.b32.xlu1 %v345_v42, %s2813_s11  ;;  %v632_v41 = vmul.f32 %v629_v33, %v2994_v17  ;;  %v631_v42 = vmul.f32 %v629_v33, %v2996_v18 }
  0xee   :  { %394 = vrot.lane.b32.xlu0 %v384_v45, %s2808_s29  ;;  %392 = vrot.lane.b32.xlu1 %v383_v46, %s2808_s29  ;;  %v655_v45 = vstv %s2636_s21  ;;  %s2656_s21 = sld [smem:[#allocation9 + $0x27]] }
  0xef   :  { %v658_v53 = vmul.f32 %v655_v45, %v2994_v17 }
  0xf2   :  { %416 = vrot.lane.b32.xlu0 %v408_v49, %s2809_s3  ;;  %396 = vrot.lane.b32.xlu1 %v385_v50, %s2808_s29  ;;  %v656_v49 = vmul.f32 %v655_v45, %v2988_v12  ;;  %v633_v50 = vmul.f32 %v629_v33, %v3002_v22 }
  0xf6   :  { %420 = vrot.lane.b32.xlu0 %v410_v51, %s2809_s3  ;;  %418 = vrot.lane.b32.xlu1 %v409_v52, %s2809_s3 }
  0xfa   :  { %442 = vrot.lane.b32.xlu0 %v434_v54, %s2810_s5  ;;  %422 = vrot.lane.b32.xlu1 %v411_v55, %s2809_s3  ;;  %v657_v54 = vmul.f32 %v655_v45, %v2996_v18  ;;  %v681_v55 = vstv %s2637_s23  ;;  %s2657_s23 = sld [smem:[#allocation9 + $0x28]] }
  0xfb   :  { %v682_v58 = vmul.f32 %v681_v55, %v2988_v12  ;;  %v683_v63 = vmul.f32 %v681_v55, %v2996_v18 }
  0xfe   :  { %446 = vrot.lane.b32.xlu0 %v436_v56, %s2810_s5  ;;  %444 = vrot.lane.b32.xlu1 %v435_v57, %s2810_s5 }
 0x102   :  { %468 = vrot.lane.b32.xlu0 %v460_v59, %s2811_s7  ;;  %448 = vrot.lane.b32.xlu1 %v437_v60, %s2810_s5  ;;  %v659_v59 = vmul.f32 %v655_v45, %v3002_v22 }
 0x106   :  { %472 = vrot.lane.b32.xlu0 %v462_v61, %s2811_s7  ;;  %470 = vrot.lane.b32.xlu1 %v461_v62, %s2811_s7  ;;  %v684_v62 = vmul.f32 %v681_v55, %v2994_v17 }
 0x10a   :  { %494 = vrot.lane.b32.xlu0 %v486_v0, %s2812_s9  ;;  %474 = vrot.lane.b32.xlu1 %v463_v1, %s2811_s7  ;;  %v3058_v0 = vld [vmem:[#allocation2 + $0x3] sm:$0xff]  ;;  %v721_v1 = vstv %s2639_s24  ;;  %s2658_s24 = sld [smem:[#allocation9 + $0x29]] }
 0x10b   :  { %v723_v21 = vmul.f32 %v721_v1, %v3067_v13 }
 0x10e   :  { %498 = vrot.lane.b32.xlu0 %v488_v2, %s2812_s9  ;;  %496 = vrot.lane.b32.xlu1 %v487_v3, %s2812_s9  ;;  %v201_v2 = vstv %s200_s25  ;;  %s2660_s25 = sld [smem:[#allocation9 + $0x2b]] }
 0x10f   :  { %v205_v33 = vmul.f32 %v201_v2, %v2890_v14 }
 0x112   :  { %520 = vrot.lane.b32.xlu0 %v512_v5, %s2813_s11  ;;  %500 = vrot.lane.b32.xlu1 %v489_v6, %s2812_s9  ;;  %v722_v5 = vmul.f32 %v721_v1, %v3058_v0  ;;  %v685_v6 = vmul.f32 %v681_v55, %v3002_v22 }
 0x116   :  { %524 = vrot.lane.b32.xlu0 %v514_v9, %s2813_s11  ;;  %522 = vrot.lane.b32.xlu1 %v513_v10, %s2813_s11  ;;  %v202_v9 = vmul.f32 %v201_v2, %v2880_v7  ;;  %v3065_v10 = vld [vmem:[#allocation2 + $0x1b] sm:$0xff]  ;;  %v204_v7 = vmul.f32 %v201_v2, %v2882_v8  ;;  %v541_v8 = vstv %s2631_s0  ;;  %s2652_s0 = sld [smem:[#allocation9 + $0x23]] }
 0x11a   :  { %560 = vrot.lane.b32.xlu0 %v552_v15, %s2808_s29  ;;  %526 = vrot.lane.b32.xlu1 %v515_v16, %s2813_s11 }
 0x11e   :  { %564 = vrot.lane.b32.xlu0 %v554_v19, %s2808_s29  ;;  %562 = vrot.lane.b32.xlu1 %v553_v20, %s2808_s29  ;;  %v724_v20 = vmul.f32 %v721_v1, %v3065_v10 }
 0x122   :  { %586 = vrot.lane.b32.xlu0 %v578_v23, %s2809_s3  ;;  %566 = vrot.lane.b32.xlu1 %v555_v24, %s2808_s29  ;;  %v203_v23 = vmul.f32 %v201_v2, %v2887_v11 }
 0x126   :  { %590 = vrot.lane.b32.xlu0 %v580_v25, %s2809_s3  ;;  %588 = vrot.lane.b32.xlu1 %v579_v26, %s2809_s3  ;;  %v747_v25 = vstv %s2640_s26  ;;  %v3075_v26 = vld [vmem:[#allocation2 + $0x23] sm:$0xff]  ;;  %s2661_s26 = sld [smem:[#allocation9 + $0x2c]] }
 0x127   :  { %v725_v11 = vmul.f32 %v721_v1, %v3075_v26  ;;  %v749_v14 = vmul.f32 %v747_v25, %v3067_v13 }
 0x12a   :  { %612 = vrot.lane.b32.xlu0 %v604_v28, %s2810_s5  ;;  %592 = vrot.lane.b32.xlu1 %v581_v29, %s2809_s3 }
 0x12c   :  { %v221_v30 = vpop.permute.xlu0 %220 }
 0x12d   :  { %v232_v15 = vadd.f32 %v221_v30, %v202_v9 }
 0x12e   :  { %616 = vrot.lane.b32.xlu0 %v606_v31, %s2810_s5  ;;  %614 = vrot.lane.b32.xlu1 %v605_v32, %s2810_s5  ;;  %v748_v32 = vmul.f32 %v747_v25, %v3058_v0 }
 0x130   :  { %v3022_v34 = vpop.permute.xlu1 %222  ;;  %v3024_v35 = vpop.permute.xlu0 %224 }
 0x131   :  { %v233_v27 = vadd.f32 %v3022_v34, %v203_v23  ;;  %v234_v28 = vadd.f32 %v3024_v35, %v204_v7 }
 0x132   :  { %638 = vrot.lane.b32.xlu0 %v630_v36, %s2811_s7  ;;  %618 = vrot.lane.b32.xlu1 %v607_v37, %s2810_s5 }
 0x134   :  { %v3030_v38 = vpop.permute.xlu1 %226  ;;  %v247_v40 = vpop.permute.xlu0 %246 }
 0x135   :  { %v258_v24 = vadd.f32 %v247_v40, %v232_v15  ;;  %v235_v34 = vadd.f32 %v3030_v38, %v205_v33 }
 0x136   :  { %642 = vrot.lane.b32.xlu0 %v632_v41, %s2811_s7  ;;  %640 = vrot.lane.b32.xlu1 %v631_v42, %s2811_s7 }
 0x138   :  { %v3036_v46 = vpop.permute.xlu1 %248  ;;  %v3038_v47 = vpop.permute.xlu0 %250 }
 0x139   :  { %v259_v36 = vadd.f32 %v3036_v46, %v233_v27  ;;  %v260_v37 = vadd.f32 %v3038_v47, %v234_v28  ;;  %v542_v46 = vmul.f32 %v541_v8, %v2988_v12 }
 0x13a   :  { %664 = vrot.lane.b32.xlu0 %v656_v49, %s2812_s9  ;;  %644 = vrot.lane.b32.xlu1 %v633_v50, %s2811_s7  ;;  %v750_v50 = vmul.f32 %v747_v25, %v3065_v10 }
 0x13c   :  { %v3044_v51 = vpop.permute.xlu1 %252  ;;  %v273_v52 = vpop.permute.xlu0 %272 }
 0x13d   :  { %v284_v29 = vadd.f32 %v273_v52, %v258_v24  ;;  %v773_v52 = vstv %s2641_s27  ;;  %v261_v47 = vadd.f32 %v3044_v51, %v235_v34  ;;  %v751_v51 = vmul.f32 %v747_v25, %v3075_v26  ;;  %s2662_s27 = sld [smem:[#allocation9 + $0x2d]] }
 0x13e   :  { %668 = vrot.lane.b32.xlu0 %v658_v53, %s2812_s9  ;;  %666 = vrot.lane.b32.xlu1 %v657_v54, %s2812_s9  ;;  %v774_v12 = vmul.f32 %v773_v52, %v3058_v0  ;;  %v776_v15 = vmul.f32 %v773_v52, %v3065_v10  ;;  %v777_v24 = vmul.f32 %v773_v52, %v3075_v26 }
 0x140   :  { %v275_v56 = vpop.permute.xlu1 %274  ;;  %v277_v57 = vpop.permute.xlu0 %276 }
 0x141   :  { %v285_v35 = vadd.f32 %v275_v56, %v259_v36  ;;  %v286_v41 = vadd.f32 %v277_v57, %v260_v37 }
 0x142   :  { %690 = vrot.lane.b32.xlu0 %v682_v58, %s2813_s11  ;;  %670 = vrot.lane.b32.xlu1 %v659_v59, %s2812_s9 }
 0x144   :  { %v3054_v60 = vpop.permute.xlu1 %278  ;;  %v299_v61 = vpop.permute.xlu0 %298 }
 0x145   :  { %v310_v40 = vadd.f32 %v299_v61, %v284_v29  ;;  %v287_v38 = vadd.f32 %v3054_v60, %v261_v47  ;;  %v825_v29 = vstv %s2643_s30  ;;  %v371_v47 = vstv %s2624_s8  ;;  %s2664_s30 = sld [smem:[#allocation9 + $0x2f]]  ;;  %s2668_s8 = sld [smem:[#allocation9 + $0x33]] }
 0x146   :  { %694 = vrot.lane.b32.xlu0 %v684_v62, %s2813_s11  ;;  %692 = vrot.lane.b32.xlu1 %v683_v63, %s2813_s11  ;;  %v543_v62 = vmul.f32 %v541_v8, %v2996_v18  ;;  %v775_v18 = vmul.f32 %v773_v52, %v3067_v13  ;;  %v828_v36 = vmul.f32 %v825_v29, %v3065_v10  ;;  %v3153_v52 = vld [vmem:[#allocation2 + $0x4] sm:$0xff] }
 0x147   :  { %v827_v37 = vmul.f32 %v825_v29, %v3067_v13 }
 0x148   :  { %v301_v3 = vpop.permute.xlu1 %300  ;;  %v303_v4 = vpop.permute.xlu0 %302 }
 0x149   :  { %v311_v53 = vadd.f32 %v301_v3, %v285_v35  ;;  %v312_v54 = vadd.f32 %v303_v4, %v286_v41  ;;  %v544_v3 = vmul.f32 %v541_v8, %v2994_v17  ;;  %v545_v17 = vmul.f32 %v541_v8, %v3002_v22 }
 0x14a   :  { %730 = vrot.lane.b32.xlu0 %v722_v5, %s2808_s29  ;;  %696 = vrot.lane.b32.xlu1 %v685_v6, %s2813_s11 }
 0x14c   :  { %v305_v16 = vpop.permute.xlu1 %304  ;;  %v325_v19 = vpop.permute.xlu0 %324 }
 0x14d   :  { %v336_v42 = vadd.f32 %v325_v19, %v310_v40  ;;  %v313_v63 = vadd.f32 %v305_v16, %v287_v38  ;;  %v799_v19 = vstv %s2642_s28  ;;  %v851_v40 = vstv %s2644_s4  ;;  %s2663_s28 = sld [smem:[#allocation9 + $0x2e]]  ;;  %s2665_s4 = sld [smem:[#allocation9 + $0x30]] }
 0x14e   :  { %734 = vrot.lane.b32.xlu0 %v724_v20, %s2808_s29  ;;  %732 = vrot.lane.b32.xlu1 %v723_v21, %s2808_s29  ;;  %v800_v7 = vmul.f32 %v799_v19, %v3058_v0  ;;  %v802_v27 = vmul.f32 %v799_v19, %v3065_v10  ;;  %v801_v28 = vmul.f32 %v799_v19, %v3067_v13 }
 0x14f   :  { %v852_v41 = vmul.f32 %v851_v40, %v3058_v0  ;;  %v855_v38 = vmul.f32 %v851_v40, %v3075_v26 }
 0x150   :  { %v327_v30 = vpop.permute.xlu1 %326  ;;  %v329_v31 = vpop.permute.xlu0 %328 }
 0x151   :  { %v337_v56 = vadd.f32 %v327_v30, %v311_v53  ;;  %v338_v57 = vadd.f32 %v329_v31, %v312_v54 }
 0x152   :  { %756 = vrot.lane.b32.xlu0 %v748_v32, %s2809_s3  ;;  %736 = vrot.lane.b32.xlu1 %v725_v11, %s2808_s29  ;;  %v826_v32 = vmul.f32 %v825_v29, %v3058_v0  ;;  %v803_v11 = vmul.f32 %v799_v19, %v3075_v26 }
 0x154   :  { %v331_v45 = vpop.permute.xlu1 %330  ;;  %v351_v49 = vpop.permute.xlu0 %350 }
 0x155   :  { %v362_v55 = vadd.f32 %v351_v49, %v336_v42  ;;  %v339_v60 = vadd.f32 %v331_v45, %v313_v63  ;;  %v829_v42 = vmul.f32 %v825_v29, %v3075_v26 }
 0x156   :  { %760 = vrot.lane.b32.xlu0 %v750_v50, %s2809_s3  ;;  %758 = vrot.lane.b32.xlu1 %v749_v14, %s2809_s3  ;;  %v854_v50 = vmul.f32 %v851_v40, %v3065_v10  ;;  %v853_v14 = vmul.f32 %v851_v40, %v3067_v13 }
 0x157   :  { %v3096_v58 = vadd.f32 %v542_v46, %v362_v55  ;;  %v891_v46 = vstv %s2646_s6  ;;  %s2667_s6 = sld [smem:[#allocation9 + $0x32]] }
 0x158   :  { %v353_v59 = vpop.permute.xlu1 %352  ;;  %v355_v61 = vpop.permute.xlu0 %354  ;;  %v892_v55 = vmul.f32 %v891_v46, %v3153_v52 }
 0x159   :  { %v363_v1 = vadd.f32 %v353_v59, %v337_v56  ;;  %v364_v2 = vadd.f32 %v355_v61, %v338_v57  ;;  %v372_v56 = vmul.f32 %v371_v47, %v2932_v39  ;;  %v3160_v57 = vld [vmem:[#allocation2 + $0xc] sm:$0xff]  ;;  %v3162_v59 = vld [vmem:[#allocation2 + $0x1c] sm:$0xff]  ;;  %v374_v39 = vmul.f32 %v371_v47, %v2938_v43 }
 0x15a   :  { %782 = vrot.lane.b32.xlu0 %v774_v12, %s2810_s5  ;;  %762 = vrot.lane.b32.xlu1 %v751_v51, %s2809_s3  ;;  %v894_v63 = vmul.f32 %v891_v46, %v3162_v59  ;;  %v711_v43 = vstv %s2638_s12  ;;  %s2669_s12 = sld [smem:[#allocation9 + $0x34]] }
 0x15b   :  { %v3104_v4 = vadd.f32 %v543_v62, %v363_v1  ;;  %v3106_v5 = vadd.f32 %v544_v3, %v364_v2  ;;  %v893_v62 = vmul.f32 %v891_v46, %v3160_v57  ;;  %v373_v1 = vmul.f32 %v371_v47, %v2940_v44  ;;  %v3171_v3 = vld [vmem:[#allocation2 + $0x24] sm:$0xff] }
 0x15c   :  { %v357_v6 = vpop.permute.xlu1 %356  ;;  %v3108_v9 = vpop.permute.xlu0 %390  ;;  %v895_v19 = vmul.f32 %v891_v46, %v3171_v3 }
 0x15d   :  { %v365_v16 = vadd.f32 %v357_v6, %v339_v60  ;;  %v402_v61 = vadd.f32 %v3108_v9, %v372_v56  ;;  %v917_v60 = vstv %s2647_s10  ;;  %s2659_s10 = sld [smem:[#allocation9 + $0x2a]] }
 0x15e   :  { %786 = vrot.lane.b32.xlu0 %v776_v15, %s2810_s5  ;;  %784 = vrot.lane.b32.xlu1 %v775_v18, %s2810_s5  ;;  %v918_v44 = vmul.f32 %v917_v60, %v3153_v52 }
 0x15f   :  { %v3115_v20 = vadd.f32 %v545_v17, %v365_v16  ;;  %v375_v17 = vmul.f32 %v371_v47, %v2946_v48  ;;  %v920_v48 = vmul.f32 %v917_v60, %v3162_v59 }
 0x160   :  { %v3117_v21 = vpop.permute.xlu1 %392  ;;  %v3119_v23 = vpop.permute.xlu0 %394 }
 0x161   :  { %v403_v6 = vadd.f32 %v3117_v21, %v373_v1  ;;  %v404_v9 = vadd.f32 %v3119_v23, %v374_v39 }
 0x162   :  { %808 = vrot.lane.b32.xlu0 %v800_v7, %s2811_s7  ;;  %788 = vrot.lane.b32.xlu1 %v777_v24, %s2810_s5 }
 0x164   :  { %v3125_v25 = vpop.permute.xlu1 %396  ;;  %v417_v22 = vpop.permute.xlu0 %416 }
 0x165   :  { %v428_v2 = vadd.f32 %v417_v22, %v402_v61  ;;  %v405_v21 = vadd.f32 %v3125_v25, %v375_v17 }
 0x166   :  { %812 = vrot.lane.b32.xlu0 %v802_v27, %s2811_s7  ;;  %810 = vrot.lane.b32.xlu1 %v801_v28, %s2811_s7 }
 0x168   :  { %v3131_v30 = vpop.permute.xlu1 %418  ;;  %v3133_v31 = vpop.permute.xlu0 %420 }
 0x169   :  { %v429_v7 = vadd.f32 %v3131_v30, %v403_v6  ;;  %v430_v24 = vadd.f32 %v3133_v31, %v404_v9  ;;  %v712_v30 = vmul.f32 %v711_v43, %v3058_v0  ;;  %v921_v0 = vmul.f32 %v917_v60, %v3171_v3 }
 0x16a   :  { %834 = vrot.lane.b32.xlu0 %v826_v32, %s2812_s9  ;;  %814 = vrot.lane.b32.xlu1 %v803_v11, %s2811_s7  ;;  %v919_v11 = vmul.f32 %v917_v60, %v3160_v57 }
 0x16c   :  { %v3139_v8 = vpop.permute.xlu1 %422  ;;  %v443_v33 = vpop.permute.xlu0 %442 }
 0x16d   :  { %v454_v15 = vadd.f32 %v443_v33, %v428_v2  ;;  %v943_v33 = vstv %s2648_s13  ;;  %v431_v31 = vadd.f32 %v3139_v8, %v405_v21  ;;  %s2670_s13 = sld [smem:[#allocation9 + $0x35]] }
 0x16e   :  { %838 = vrot.lane.b32.xlu0 %v828_v36, %s2812_s9  ;;  %836 = vrot.lane.b32.xlu1 %v827_v37, %s2812_s9  ;;  %v944_v8 = vmul.f32 %v943_v33, %v3153_v52  ;;  %v945_v61 = vmul.f32 %v943_v33, %v3160_v57  ;;  %v947_v39 = vmul.f32 %v943_v33, %v3171_v3 }
 0x170   :  { %v445_v34 = vpop.permute.xlu1 %444  ;;  %v447_v35 = vpop.permute.xlu0 %446 }
 0x171   :  { %v455_v23 = vadd.f32 %v445_v34, %v429_v7  ;;  %v456_v27 = vadd.f32 %v447_v35, %v430_v24 }
 0x172   :  { %860 = vrot.lane.b32.xlu0 %v852_v41, %s2813_s11  ;;  %840 = vrot.lane.b32.xlu1 %v829_v42, %s2812_s9 }
 0x174   :  { %v3149_v45 = vpop.permute.xlu1 %448  ;;  %v469_v49 = vpop.permute.xlu0 %468 }
 0x175   :  { %v480_v22 = vadd.f32 %v469_v49, %v454_v15  ;;  %v457_v25 = vadd.f32 %v3149_v45, %v431_v31  ;;  %v995_v15 = vstv %s2650_s15  ;;  %s2672_s15 = sld [smem:[#allocation9 + $0x37]] }
 0x176   :  { %864 = vrot.lane.b32.xlu0 %v854_v50, %s2813_s11  ;;  %862 = vrot.lane.b32.xlu1 %v853_v14, %s2813_s11  ;;  %v713_v50 = vmul.f32 %v711_v43, %v3067_v13  ;;  %v946_v13 = vmul.f32 %v943_v33, %v3162_v59  ;;  %v997_v7 = vmul.f32 %v995_v15, %v3160_v57  ;;  %v3241_v33 = vld [vmem:[#allocation2 + $0x5] sm:$0xff] }
 0x177   :  { %v998_v24 = vmul.f32 %v995_v15, %v3162_v59 }
 0x178   :  { %v471_v53 = vpop.permute.xlu1 %470  ;;  %v473_v54 = vpop.permute.xlu0 %472 }
 0x179   :  { %v481_v36 = vadd.f32 %v471_v53, %v455_v23  ;;  %v482_v37 = vadd.f32 %v473_v54, %v456_v27  ;;  %v714_v53 = vmul.f32 %v711_v43, %v3065_v10  ;;  %v715_v10 = vmul.f32 %v711_v43, %v3075_v26 }
 0x17a   :  { %900 = vrot.lane.b32.xlu0 %v892_v55, %s2808_s29  ;;  %866 = vrot.lane.b32.xlu1 %v855_v38, %s2813_s11  ;;  %v999_v27 = vmul.f32 %v995_v15, %v3171_v3 }
 0x17c   :  { %v475_v12 = vpop.permute.xlu1 %474  ;;  %v495_v51 = vpop.permute.xlu0 %494 }
 0x17d   :  { %v506_v28 = vadd.f32 %v495_v51, %v480_v22  ;;  %v483_v14 = vadd.f32 %v475_v12, %v457_v25  ;;  %v969_v51 = vstv %s2649_s14  ;;  %v1021_v22 = vstv %s2651_s16  ;;  %v3247_v25 = vld [vmem:[#allocation2 + $0xd] sm:$0xff]  ;;  %s2671_s14 = sld [smem:[#allocation9 + $0x36]]  ;;  %s2674_s16 = sld [smem:[#allocation9 + $0x39]] }
 0x17e   :  { %902 = vrot.lane.b32.xlu1 %v893_v62, %s2808_s29  ;;  %904 = vrot.lane.b32.xlu0 %v894_v63, %s2808_s29  ;;  %v970_v2 = vmul.f32 %v969_v51, %v3153_v52  ;;  %v971_v6 = vmul.f32 %v969_v51, %v3160_v57  ;;  %v972_v9 = vmul.f32 %v969_v51, %v3162_v59 }
 0x180   :  { %v497_v18 = vpop.permute.xlu1 %496  ;;  %v499_v16 = vpop.permute.xlu0 %498 }
 0x181   :  { %v507_v34 = vadd.f32 %v497_v18, %v481_v36  ;;  %v508_v35 = vadd.f32 %v499_v16, %v482_v37  ;;  %v1025_v37 = vmul.f32 %v1021_v22, %v3171_v3 }
 0x182   :  { %906 = vrot.lane.b32.xlu1 %v895_v19, %s2808_s29  ;;  %926 = vrot.lane.b32.xlu0 %v918_v44, %s2809_s3  ;;  %v973_v19 = vmul.f32 %v969_v51, %v3171_v3  ;;  %v996_v44 = vmul.f32 %v995_v15, %v3153_v52 }
 0x184   :  { %v501_v29 = vpop.permute.xlu1 %500  ;;  %v521_v32 = vpop.permute.xlu0 %520 }
 0x185   :  { %v532_v40 = vadd.f32 %v521_v32, %v506_v28  ;;  %v509_v45 = vadd.f32 %v501_v29, %v483_v14  ;;  %v1022_v28 = vmul.f32 %v1021_v22, %v3153_v52  ;;  %v3256_v14 = vld [vmem:[#allocation2 + $0x25] sm:$0xff] }
 0x186   :  { %928 = vrot.lane.b32.xlu1 %v919_v11, %s2809_s3  ;;  %930 = vrot.lane.b32.xlu0 %v920_v48, %s2809_s3  ;;  %v1023_v11 = vmul.f32 %v1021_v22, %v3160_v57  ;;  %v1024_v48 = vmul.f32 %v1021_v22, %v3162_v59 }
 0x187   :  { %v3192_v41 = vadd.f32 %v712_v30, %v532_v40  ;;  %v1061_v30 = vstv %s2653_s17  ;;  %s2675_s17 = sld [smem:[#allocation9 + $0x3a]] }
 0x188   :  { %v523_v42 = vpop.permute.xlu1 %522  ;;  %v525_v49 = vpop.permute.xlu0 %524  ;;  %v1062_v40 = vmul.f32 %v1061_v30, %v3241_v33 }
 0x189   :  { %v533_v46 = vadd.f32 %v523_v42, %v507_v34  ;;  %v534_v47 = vadd.f32 %v525_v49, %v508_v35  ;;  %v3249_v34 = vld [vmem:[#allocation2 + $0x1d] sm:$0xff] }
 0x18a   :  { %932 = vrot.lane.b32.xlu1 %v921_v0, %s2809_s3  ;;  %952 = vrot.lane.b32.xlu0 %v944_v8, %s2810_s5  ;;  %v1063_v0 = vmul.f32 %v1061_v30, %v3247_v25  ;;  %v1064_v8 = vmul.f32 %v1061_v30, %v3249_v34 }
 0x18b   :  { %v3200_v54 = vadd.f32 %v713_v50, %v533_v46  ;;  %v3202_v55 = vadd.f32 %v714_v53, %v534_v47  ;;  %v1087_v46 = vstv %s2654_s18  ;;  %s2676_s18 = sld [smem:[#allocation9 + $0x3b]] }
 0x18c   :  { %v527_v38 = vpop.permute.xlu1 %526  ;;  %v561_v56 = vpop.permute.xlu0 %560 }
 0x18d   :  { %v535_v12 = vadd.f32 %v527_v38, %v509_v45  ;;  %v572_v35 = vadd.f32 %v561_v56, %v3096_v58  ;;  %v1065_v56 = vmul.f32 %v1061_v30, %v3256_v14 }
 0x18e   :  { %954 = vrot.lane.b32.xlu1 %v945_v61, %s2810_s5  ;;  %956 = vrot.lane.b32.xlu0 %v946_v13, %s2810_s5  ;;  %v1088_v61 = vmul.f32 %v1087_v46, %v3241_v33 }
 0x18f   :  { %v3209_v62 = vadd.f32 %v715_v10, %v535_v12  ;;  %v881_v10 = vstv %s2645_s19  ;;  %s2677_s19 = sld [smem:[#allocation9 + $0x3c]] }
 0x190   :  { %v3211_v63 = vpop.permute.xlu1 %562  ;;  %v3213_v1 = vpop.permute.xlu0 %564  ;;  %v882_v15 = vmul.f32 %v881_v10, %v3153_v52 }
 0x191   :  { %v573_v47 = vadd.f32 %v3211_v63, %v3104_v4  ;;  %v574_v58 = vadd.f32 %v3213_v1, %v3106_v5 }
 0x192   :  { %958 = vrot.lane.b32.xlu1 %v947_v39, %s2810_s5  ;;  %978 = vrot.lane.b32.xlu0 %v970_v2, %s2811_s7 }
 0x194   :  { %v3219_v60 = vpop.permute.xlu1 %566  ;;  %v587_v26 = vpop.permute.xlu0 %586 }
 0x195   :  { %v598_v50 = vadd.f32 %v587_v26, %v572_v35  ;;  %v575_v4 = vadd.f32 %v3219_v60, %v3115_v20  ;;  %v1089_v26 = vmul.f32 %v1087_v46, %v3247_v25 }
 0x196   :  { %980 = vrot.lane.b32.xlu1 %v971_v6, %s2811_s7  ;;  %982 = vrot.lane.b32.xlu0 %v972_v9, %s2811_s7  ;;  %v1090_v6 = vmul.f32 %v1087_v46, %v3249_v34  ;;  %v1113_v9 = vstv %s2655_s20  ;;  %s2678_s20 = sld [smem:[#allocation9 + $0x3d]] }
 0x197   :  { %v1114_v52 = vmul.f32 %v1113_v9, %v3241_v33 }
 0x198   :  { %v589_v18 = vpop.permute.xlu1 %588  ;;  %v591_v16 = vpop.permute.xlu0 %590 }
 0x199   :  { %v599_v13 = vadd.f32 %v589_v18, %v573_v47  ;;  %v600_v12 = vadd.f32 %v591_v16, %v574_v58  ;;  %v1165_v58 = vstv %s2657_s23  ;;  %s2681_s23 = sld [smem:[#allocation9 + $0x40]] }
 0x19a   :  { %984 = vrot.lane.b32.xlu1 %v973_v19, %s2811_s7  ;;  %1004 = vrot.lane.b32.xlu0 %v996_v44, %s2812_s9 }
 0x19c   :  { %v3229_v43 = vpop.permute.xlu1 %592  ;;  %v613_v17 = vpop.permute.xlu0 %612 }
 0x19d   :  { %v624_v53 = vadd.f32 %v613_v17, %v598_v50  ;;  %v601_v18 = vadd.f32 %v3229_v43, %v575_v4  ;;  %v883_v43 = vmul.f32 %v881_v10, %v3160_v57  ;;  %v1116_v57 = vmul.f32 %v1113_v9, %v3249_v34 }
 0x19e   :  { %1006 = vrot.lane.b32.xlu1 %v997_v7, %s2812_s9  ;;  %1008 = vrot.lane.b32.xlu0 %v998_v24, %s2812_s9 }
 0x1a0   :  { %v615_v21 = vpop.permute.xlu1 %614  ;;  %v617_v23 = vpop.permute.xlu0 %616 }
 0x1a1   :  { %v625_v63 = vadd.f32 %v615_v21, %v599_v13  ;;  %v626_v5 = vadd.f32 %v617_v23, %v600_v12  ;;  %v1091_v21 = vmul.f32 %v1087_v46, %v3256_v14  ;;  %v1167_v12 = vmul.f32 %v1165_v58, %v3247_v25 }
 0x1a2   :  { %1010 = vrot.lane.b32.xlu1 %v999_v27, %s2812_s9  ;;  %1030 = vrot.lane.b32.xlu0 %v1022_v28, %s2813_s11 }
 0x1a4   :  { %v619_v29 = vpop.permute.xlu1 %618  ;;  %v639_v32 = vpop.permute.xlu0 %638 }
 0x1a5   :  { %v650_v51 = vadd.f32 %v639_v32, %v624_v53  ;;  %v627_v20 = vadd.f32 %v619_v29, %v601_v18  ;;  %v884_v32 = vmul.f32 %v881_v10, %v3162_v59  ;;  %v885_v59 = vmul.f32 %v881_v10, %v3171_v3 }
 0x1a6   :  { %1032 = vrot.lane.b32.xlu1 %v1023_v11, %s2813_s11  ;;  %1034 = vrot.lane.b32.xlu0 %v1024_v48, %s2813_s11  ;;  %v1191_v10 = vstv %s2658_s24  ;;  %s2682_s24 = sld [smem:[#allocation9 + $0x41]] }
 0x1a8   :  { %v641_v31 = vpop.permute.xlu1 %640  ;;  %v643_v36 = vpop.permute.xlu0 %642 }
 0x1a9   :  { %v651_v16 = vadd.f32 %v641_v31, %v625_v63  ;;  %v652_v19 = vadd.f32 %v643_v36, %v626_v5  ;;  %v1115_v36 = vmul.f32 %v1113_v9, %v3247_v25  ;;  %v1169_v5 = vmul.f32 %v1165_v58, %v3256_v14 }
 0x1aa   :  { %1036 = vrot.lane.b32.xlu1 %v1025_v37, %s2813_s11  ;;  %1070 = vrot.lane.b32.xlu0 %v1062_v40, %s2808_s29  ;;  %v1139_v40 = vstv %s2656_s21  ;;  %s2679_s21 = sld [smem:[#allocation9 + $0x3e]] }
 0x1ab   :  { %v1141_v46 = vmul.f32 %v1139_v40, %v3247_v25  ;;  %v1142_v47 = vmul.f32 %v1139_v40, %v3249_v34 }
 0x1ac   :  { %v645_v42 = vpop.permute.xlu1 %644  ;;  %v665_v49 = vpop.permute.xlu0 %664 }
 0x1ad   :  { %v676_v1 = vadd.f32 %v665_v49, %v650_v51  ;;  %v653_v23 = vadd.f32 %v645_v42, %v627_v20  ;;  %v1168_v51 = vmul.f32 %v1165_v58, %v3249_v34  ;;  %v3331_v20 = vld [vmem:[#allocation2 + $0xe] sm:$0xff] }
 0x1ae   :  { %1072 = vrot.lane.b32.xlu1 %v1063_v0, %s2808_s29  ;;  %1074 = vrot.lane.b32.xlu0 %v1064_v8, %s2808_s29  ;;  %v1117_v0 = vmul.f32 %v1113_v9, %v3256_v14  ;;  %v1140_v8 = vmul.f32 %v1139_v40, %v3241_v33  ;;  %v3325_v9 = vld [vmem:[#allocation2 + $0x6] sm:$0xff] }
 0x1b0   :  { %v667_v45 = vpop.permute.xlu1 %666  ;;  %v669_v38 = vpop.permute.xlu0 %668 }
 0x1b1   :  { %v677_v60 = vadd.f32 %v667_v45, %v651_v16  ;;  %v678_v17 = vadd.f32 %v669_v38, %v652_v19  ;;  %v1143_v38 = vmul.f32 %v1139_v40, %v3256_v14  ;;  %v1195_v19 = vmul.f32 %v1191_v10, %v3256_v14 }
 0x1b2   :  { %1076 = vrot.lane.b32.xlu1 %v1065_v56, %s2808_s29  ;;  %1096 = vrot.lane.b32.xlu0 %v1088_v61, %s2809_s3  ;;  %v1166_v56 = vmul.f32 %v1165_v58, %v3241_v33 }
 0x1b4   :  { %v671_v39 = vpop.permute.xlu1 %670  ;;  %v691_v2 = vpop.permute.xlu0 %690 }
 0x1b5   :  { %v702_v44 = vadd.f32 %v691_v2, %v676_v1  ;;  %v679_v29 = vadd.f32 %v671_v39, %v653_v23  ;;  %v1192_v1 = vmul.f32 %v1191_v10, %v3241_v33  ;;  %v3340_v23 = vld [vmem:[#allocation2 + $0x26] sm:$0xff] }
 0x1b6   :  { %1098 = vrot.lane.b32.xlu1 %v1089_v26, %s2809_s3  ;;  %1100 = vrot.lane.b32.xlu0 %v1090_v6, %s2809_s3  ;;  %v1193_v26 = vmul.f32 %v1191_v10, %v3247_v25  ;;  %v1194_v6 = vmul.f32 %v1191_v10, %v3249_v34 }
 0x1b7   :  { %v3276_v7 = vadd.f32 %v882_v15, %v702_v44  ;;  %v1231_v15 = vstv %s2660_s25  ;;  %s3621_s25 = sld [smem:[#allocation9 + $0x42]] }
 0x1b8   :  { %v693_v24 = vpop.permute.xlu1 %692  ;;  %v695_v22 = vpop.permute.xlu0 %694  ;;  %v1232_v44 = vmul.f32 %v1231_v15, %v3325_v9 }
 0x1b9   :  { %v703_v27 = vadd.f32 %v693_v24, %v677_v60  ;;  %v704_v28 = vadd.f32 %v695_v22, %v678_v17  ;;  %v3333_v60 = vld [vmem:[#allocation2 + $0x1e] sm:$0xff] }
 0x1ba   :  { %1102 = vrot.lane.b32.xlu1 %v1091_v21, %s2809_s3  ;;  %1122 = vrot.lane.b32.xlu0 %v1114_v52, %s2810_s5  ;;  %v1233_v21 = vmul.f32 %v1231_v15, %v3331_v20  ;;  %v1234_v52 = vmul.f32 %v1231_v15, %v3333_v60 }
 0x1bb   :  { %v3284_v11 = vadd.f32 %v883_v43, %v703_v27  ;;  %v3286_v48 = vadd.f32 %v884_v32, %v704_v28  ;;  %v1257_v27 = vstv %s2661_s26  ;;  %s3667_s26 = sld [smem:[#allocation9 + $0x43]] }
 0x1bc   :  { %v697_v30 = vpop.permute.xlu1 %696  ;;  %v731_v31 = vpop.permute.xlu0 %730 }
 0x1bd   :  { %v705_v37 = vadd.f32 %v697_v30, %v679_v29  ;;  %v742_v17 = vadd.f32 %v731_v31, %v3192_v41  ;;  %v1235_v31 = vmul.f32 %v1231_v15, %v3340_v23 }
 0x1be   :  { %1124 = vrot.lane.b32.xlu1 %v1115_v36, %s2810_s5  ;;  %1126 = vrot.lane.b32.xlu0 %v1116_v57, %s2810_s5  ;;  %v1258_v36 = vmul.f32 %v1257_v27, %v3325_v9 }
 0x1bf   :  { %v3293_v35 = vadd.f32 %v885_v59, %v705_v37  ;;  %v1051_v59 = vstv %s2652_s0  ;;  %s2685_s0 = sld [smem:[#allocation9 + $0x44]] }
 0x1c0   :  { %v3295_v42 = vpop.permute.xlu1 %732  ;;  %v3297_v49 = vpop.permute.xlu0 %734  ;;  %v1052_v58 = vmul.f32 %v1051_v59, %v3241_v33 }
 0x1c1   :  { %v743_v28 = vadd.f32 %v3295_v42, %v3200_v54  ;;  %v744_v41 = vadd.f32 %v3297_v49, %v3202_v55 }
 0x1c2   :  { %1128 = vrot.lane.b32.xlu1 %v1117_v0, %s2810_s5  ;;  %1148 = vrot.lane.b32.xlu0 %v1140_v8, %s2811_s7 }
 0x1c4   :  { %v3303_v50 = vpop.permute.xlu1 %736  ;;  %v757_v3 = vpop.permute.xlu0 %756 }
 0x1c5   :  { %v768_v43 = vadd.f32 %v757_v3, %v742_v17  ;;  %v745_v54 = vadd.f32 %v3303_v50, %v3209_v62  ;;  %v1259_v3 = vmul.f32 %v1257_v27, %v3331_v20 }
 0x1c6   :  { %1150 = vrot.lane.b32.xlu1 %v1141_v46, %s2811_s7  ;;  %1152 = vrot.lane.b32.xlu0 %v1142_v47, %s2811_s7  ;;  %v1260_v46 = vmul.f32 %v1257_v27, %v3333_v60  ;;  %v1283_v47 = vstv %s2662_s27  ;;  %s2686_s27 = sld [smem:[#allocation9 + $0x45]] }
 0x1c7   :  { %v1284_v33 = vmul.f32 %v1283_v47, %v3325_v9 }
 0x1c8   :  { %v759_v53 = vpop.permute.xlu1 %758  ;;  %v761_v45 = vpop.permute.xlu0 %760 }
 0x1c9   :  { %v769_v57 = vadd.f32 %v759_v53, %v743_v28  ;;  %v770_v37 = vadd.f32 %v761_v45, %v744_v41  ;;  %v1335_v41 = vstv %s2664_s30  ;;  %s2666_s30 = sld [smem:[#allocation9 + $0x31]] }
 0x1ca   :  { %1154 = vrot.lane.b32.xlu1 %v1143_v38, %s2811_s7  ;;  %1174 = vrot.lane.b32.xlu0 %v1166_v56, %s2812_s9 }
 0x1cc   :  { %v3313_v61 = vpop.permute.xlu1 %762  ;;  %v783_v13 = vpop.permute.xlu0 %782 }
 0x1cd   :  { %v794_v32 = vadd.f32 %v783_v13, %v768_v43  ;;  %v771_v53 = vadd.f32 %v3313_v61, %v745_v54  ;;  %v1053_v61 = vmul.f32 %v1051_v59, %v3247_v25  ;;  %v1286_v25 = vmul.f32 %v1283_v47, %v3333_v60 }
 0x1ce   :  { %1176 = vrot.lane.b32.xlu1 %v1167_v12, %s2812_s9  ;;  %1178 = vrot.lane.b32.xlu0 %v1168_v51, %s2812_s9 }
 0x1d0   :  { %v785_v4 = vpop.permute.xlu1 %784  ;;  %v787_v63 = vpop.permute.xlu0 %786 }
 0x1d1   :  { %v795_v42 = vadd.f32 %v785_v4, %v769_v57  ;;  %v796_v55 = vadd.f32 %v787_v63, %v770_v37  ;;  %v1261_v4 = vmul.f32 %v1257_v27, %v3340_v23  ;;  %v1337_v37 = vmul.f32 %v1335_v41, %v3331_v20 }
 0x1d2   :  { %1180 = vrot.lane.b32.xlu1 %v1169_v5, %s2812_s9  ;;  %1200 = vrot.lane.b32.xlu0 %v1192_v1, %s2813_s11 }
 0x1d4   :  { %v789_v39 = vpop.permute.xlu1 %788  ;;  %v809_v2 = vpop.permute.xlu0 %808 }
 0x1d5   :  { %v820_v40 = vadd.f32 %v809_v2, %v794_v32  ;;  %v797_v62 = vadd.f32 %v789_v39, %v771_v53  ;;  %v1054_v2 = vmul.f32 %v1051_v59, %v3249_v34  ;;  %v1055_v34 = vmul.f32 %v1051_v59, %v3256_v14 }
 0x1d6   :  { %1202 = vrot.lane.b32.xlu1 %v1193_v26, %s2813_s11  ;;  %1204 = vrot.lane.b32.xlu0 %v1194_v6, %s2813_s11  ;;  %v1361_v59 = vstv %s2665_s4  ;;  %s2689_s4 = sld [smem:[#allocation9 + $0x48]] }
 0x1d8   :  { %v811_v18 = vpop.permute.xlu1 %810  ;;  %v813_v16 = vpop.permute.xlu0 %812 }
 0x1d9   :  { %v821_v45 = vadd.f32 %v811_v18, %v795_v42  ;;  %v822_v38 = vadd.f32 %v813_v16, %v796_v55  ;;  %v1285_v16 = vmul.f32 %v1283_v47, %v3331_v20  ;;  %v1339_v55 = vmul.f32 %v1335_v41, %v3340_v23 }
 0x1da   :  { %1206 = vrot.lane.b32.xlu1 %v1195_v19, %s2813_s11  ;;  %1240 = vrot.lane.b32.xlu0 %v1232_v44, %s2808_s29  ;;  %v1309_v44 = vstv %s2663_s28  ;;  %s2688_s28 = sld [smem:[#allocation9 + $0x47]] }
 0x1db   :  { %v1311_v27 = vmul.f32 %v1309_v44, %v3331_v20  ;;  %v1312_v28 = vmul.f32 %v1309_v44, %v3333_v60 }
 0x1dc   :  { %v815_v24 = vpop.permute.xlu1 %814  ;;  %v835_v22 = vpop.permute.xlu0 %834 }
 0x1dd   :  { %v846_v49 = vadd.f32 %v835_v22, %v820_v40  ;;  %v823_v63 = vadd.f32 %v815_v24, %v797_v62  ;;  %v1338_v40 = vmul.f32 %v1335_v41, %v3333_v60  ;;  %v3415_v62 = vld [vmem:[#allocation2 + $0x38] sm:$0xff] }
 0x1de   :  { %1242 = vrot.lane.b32.xlu1 %v1233_v21, %s2808_s29  ;;  %1244 = vrot.lane.b32.xlu0 %v1234_v52, %s2808_s29  ;;  %v1287_v21 = vmul.f32 %v1283_v47, %v3340_v23  ;;  %v1310_v52 = vmul.f32 %v1309_v44, %v3325_v9  ;;  %v3409_v47 = vld [vmem:[#allocation2 + $0x30] sm:$0xff] }
 0x1e0   :  { %v837_v29 = vpop.permute.xlu1 %836  ;;  %v839_v30 = vpop.permute.xlu0 %838 }
 0x1e1   :  { %v847_v50 = vadd.f32 %v837_v29, %v821_v45  ;;  %v848_v13 = vadd.f32 %v839_v30, %v822_v38  ;;  %v1313_v30 = vmul.f32 %v1309_v44, %v3340_v23  ;;  %v1365_v38 = vmul.f32 %v1361_v59, %v3340_v23 }
 0x1e2   :  { %1246 = vrot.lane.b32.xlu1 %v1235_v31, %s2808_s29  ;;  %1266 = vrot.lane.b32.xlu0 %v1258_v36, %s2809_s3  ;;  %v1336_v31 = vmul.f32 %v1335_v41, %v3325_v9 }
 0x1e4   :  { %v841_v0 = vpop.permute.xlu1 %840  ;;  %v861_v8 = vpop.permute.xlu0 %860 }
 0x1e5   :  { %v872_v56 = vadd.f32 %v861_v8, %v846_v49  ;;  %v849_v39 = vadd.f32 %v841_v0, %v823_v63  ;;  %v1362_v49 = vmul.f32 %v1361_v59, %v3325_v9  ;;  %v3424_v63 = vld [vmem:[#allocation2 + $0x50] sm:$0xff] }
 0x1e6   :  { %1268 = vrot.lane.b32.xlu1 %v1259_v3, %s2809_s3  ;;  %1270 = vrot.lane.b32.xlu0 %v1260_v46, %s2809_s3  ;;  %v1363_v3 = vmul.f32 %v1361_v59, %v3331_v20  ;;  %v1364_v46 = vmul.f32 %v1361_v59, %v3333_v60 }
 0x1e7   :  { %v3360_v12 = vadd.f32 %v1052_v58, %v872_v56  ;;  %v1401_v58 = vstv %s2667_s6  ;;  %s2690_s6 = sld [smem:[#allocation9 + $0x49]] }
 0x1e8   :  { %v863_v51 = vpop.permute.xlu1 %862  ;;  %v865_v10 = vpop.permute.xlu0 %864  ;;  %v1402_v56 = vmul.f32 %v1401_v58, %v3409_v47 }
 0x1e9   :  { %v873_v5 = vadd.f32 %v863_v51, %v847_v50  ;;  %v874_v1 = vadd.f32 %v865_v10, %v848_v13  ;;  %v3417_v50 = vld [vmem:[#allocation2 + $0x48] sm:$0xff] }
 0x1ea   :  { %1272 = vrot.lane.b32.xlu1 %v1261_v4, %s2809_s3  ;;  %1292 = vrot.lane.b32.xlu0 %v1284_v33, %s2810_s5  ;;  %v1403_v4 = vmul.f32 %v1401_v58, %v3415_v62  ;;  %v1404_v33 = vmul.f32 %v1401_v58, %v3417_v50 }
 0x1eb   :  { %v3368_v26 = vadd.f32 %v1053_v61, %v873_v5  ;;  %v3370_v6 = vadd.f32 %v1054_v2, %v874_v1  ;;  %v1427_v5 = vstv %s2668_s8  ;;  %s2680_s8 = sld [smem:[#allocation9 + $0x3f]] }
 0x1ec   :  { %v867_v15 = vpop.permute.xlu1 %866  ;;  %v901_v18 = vpop.permute.xlu0 %900 }
 0x1ed   :  { %v875_v19 = vadd.f32 %v867_v15, %v849_v39  ;;  %v912_v13 = vadd.f32 %v901_v18, %v3276_v7  ;;  %v1405_v18 = vmul.f32 %v1401_v58, %v3424_v63 }
 0x1ee   :  { %1294 = vrot.lane.b32.xlu1 %v1285_v16, %s2810_s5  ;;  %1296 = vrot.lane.b32.xlu0 %v1286_v25, %s2810_s5  ;;  %v1428_v16 = vmul.f32 %v1427_v5, %v3409_v47 }
 0x1ef   :  { %v3377_v17 = vadd.f32 %v1055_v34, %v875_v19  ;;  %v1221_v34 = vstv %s2659_s10  ;;  %s2691_s10 = sld [smem:[#allocation9 + $0x4a]] }
 0x1f0   :  { %v3379_v24 = vpop.permute.xlu1 %902  ;;  %v3381_v22 = vpop.permute.xlu0 %904  ;;  %v1222_v41 = vmul.f32 %v1221_v34, %v3325_v9 }
 0x1f1   :  { %v913_v1 = vadd.f32 %v3379_v24, %v3284_v11  ;;  %v914_v7 = vadd.f32 %v3381_v22, %v3286_v48 }
 0x1f2   :  { %1298 = vrot.lane.b32.xlu1 %v1287_v21, %s2810_s5  ;;  %1318 = vrot.lane.b32.xlu0 %v1310_v52, %s2811_s7 }
 0x1f4   :  { %v3387_v43 = vpop.permute.xlu1 %906  ;;  %v927_v14 = vpop.permute.xlu0 %926 }
 0x1f5   :  { %v938_v61 = vadd.f32 %v927_v14, %v912_v13  ;;  %v915_v11 = vadd.f32 %v3387_v43, %v3293_v35  ;;  %v1429_v14 = vmul.f32 %v1427_v5, %v3415_v62 }
 0x1f6   :  { %1320 = vrot.lane.b32.xlu1 %v1311_v27, %s2811_s7  ;;  %1322 = vrot.lane.b32.xlu0 %v1312_v28, %s2811_s7  ;;  %v1430_v27 = vmul.f32 %v1427_v5, %v3417_v50  ;;  %v1453_v28 = vstv %s2669_s12  ;;  %s2692_s12 = sld [smem:[#allocation9 + $0x4b]] }
 0x1f7   :  { %v1454_v9 = vmul.f32 %v1453_v28, %v3409_v47 }
 0x1f8   :  { %v929_v32 = vpop.permute.xlu1 %928  ;;  %v931_v29 = vpop.permute.xlu0 %930 }
 0x1f9   :  { %v939_v25 = vadd.f32 %v929_v32, %v913_v1  ;;  %v940_v19 = vadd.f32 %v931_v29, %v914_v7  ;;  %v1505_v7 = vstv %s2671_s14  ;;  %s2695_s14 = sld [smem:[#allocation9 + $0x4e]] }
 0x1fa   :  { %1324 = vrot.lane.b32.xlu1 %v1313_v30, %s2811_s7  ;;  %1344 = vrot.lane.b32.xlu0 %v1336_v31, %s2812_s9 }
 0x1fc   :  { %v3397_v36 = vpop.permute.xlu1 %932  ;;  %v953_v57 = vpop.permute.xlu0 %952 }
 0x1fd   :  { %v964_v2 = vadd.f32 %v953_v57, %v938_v61  ;;  %v941_v32 = vadd.f32 %v3397_v36, %v915_v11  ;;  %v1223_v36 = vmul.f32 %v1221_v34, %v3331_v20  ;;  %v1456_v20 = vmul.f32 %v1453_v28, %v3417_v50 }
 0x1fe   :  { %1346 = vrot.lane.b32.xlu1 %v1337_v37, %s2812_s9  ;;  %1348 = vrot.lane.b32.xlu0 %v1338_v40, %s2812_s9 }
 0x200   :  { %v955_v54 = vpop.permute.xlu1 %954  ;;  %v957_v42 = vpop.permute.xlu0 %956 }
 0x201   :  { %v965_v24 = vadd.f32 %v955_v54, %v939_v25  ;;  %v966_v48 = vadd.f32 %v957_v42, %v940_v19  ;;  %v1431_v54 = vmul.f32 %v1427_v5, %v3424_v63  ;;  %v1507_v19 = vmul.f32 %v1505_v7, %v3415_v62 }
 0x202   :  { %1350 = vrot.lane.b32.xlu1 %v1339_v55, %s2812_s9  ;;  %1370 = vrot.lane.b32.xlu0 %v1362_v49, %s2813_s11 }
 0x204   :  { %v959_v0 = vpop.permute.xlu1 %958  ;;  %v979_v8 = vpop.permute.xlu0 %978 }
 0x205   :  { %v990_v44 = vadd.f32 %v979_v8, %v964_v2  ;;  %v967_v35 = vadd.f32 %v959_v0, %v941_v32  ;;  %v1224_v8 = vmul.f32 %v1221_v34, %v3333_v60  ;;  %v1225_v60 = vmul.f32 %v1221_v34, %v3340_v23 }
 0x206   :  { %1372 = vrot.lane.b32.xlu1 %v1363_v3, %s2813_s11  ;;  %1374 = vrot.lane.b32.xlu0 %v1364_v46, %s2813_s11  ;;  %v1531_v34 = vstv %s2672_s15  ;;  %s2696_s15 = sld [smem:[#allocation9 + $0x4f]] }
 0x208   :  { %v981_v53 = vpop.permute.xlu1 %980  ;;  %v983_v45 = vpop.permute.xlu0 %982 }
 0x209   :  { %v991_v29 = vadd.f32 %v981_v53, %v965_v24  ;;  %v992_v30 = vadd.f32 %v983_v45, %v966_v48  ;;  %v1455_v45 = vmul.f32 %v1453_v28, %v3415_v62  ;;  %v1509_v48 = vmul.f32 %v1505_v7, %v3424_v63 }
 0x20a   :  { %1376 = vrot.lane.b32.xlu1 %v1365_v38, %s2813_s11  ;;  %1410 = vrot.lane.b32.xlu0 %v1402_v56, %s2808_s29  ;;  %v1479_v56 = vstv %s2670_s13  ;;  %s2693_s13 = sld [smem:[#allocation9 + $0x4c]] }
 0x20b   :  { %v1481_v5 = vmul.f32 %v1479_v56, %v3415_v62  ;;  %v1482_v1 = vmul.f32 %v1479_v56, %v3417_v50 }
 0x20c   :  { %v985_v51 = vpop.permute.xlu1 %984  ;;  %v1005_v10 = vpop.permute.xlu0 %1004 }
 0x20d   :  { %v1016_v22 = vadd.f32 %v1005_v10, %v990_v44  ;;  %v993_v42 = vadd.f32 %v985_v51, %v967_v35  ;;  %v1508_v44 = vmul.f32 %v1505_v7, %v3417_v50 }
 0x20e   :  { %1412 = vrot.lane.b32.xlu1 %v1403_v4, %s2808_s29  ;;  %1414 = vrot.lane.b32.xlu0 %v1404_v33, %s2808_s29  ;;  %v1457_v4 = vmul.f32 %v1453_v28, %v3424_v63  ;;  %v1480_v33 = vmul.f32 %v1479_v56, %v3409_v47  ;;  %v3511_v28 = vld [vmem:[#allocation2 + $0x31] sm:$0xff] }
 0x20f   :  { %4242 = vst [vmem:[#allocation14_spill] sm:$0xff] %v3511_v28 }
 0x210   :  { %v1007_v39 = vpop.permute.xlu1 %1006  ;;  %v1009_v15 = vpop.permute.xlu0 %1008 }
 0x211   :  { %v1017_v43 = vadd.f32 %v1007_v39, %v991_v29  ;;  %v1018_v57 = vadd.f32 %v1009_v15, %v992_v30  ;;  %v1483_v15 = vmul.f32 %v1479_v56, %v3424_v63  ;;  %v1535_v29 = vmul.f32 %v1531_v34, %v3424_v63 }
 0x212   :  { %1416 = vrot.lane.b32.xlu1 %v1405_v18, %s2808_s29  ;;  %1436 = vrot.lane.b32.xlu0 %v1428_v16, %s2809_s3  ;;  %v1506_v18 = vmul.f32 %v1505_v7, %v3409_v47  ;;  %v1649_v7 = vstv %s2677_s19  ;;  %s2700_s19 = sld [smem:[#allocation9 + $0x53]] }
 0x214   :  { %v1011_v21 = vpop.permute.xlu1 %1010  ;;  %v1031_v52 = vpop.permute.xlu0 %1030 }
 0x215   :  { %v1042_v31 = vadd.f32 %v1031_v52, %v1016_v22  ;;  %v1019_v0 = vadd.f32 %v1011_v21, %v993_v42  ;;  %v1532_v22 = vmul.f32 %v1531_v34, %v3409_v47 }
 0x216   :  { %1438 = vrot.lane.b32.xlu1 %v1429_v14, %s2809_s3  ;;  %1440 = vrot.lane.b32.xlu0 %v1430_v27, %s2809_s3  ;;  %v1533_v14 = vmul.f32 %v1531_v34, %v3415_v62  ;;  %v1534_v27 = vmul.f32 %v1531_v34, %v3417_v50  ;;  %v3523_v62 = vld [vmem:[#allocation2 + $0x49] sm:$0xff] }
 0x217   :  { %v3444_v37 = vadd.f32 %v1222_v41, %v1042_v31  ;;  %v1571_v41 = vstv %s2674_s16  ;;  %v3521_v31 = vld [vmem:[#allocation2 + $0x39] sm:$0xff]  ;;  %4244 = vst [vmem:[#allocation16_spill] sm:$0xff] %v3523_v62  ;;  %s2697_s16 = sld [smem:[#allocation9 + $0x50]] }
 0x218   :  { %v1033_v40 = vpop.permute.xlu1 %1032  ;;  %v1035_v59 = vpop.permute.xlu0 %1034  ;;  %v1572_v30 = vmul.f32 %v1571_v41, %v3511_v28  ;;  %4243 = vst [vmem:[#allocation15_spill] sm:$0xff] %v3521_v31 }
 0x219   :  { %v1043_v55 = vadd.f32 %v1033_v40, %v1017_v43  ;;  %v1044_v49 = vadd.f32 %v1035_v59, %v1018_v57  ;;  %v1573_v57 = vmul.f32 %v1571_v41, %v3521_v31  ;;  %v1574_v40 = vmul.f32 %v1571_v41, %v3523_v62  ;;  %v3533_v59 = vld [vmem:[#allocation2 + $0x51] sm:$0xff] }
 0x21a   :  { %1442 = vrot.lane.b32.xlu1 %v1431_v54, %s2809_s3  ;;  %1462 = vrot.lane.b32.xlu0 %v1454_v9, %s2810_s5  ;;  %4245 = vst [vmem:[#allocation17_spill] sm:$0xff] %v3533_v59  ;;  %v1597_v54 = vstv %s2675_s17  ;;  %v1575_v42 = vmul.f32 %v1571_v41, %v3533_v59  ;;  %s2698_s17 = sld [smem:[#allocation9 + $0x51]] }
 0x21b   :  { %v3452_v3 = vadd.f32 %v1223_v36, %v1043_v55  ;;  %v3454_v46 = vadd.f32 %v1224_v8, %v1044_v49  ;;  %v1598_v55 = vmul.f32 %v1597_v54, %v3511_v28  ;;  %v1601_v56 = vmul.f32 %v1597_v54, %v3533_v59 }
 0x21c   :  { %v1037_v58 = vpop.permute.xlu1 %1036  ;;  %v3456_v53 = vpop.permute.xlu0 %1070 }
 0x21d   :  { %v1045_v38 = vadd.f32 %v1037_v58, %v1019_v0  ;;  %v1599_v0 = vmul.f32 %v1597_v54, %v3521_v31  ;;  %v1600_v58 = vmul.f32 %v1597_v54, %v3523_v62 }
 0x21e   :  { %1464 = vrot.lane.b32.xlu1 %v1455_v45, %s2810_s5  ;;  %1466 = vrot.lane.b32.xlu0 %v1456_v20, %s2810_s5  ;;  %v1623_v45 = vstv %s2676_s18  ;;  %s2699_s18 = sld [smem:[#allocation9 + $0x52]] }
 0x21f   :  { %v3463_v13 = vadd.f32 %v1225_v60, %v1045_v38  ;;  %v1624_v60 = vmul.f32 %v1623_v45, %v3511_v28 }
 0x220   :  { %v3465_v51 = vpop.permute.xlu1 %1072  ;;  %v3467_v10 = vpop.permute.xlu0 %1074 }
 0x222   :  { %1468 = vrot.lane.b32.xlu1 %v1457_v4, %s2810_s5  ;;  %1488 = vrot.lane.b32.xlu0 %v1480_v33, %s2811_s7 }
 0x224   :  { %v3473_v61 = vpop.permute.xlu1 %1076  ;;  %v3475_v23 = vpop.permute.xlu0 %1096 }
 0x226   :  { %1490 = vrot.lane.b32.xlu1 %v1481_v5, %s2811_s7  ;;  %1492 = vrot.lane.b32.xlu0 %v1482_v1, %s2811_s7  ;;  %v1625_v5 = vmul.f32 %v1623_v45, %v3521_v31  ;;  %v1626_v1 = vmul.f32 %v1623_v45, %v3523_v62 }
 0x228   :  { %v3481_v2 = vpop.permute.xlu1 %1098  ;;  %v3483_v39 = vpop.permute.xlu0 %1100 }
 0x22a   :  { %1494 = vrot.lane.b32.xlu1 %v1483_v15, %s2811_s7  ;;  %1514 = vrot.lane.b32.xlu0 %v1506_v18, %s2812_s9 }
 0x22c   :  { %v3489_v16 = vpop.permute.xlu1 %1102  ;;  %v3491_v25 = vpop.permute.xlu0 %1122 }
 0x22e   :  { %1516 = vrot.lane.b32.xlu1 %v1507_v19, %s2812_s9  ;;  %1518 = vrot.lane.b32.xlu0 %v1508_v44, %s2812_s9  ;;  %v1627_v19 = vmul.f32 %v1623_v45, %v3533_v59  ;;  %v1650_v44 = vmul.f32 %v1649_v7, %v3511_v28 }
 0x230   :  { %v3497_v11 = vpop.permute.xlu1 %1124  ;;  %v3499_v24 = vpop.permute.xlu0 %1126 }
 0x232   :  { %1520 = vrot.lane.b32.xlu1 %v1509_v48, %s2812_s9  ;;  %1540 = vrot.lane.b32.xlu0 %v1532_v22, %s2813_s11  ;;  %v1651_v22 = vmul.f32 %v1649_v7, %v3521_v31 }
 0x234   :  { %v3505_v21 = vpop.permute.xlu1 %1128  ;;  %v3507_v52 = vpop.permute.xlu0 %1148 }
 0x236   :  { %1542 = vrot.lane.b32.xlu1 %v1533_v14, %s2813_s11  ;;  %1544 = vrot.lane.b32.xlu0 %v1534_v27, %s2813_s11  ;;  %v1652_v14 = vmul.f32 %v1649_v7, %v3523_v62  ;;  %v1675_v27 = vstv %s2678_s20  ;;  %s2702_s20 = sld [smem:[#allocation9 + $0x55]] }
 0x238   :  { %v3515_v47 = vpop.permute.xlu1 %1150  ;;  %v3517_v32 = vpop.permute.xlu0 %1152 }
 0x23a   :  { %1546 = vrot.lane.b32.xlu1 %v1535_v29, %s2813_s11  ;;  %1580 = vrot.lane.b32.xlu0 %v1572_v30, %s2808_s29  ;;  %v1653_v30 = vmul.f32 %v1649_v7, %v3533_v59 }
 0x23c   :  { %v3527_v35 = vpop.permute.xlu1 %1154  ;;  %v3529_v43 = vpop.permute.xlu0 %1174 }
 0x23e   :  { %1582 = vrot.lane.b32.xlu1 %v1573_v57, %s2808_s29  ;;  %1584 = vrot.lane.b32.xlu0 %v1574_v40, %s2808_s29  ;;  %v1676_v57 = vmul.f32 %v1675_v27, %v3511_v28 }
 0x240   :  { %v3537_v9 = vpop.permute.xlu1 %1176  ;;  %v3539_v36 = vpop.permute.xlu0 %1178 }
 0x242   :  { %1586 = vrot.lane.b32.xlu1 %v1575_v42, %s2808_s29  ;;  %1606 = vrot.lane.b32.xlu0 %v1598_v55, %s2809_s3  ;;  %v1677_v42 = vmul.f32 %v1675_v27, %v3521_v31  ;;  %v1678_v55 = vmul.f32 %v1675_v27, %v3523_v62 }
 0x244   :  { %v3545_v49 = vpop.permute.xlu1 %1180  ;;  %v3547_v8 = vpop.permute.xlu0 %1200 }
 0x246   :  { %1608 = vrot.lane.b32.xlu1 %v1599_v0, %s2809_s3  ;;  %1610 = vrot.lane.b32.xlu0 %v1600_v58, %s2809_s3  ;;  %v1701_v0 = vstv %s2679_s21  ;;  %s2673_s21 = sld [smem:[#allocation9 + $0x38]] }
 0x247   :  { %v1703_v7 = vmul.f32 %v1701_v0, %v3521_v31 }
 0x248   :  { %v3553_v20 = vpop.permute.xlu1 %1202  ;;  %v3555_v38 = vpop.permute.xlu0 %1204 }
 0x24a   :  { %1612 = vrot.lane.b32.xlu1 %v1601_v56, %s2809_s3  ;;  %1632 = vrot.lane.b32.xlu0 %v1624_v60, %s2810_s5  ;;  %v1679_v56 = vmul.f32 %v1675_v27, %v3533_v59  ;;  %v1702_v60 = vmul.f32 %v1701_v0, %v3511_v28  ;;  %v1083_v28 = vadd.f32 %v3465_v51, %v3368_v26 }
 0x24c   :  { %v3561_v4 = vpop.permute.xlu1 %1206  ;;  %v1241_v33 = vpop.permute.xlu0 %1240  ;;  %v1109_v26 = vadd.f32 %v3481_v2, %v1083_v28 }
 0x24e   :  { %1634 = vrot.lane.b32.xlu1 %v1625_v5, %s2810_s5  ;;  %1636 = vrot.lane.b32.xlu0 %v1626_v1, %s2810_s5 }
 0x250   :  { %v3567_v15 = vpop.permute.xlu1 %1242  ;;  %v3569_v18 = vpop.permute.xlu0 %1244 }
 0x252   :  { %1638 = vrot.lane.b32.xlu1 %v1627_v19, %s2810_s5  ;;  %1658 = vrot.lane.b32.xlu0 %v1650_v44, %s2811_s7  ;;  %v1704_v19 = vmul.f32 %v1701_v0, %v3523_v62  ;;  %v3603_v44 = vld [vmem:[#allocation2 + $0x32] sm:$0xff] }
 0x254   :  { %v3575_v34 = vpop.permute.xlu1 %1246  ;;  %v1267_v48 = vpop.permute.xlu0 %1266 }
 0x255   :  { %v1255_v28 = vadd.f32 %v3575_v34, %v3463_v13 }
 0x256   :  { %1660 = vrot.lane.b32.xlu1 %v1651_v22, %s2811_s7  ;;  %1662 = vrot.lane.b32.xlu0 %v1652_v14, %s2811_s7  ;;  %v1741_v22 = vstv %s2681_s23  ;;  %s2709_s23 = sld [smem:[#allocation9 + $0x5c]] }
 0x258   :  { %v3581_v41 = vpop.permute.xlu1 %1268  ;;  %v3583_v29 = vpop.permute.xlu0 %1270 }
 0x25a   :  { %1664 = vrot.lane.b32.xlu1 %v1653_v30, %s2811_s7  ;;  %1684 = vrot.lane.b32.xlu0 %v1676_v57, %s2812_s9  ;;  %v1705_v30 = vmul.f32 %v1701_v0, %v3533_v59  ;;  %v1742_v57 = vmul.f32 %v1741_v22, %v3603_v44  ;;  %v1252_v0 = vadd.f32 %v1241_v33, %v3444_v37 }
 0x25b   :  { %v1084_v37 = vadd.f32 %v3467_v10, %v3370_v6  ;;  %v1253_v33 = vadd.f32 %v3567_v15, %v3452_v3  ;;  %v1085_v3 = vadd.f32 %v3473_v61, %v3377_v17 }
 0x25c   :  { %v3589_v40 = vpop.permute.xlu1 %1272  ;;  %v1293_v54 = vpop.permute.xlu0 %1292 }
 0x25d   :  { %v1110_v6 = vadd.f32 %v3483_v39, %v1084_v37 }
 0x25e   :  { %1686 = vrot.lane.b32.xlu1 %v1677_v42, %s2812_s9  ;;  %1688 = vrot.lane.b32.xlu0 %v1678_v55, %s2812_s9  ;;  %v3609_v42 = vld [vmem:[#allocation2 + $0x3a] sm:$0xff]  ;;  %v3611_v55 = vld [vmem:[#allocation2 + $0x4a] sm:$0xff] }
 0x25f   :  { %v1743_v31 = vmul.f32 %v1741_v22, %v3609_v42  ;;  %v1136_v2 = vadd.f32 %v3499_v24, %v1110_v6 }
 0x260   :  { %v1295_v58 = vpop.permute.xlu1 %1294  ;;  %v1297_v45 = vpop.permute.xlu0 %1296 }
 0x262   :  { %1690 = vrot.lane.b32.xlu1 %v1679_v56, %s2812_s9  ;;  %1710 = vrot.lane.b32.xlu0 %v1702_v60, %s2813_s11  ;;  %v1082_v56 = vadd.f32 %v3456_v53, %v3360_v12  ;;  %v3617_v60 = vld [vmem:[#allocation2 + $0x52] sm:$0xff]  ;;  %v1744_v12 = vmul.f32 %v1741_v22, %v3611_v55  ;;  %v1278_v53 = vadd.f32 %v1267_v48, %v1252_v0 }
 0x263   :  { %v1254_v48 = vadd.f32 %v3569_v18, %v3454_v46  ;;  %v1279_v46 = vadd.f32 %v3581_v41, %v1253_v33 }
 0x264   :  { %v3599_v5 = vpop.permute.xlu1 %1298  ;;  %v1319_v1 = vpop.permute.xlu0 %1318 }
 0x265   :  { %v1280_v15 = vadd.f32 %v3583_v29, %v1254_v48  ;;  %v1305_v17 = vadd.f32 %v1295_v58, %v1279_v46  ;;  %v1111_v29 = vadd.f32 %v3489_v16, %v1085_v3  ;;  %v1845_v46 = vstv %s2685_s0  ;;  %s4050_s0 = sld [smem:[#allocation9 + $0x5d]] }
 0x266   :  { %1712 = vrot.lane.b32.xlu1 %v1703_v7, %s2813_s11  ;;  %1714 = vrot.lane.b32.xlu0 %v1704_v19, %s2813_s11  ;;  %v3619_v7 = vstv %s2682_s24  ;;  %v1108_v19 = vadd.f32 %v3475_v23, %v1082_v56  ;;  %s3950_s24 = sld [smem:[#allocation9 + $0x56]] }
 0x267   :  { %v1769_v56 = vmul.f32 %v3619_v7, %v3609_v42  ;;  %v1306_v61 = vadd.f32 %v1297_v45, %v1280_v15  ;;  %v1137_v13 = vadd.f32 %v3505_v21, %v1111_v29 }
 0x268   :  { %v1321_v14 = vpop.permute.xlu1 %1320  ;;  %v1323_v27 = vpop.permute.xlu0 %1322  ;;  %v1134_v23 = vadd.f32 %v3491_v25, %v1108_v19  ;;  %v1281_v19 = vadd.f32 %v3589_v40, %v1255_v28  ;;  %v1847_v28 = vmul.f32 %v1845_v46, %v3609_v42 }
 0x269   :  { %v1163_v40 = vadd.f32 %v3527_v35, %v1137_v13 }
 0x26a   :  { %1716 = vrot.lane.b32.xlu1 %v1705_v30, %s2813_s11  ;;  %1750 = vrot.lane.b32.xlu0 %v1742_v57, %s2808_s29  ;;  %v1745_v30 = vmul.f32 %v1741_v22, %v3617_v60  ;;  %v1768_v57 = vmul.f32 %v3619_v7, %v3603_v44  ;;  %v1304_v22 = vadd.f32 %v1293_v54, %v1278_v53 }
 0x26b   :  { %v1160_v51 = vadd.f32 %v3507_v52, %v1134_v23  ;;  %v1135_v54 = vadd.f32 %v3497_v11, %v1109_v26  ;;  %v1793_v52 = vstv %s3621_s25  ;;  %v1162_v11 = vadd.f32 %v3517_v32, %v1136_v2  ;;  %s3952_s25 = sld [smem:[#allocation9 + $0x46]] }
 0x26c   :  { %v3625_v59 = vpop.permute.xlu1 %1324  ;;  %v1345_v62 = vpop.permute.xlu0 %1344  ;;  %v1330_v18 = vadd.f32 %v1319_v1, %v1304_v22  ;;  %v1332_v53 = vadd.f32 %v1323_v27, %v1306_v61  ;;  %v1189_v35 = vadd.f32 %v3545_v49, %v1163_v40  ;;  %v1846_v2 = vmul.f32 %v1845_v46, %v3603_v44 }
 0x26d   :  { %v1186_v39 = vadd.f32 %v3529_v43, %v1160_v51  ;;  %v1161_v1 = vadd.f32 %v3515_v47, %v1135_v54  ;;  %v1188_v16 = vadd.f32 %v3539_v36, %v1162_v11  ;;  %v1307_v47 = vadd.f32 %v3599_v5, %v1281_v19 }
 0x26e   :  { %1752 = vrot.lane.b32.xlu1 %v1743_v31, %s2808_s29  ;;  %1754 = vrot.lane.b32.xlu0 %v1744_v12, %s2808_s29  ;;  %v1770_v31 = vmul.f32 %v3619_v7, %v3611_v55  ;;  %v1356_v41 = vadd.f32 %v1345_v62, %v1330_v18  ;;  %v1331_v12 = vadd.f32 %v1321_v14, %v1305_v17  ;;  %v1871_v61 = vstv %s2686_s27  ;;  %s2711_s27 = sld [smem:[#allocation9 + $0x5e]] }
 0x26f   :  { %v1212_v24 = vadd.f32 %v3547_v8, %v1186_v39  ;;  %v1187_v62 = vadd.f32 %v3537_v9, %v1161_v1  ;;  %v1771_v9 = vmul.f32 %v3619_v7, %v3617_v60  ;;  %v1794_v36 = vmul.f32 %v1793_v52, %v3603_v44 }
 0x270   :  { %v1347_v10 = vpop.permute.xlu1 %1346  ;;  %v1349_v25 = vpop.permute.xlu0 %1348  ;;  %v1214_v14 = vadd.f32 %v3555_v38, %v1188_v16  ;;  %v1333_v5 = vadd.f32 %v3625_v59, %v1307_v47  ;;  %v1795_v38 = vmul.f32 %v1793_v52, %v3609_v42  ;;  %v1796_v59 = vmul.f32 %v1793_v52, %v3611_v55  ;;  %v3745_v47 = vld [vmem:[#allocation2 + $0x3b] sm:$0xff] }
 0x271   :  { %v1357_v32 = vadd.f32 %v1347_v10, %v1331_v12  ;;  %v1358_v8 = vadd.f32 %v1349_v25, %v1332_v53  ;;  %v1213_v58 = vadd.f32 %v3553_v20, %v1187_v62  ;;  %v1215_v48 = vadd.f32 %v3561_v4, %v1189_v35  ;;  %v3737_v12 = vld [vmem:[#allocation2 + $0x33] sm:$0xff]  ;;  %4250 = vst [vmem:[#allocation22_spill] sm:$0xff] %v3745_v47 }
 0x272   :  { %1756 = vrot.lane.b32.xlu1 %v1745_v30, %s2808_s29  ;;  %1776 = vrot.lane.b32.xlu0 %v1768_v57, %s2809_s3  ;;  %v1797_v51 = vmul.f32 %v1793_v52, %v3617_v60  ;;  %v1848_v17 = vmul.f32 %v1845_v46, %v3611_v55  ;;  %v1849_v1 = vmul.f32 %v1845_v46, %v3617_v60  ;;  %v1911_v53 = vstv %s2688_s28  ;;  %s2705_s28 = sld [smem:[#allocation9 + $0x58]] }
 0x273   :  { %v1872_v11 = vmul.f32 %v1871_v61, %v3603_v44  ;;  %v1874_v19 = vmul.f32 %v1871_v61, %v3611_v55  ;;  %v1875_v62 = vmul.f32 %v1871_v61, %v3617_v60  ;;  %v1912_v16 = vmul.f32 %v1911_v53, %v3737_v12 }
 0x274   :  { %v1351_v43 = vpop.permute.xlu1 %1350  ;;  %v1371_v0 = vpop.permute.xlu0 %1370 }
 0x275   :  { %v1382_v30 = vadd.f32 %v1371_v0, %v1356_v41  ;;  %v1359_v20 = vadd.f32 %v1351_v43, %v1333_v5  ;;  %v1873_v0 = vmul.f32 %v1871_v61, %v3609_v42 }
 0x276   :  { %1778 = vrot.lane.b32.xlu1 %v1769_v56, %s2809_s3  ;;  %1780 = vrot.lane.b32.xlu0 %v1770_v31, %s2809_s3  ;;  %v1819_v56 = vstv %s3667_s26  ;;  %s3956_s26 = sld [smem:[#allocation9 + $0x4d]] }
 0x277   :  { %v3675_v34 = vadd.f32 %v1382_v30, %v1212_v24  ;;  %v1820_v10 = vmul.f32 %v1819_v56, %v3603_v44  ;;  %v1821_v31 = vmul.f32 %v1819_v56, %v3609_v42  ;;  %v1822_v3 = vmul.f32 %v1819_v56, %v3611_v55 }
 0x278   :  { %v1373_v45 = vpop.permute.xlu1 %1372  ;;  %v1375_v21 = vpop.permute.xlu0 %1374  ;;  %v1823_v54 = vmul.f32 %v1819_v56, %v3617_v60 }
 0x279   :  { %4246 = vst [vmem:[#allocation18_spill] sm:$0xff] %v3675_v34  ;;  %v1383_v27 = vadd.f32 %v1373_v45, %v1357_v32  ;;  %v1384_v57 = vadd.f32 %v1375_v21, %v1358_v8  ;;  %v3747_v32 = vld [vmem:[#allocation2 + $0x4b] sm:$0xff]  ;;  %v3751_v8 = vstv %s2666_s30  ;;  %v1913_v45 = vmul.f32 %v1911_v53, %v3745_v47  ;;  %s2701_s30 = sld [smem:[#allocation9 + $0x54]] }
 0x27a   :  { %1782 = vrot.lane.b32.xlu1 %v1771_v9, %s2809_s3  ;;  %1802 = vrot.lane.b32.xlu0 %v1794_v36, %s2810_s5  ;;  %4251 = vst [vmem:[#allocation23_spill] sm:$0xff] %v3747_v32  ;;  %v1914_v21 = vmul.f32 %v1911_v53, %v3747_v32  ;;  %v1394_v9 = vmul.f32 %v3751_v8, %v3417_v50  ;;  %v3759_v36 = vld [vmem:[#allocation2 + $0x53] sm:$0xff] }
 0x27b   :  { %v3687_v37 = vadd.f32 %v1383_v27, %v1213_v58  ;;  %v3689_v23 = vadd.f32 %v1384_v57, %v1214_v14  ;;  %4252 = vst [vmem:[#allocation24_spill] sm:$0xff] %v3759_v36  ;;  %v1937_v14 = vstv %s2689_s4  ;;  %v1915_v35 = vmul.f32 %v1911_v53, %v3759_v36  ;;  %v2737_v34 = vld [vmem:[#allocation2 + $0x30] sm:$0xff]  ;;  %s2706_s4 = sld [smem:[#allocation9 + $0x59]] }
 0x27c   :  { %v1377_v7 = vpop.permute.xlu1 %1376  ;;  %v3691_v33 = vpop.permute.xlu0 %1410  ;;  %v1395_v50 = vmul.f32 %v3751_v8, %v3424_v63  ;;  %v1939_v56 = vmul.f32 %v1937_v14, %v3745_v47  ;;  %v1989_v53 = vstv %s2691_s10 }
 0x27d   :  { %4247 = vst [vmem:[#allocation19_spill] sm:$0xff] %v3687_v37  ;;  %4248 = vst [vmem:[#allocation20_spill] sm:$0xff] %v3689_v23  ;;  %v1385_v22 = vadd.f32 %v1377_v7, %v1359_v20  ;;  %v1938_v20 = vmul.f32 %v1937_v14, %v3737_v12  ;;  %v2185_v23 = vstv %s2699_s18 }
 0x27e   :  { %1804 = vrot.lane.b32.xlu1 %v1795_v38, %s2810_s5  ;;  %1806 = vrot.lane.b32.xlu0 %v1796_v59, %s2810_s5 }
 0x27f   :  { %v3699_v49 = vadd.f32 %v1385_v22, %v1215_v48 }
 0x280   :  { %v3701_v26 = vpop.permute.xlu1 %1412  ;;  %v1415_v6 = vpop.permute.xlu0 %1414 }
 0x281   :  { %4249 = vst [vmem:[#allocation21_spill] sm:$0xff] %v3699_v49  ;;  %v1424_v5 = vadd.f32 %v1415_v6, %v1394_v9  ;;  %v1940_v6 = vmul.f32 %v1937_v14, %v3747_v32  ;;  %v1991_v9 = vmul.f32 %v1989_v53, %v3745_v47 }
 0x282   :  { %1808 = vrot.lane.b32.xlu1 %v1797_v51, %s2810_s5  ;;  %1828 = vrot.lane.b32.xlu0 %v1820_v10, %s2811_s7 }
 0x284   :  { %v3707_v4 = vpop.permute.xlu1 %1416  ;;  %v3709_v25 = vpop.permute.xlu0 %1436 }
 0x285   :  { %v1425_v38 = vadd.f32 %v3707_v4, %v1395_v50 }
 0x286   :  { %1830 = vrot.lane.b32.xlu1 %v1821_v31, %s2811_s7  ;;  %1832 = vrot.lane.b32.xlu0 %v1822_v3, %s2811_s7  ;;  %v1963_v31 = vstv %s2690_s6  ;;  %s2707_s6 = sld [smem:[#allocation9 + $0x5a]] }
 0x288   :  { %v3715_v15 = vpop.permute.xlu1 %1438  ;;  %v1441_v18 = vpop.permute.xlu0 %1440 }
 0x289   :  { %v1450_v7 = vadd.f32 %v1441_v18, %v1424_v5  ;;  %v1941_v18 = vmul.f32 %v1937_v14, %v3759_v36  ;;  %v1992_v14 = vmul.f32 %v1989_v53, %v3747_v32  ;;  %v2015_v5 = vstv %s2692_s12 }
 0x28a   :  { %1834 = vrot.lane.b32.xlu1 %v1823_v54, %s2811_s7  ;;  %1854 = vrot.lane.b32.xlu0 %v1846_v2, %s2812_s9  ;;  %v1964_v54 = vmul.f32 %v1963_v31, %v3737_v12  ;;  %v3782_v2 = vstv %s2680_s8  ;;  %v2016_v50 = vmul.f32 %v2015_v5, %v3737_v12 }
 0x28c   :  { %v1443_v39 = vpop.permute.xlu1 %1442  ;;  %v3721_v52 = vpop.permute.xlu0 %1462 }
 0x28d   :  { %v1451_v51 = vadd.f32 %v1443_v39, %v1425_v38 }
 0x28e   :  { %1856 = vrot.lane.b32.xlu1 %v1847_v28, %s2812_s9  ;;  %1858 = vrot.lane.b32.xlu0 %v1848_v17, %s2812_s9  ;;  %v1734_v17 = vmul.f32 %v3782_v2, %v3611_v55  ;;  %v1735_v55 = vmul.f32 %v3782_v2, %v3617_v60 }
 0x290   :  { %v3727_v41 = vpop.permute.xlu1 %1464  ;;  %v1467_v29 = vpop.permute.xlu0 %1466 }
 0x291   :  { %v1476_v59 = vadd.f32 %v1467_v29, %v1450_v7 }
 0x292   :  { %1860 = vrot.lane.b32.xlu1 %v1849_v1, %s2812_s9  ;;  %1880 = vrot.lane.b32.xlu0 %v1872_v11, %s2813_s11 }
 0x294   :  { %v1469_v24 = vpop.permute.xlu1 %1468  ;;  %v3733_v43 = vpop.permute.xlu0 %1488 }
 0x295   :  { %v1477_v63 = vadd.f32 %v1469_v24, %v1451_v51  ;;  %v1965_v24 = vmul.f32 %v1963_v31, %v3745_v47 }
 0x296   :  { %1882 = vrot.lane.b32.xlu1 %v1873_v0, %s2813_s11  ;;  %1884 = vrot.lane.b32.xlu0 %v1874_v19, %s2813_s11  ;;  %v1966_v0 = vmul.f32 %v1963_v31, %v3747_v32 }
 0x298   :  { %v3741_v30 = vpop.permute.xlu1 %1490  ;;  %v1493_v13 = vpop.permute.xlu0 %1492 }
 0x299   :  { %v1502_v10 = vadd.f32 %v1493_v13, %v1476_v59  ;;  %v2017_v59 = vmul.f32 %v2015_v5, %v3745_v47 }
 0x29a   :  { %1886 = vrot.lane.b32.xlu1 %v1875_v62, %s2813_s11  ;;  %1920 = vrot.lane.b32.xlu0 %v1912_v16, %s2808_s29 }
 0x29c   :  { %v1495_v40 = vpop.permute.xlu1 %1494  ;;  %v3753_v58 = vpop.permute.xlu0 %1514 }
 0x29d   :  { %v1503_v28 = vadd.f32 %v1495_v40, %v1477_v63  ;;  %v1967_v40 = vmul.f32 %v1963_v31, %v3759_v36 }
 0x29e   :  { %1922 = vrot.lane.b32.xlu1 %v1913_v45, %s2808_s29  ;;  %1924 = vrot.lane.b32.xlu0 %v1914_v21, %s2808_s29  ;;  %v1990_v45 = vmul.f32 %v1989_v53, %v3737_v12 }
 0x2a0   :  { %v3763_v27 = vpop.permute.xlu1 %1516  ;;  %v1519_v57 = vpop.permute.xlu0 %1518 }
 0x2a1   :  { %v1528_v3 = vadd.f32 %v1519_v57, %v1502_v10  ;;  %v2019_v10 = vmul.f32 %v2015_v5, %v3759_v36 }
 0x2a2   :  { %1926 = vrot.lane.b32.xlu1 %v1915_v35, %s2808_s29  ;;  %1946 = vrot.lane.b32.xlu0 %v1938_v20, %s2809_s3  ;;  %v1993_v20 = vmul.f32 %v1989_v53, %v3759_v36 }
 0x2a4   :  { %v1521_v48 = vpop.permute.xlu1 %1520  ;;  %v3772_v22 = vpop.permute.xlu0 %1540 }
 0x2a5   :  { %v1529_v61 = vadd.f32 %v1521_v48, %v1503_v28  ;;  %v2018_v48 = vmul.f32 %v2015_v5, %v3747_v32  ;;  %v2081_v28 = vstv %s2695_s14 }
 0x2a6   :  { %1948 = vrot.lane.b32.xlu1 %v1939_v56, %s2809_s3  ;;  %1950 = vrot.lane.b32.xlu0 %v1940_v6, %s2809_s3  ;;  %v2041_v56 = vstv %s2693_s13 }
 0x2a7   :  { %v2042_v31 = vmul.f32 %v2041_v56, %v3737_v12 }
 0x2a8   :  { %v3778_v46 = vpop.permute.xlu1 %1542  ;;  %v1545_v4 = vpop.permute.xlu0 %1544 }
 0x2a9   :  { %v1554_v39 = vadd.f32 %v1545_v4, %v1528_v3  ;;  %v2043_v4 = vmul.f32 %v2041_v56, %v3745_v47 }
 0x2aa   :  { %1952 = vrot.lane.b32.xlu1 %v1941_v18, %s2809_s3  ;;  %1972 = vrot.lane.b32.xlu0 %v1964_v54, %s2810_s5  ;;  %v2044_v18 = vmul.f32 %v2041_v56, %v3747_v32  ;;  %v3846_v54 = vld [vmem:[#allocation2 + $0x34] sm:$0xff] }
 0x2ab   :  { %v3788_v29 = vadd.f32 %v1734_v17, %v1554_v39 }
 0x2ac   :  { %v1547_v1 = vpop.permute.xlu1 %1546  ;;  %v3790_v11 = vpop.permute.xlu0 %1580 }
 0x2ad   :  { %v1555_v19 = vadd.f32 %v1547_v1, %v1529_v61  ;;  %v2045_v61 = vmul.f32 %v2041_v56, %v3759_v36  ;;  %v2082_v1 = vmul.f32 %v2081_v28, %v3846_v54  ;;  %v1392_v36 = vmul.f32 %v2737_v34, %v3751_v8 }
 0x2ae   :  { %1974 = vrot.lane.b32.xlu1 %v1965_v24, %s2810_s5  ;;  %1976 = vrot.lane.b32.xlu0 %v1966_v0, %s2810_s5  ;;  %v3856_v24 = vld [vmem:[#allocation2 + $0x3c] sm:$0xff]  ;;  %v3858_v0 = vld [vmem:[#allocation2 + $0x4c] sm:$0xff]  ;;  %v2211_v34 = vstv %s2700_s19 }
 0x2af   :  { %v3798_v13 = vadd.f32 %v1735_v55, %v1555_v19  ;;  %4254 = vst [vmem:[#allocation26_spill] sm:$0xff] %v3856_v24  ;;  %4255 = vst [vmem:[#allocation27_spill] sm:$0xff] %v3858_v0  ;;  %v2083_v55 = vmul.f32 %v2081_v28, %v3856_v24  ;;  %v2188_v32 = vmul.f32 %v2185_v23, %v3858_v0 }
 0x2b0   :  { %v3800_v62 = vpop.permute.xlu1 %1582  ;;  %v3802_v16 = vpop.permute.xlu0 %1584 }
 0x2b2   :  { %1978 = vrot.lane.b32.xlu1 %v1967_v40, %s2810_s5  ;;  %1998 = vrot.lane.b32.xlu0 %v1990_v45, %s2811_s7  ;;  %v2084_v40 = vmul.f32 %v2081_v28, %v3858_v0  ;;  %v3868_v45 = vld [vmem:[#allocation2 + $0x54] sm:$0xff] }
 0x2b3   :  { %4257 = vst [vmem:[#allocation29_spill] sm:$0xff] %v3868_v45 }
 0x2b4   :  { %v3808_v21 = vpop.permute.xlu1 %1586  ;;  %v3810_v60 = vpop.permute.xlu0 %1606 }
 0x2b6   :  { %2000 = vrot.lane.b32.xlu1 %v1991_v9, %s2811_s7  ;;  %2002 = vrot.lane.b32.xlu0 %v1992_v14, %s2811_s7  ;;  %v2107_v9 = vstv %s2696_s15 }
 0x2b7   :  { %v2109_v56 = vmul.f32 %v2107_v9, %v3856_v24 }
 0x2b8   :  { %v3816_v57 = vpop.permute.xlu1 %1608  ;;  %v3818_v35 = vpop.permute.xlu0 %1610 }
 0x2ba   :  { %2004 = vrot.lane.b32.xlu1 %v1993_v20, %s2811_s7  ;;  %2024 = vrot.lane.b32.xlu0 %v2016_v50, %s2812_s9  ;;  %v2085_v20 = vmul.f32 %v2081_v28, %v3868_v45  ;;  %v2108_v50 = vmul.f32 %v2107_v9, %v3846_v54  ;;  %v2111_v28 = vmul.f32 %v2107_v9, %v3868_v45 }
 0x2bc   :  { %v3824_v7 = vpop.permute.xlu1 %1612  ;;  %v3826_v38 = vpop.permute.xlu0 %1632 }
 0x2be   :  { %2026 = vrot.lane.b32.xlu1 %v2017_v59, %s2812_s9  ;;  %2028 = vrot.lane.b32.xlu0 %v2018_v48, %s2812_s9 }
 0x2c0   :  { %v3832_v6 = vpop.permute.xlu1 %1634  ;;  %v3834_v51 = vpop.permute.xlu0 %1636 }
 0x2c2   :  { %2030 = vrot.lane.b32.xlu1 %v2019_v10, %s2812_s9  ;;  %2050 = vrot.lane.b32.xlu0 %v2042_v31, %s2813_s11  ;;  %v2110_v10 = vmul.f32 %v2107_v9, %v3858_v0  ;;  %v2133_v31 = vstv %s2697_s16 }
 0x2c4   :  { %v3840_v63 = vpop.permute.xlu1 %1638  ;;  %v3842_v3 = vpop.permute.xlu0 %1658 }
 0x2c5   :  { %4253 = vst [vmem:[#allocation25_spill] sm:$0xff] %v3840_v63 }
 0x2c6   :  { %2052 = vrot.lane.b32.xlu1 %v2043_v4, %s2813_s11  ;;  %2054 = vrot.lane.b32.xlu0 %v2044_v18, %s2813_s11 }
 0x2c8   :  { %v3850_v39 = vpop.permute.xlu1 %1660  ;;  %v3852_v17 = vpop.permute.xlu0 %1662 }
 0x2ca   :  { %2056 = vrot.lane.b32.xlu1 %v2045_v61, %s2813_s11  ;;  %2090 = vrot.lane.b32.xlu0 %v2082_v1, %s2808_s29  ;;  %v2134_v61 = vmul.f32 %v2133_v31, %v3846_v54 }
 0x2cc   :  { %v3862_v19 = vpop.permute.xlu1 %1664  ;;  %v3864_v53 = vpop.permute.xlu0 %1684 }
 0x2cd   :  { %4256 = vst [vmem:[#allocation28_spill] sm:$0xff] %v3862_v19 }
 0x2ce   :  { %2092 = vrot.lane.b32.xlu1 %v2083_v55, %s2808_s29  ;;  %2094 = vrot.lane.b32.xlu0 %v2084_v40, %s2808_s29  ;;  %v2135_v40 = vmul.f32 %v2133_v31, %v3856_v24 }
 0x2d0   :  { %v3872_v14 = vpop.permute.xlu1 %1686  ;;  %v3874_v5 = vpop.permute.xlu0 %1688 }
 0x2d1   :  { %4258 = vst [vmem:[#allocation30_spill] sm:$0xff] %v3872_v14  ;;  %4259 = vst [vmem:[#allocation31_spill] sm:$0xff] %v3874_v5  ;;  %v4268_v5 = vld [vmem:[#allocation16_spill] sm:$0xff] }
 0x2d2   :  { %2096 = vrot.lane.b32.xlu1 %v2085_v20, %s2808_s29  ;;  %2116 = vrot.lane.b32.xlu0 %v2108_v50, %s2809_s3  ;;  %v2136_v20 = vmul.f32 %v2133_v31, %v3858_v0  ;;  %v2159_v50 = vstv %s2698_s17 }
 0x2d4   :  { %v3880_v59 = vpop.permute.xlu1 %1690  ;;  %v3882_v48 = vpop.permute.xlu0 %1710 }
 0x2d5   :  { %4260 = vst [vmem:[#allocation32_spill] sm:$0xff] %v3880_v59  ;;  %4261 = vst [vmem:[#allocation33_spill] sm:$0xff] %v3882_v48  ;;  %v2187_v59 = vmul.f32 %v2185_v23, %v3856_v24 }
 0x2d6   :  { %2118 = vrot.lane.b32.xlu1 %v2109_v56, %s2809_s3  ;;  %2120 = vrot.lane.b32.xlu0 %v2110_v10, %s2809_s3  ;;  %v2137_v10 = vmul.f32 %v2133_v31, %v3868_v45 }
 0x2d8   :  { %v3888_v4 = vpop.permute.xlu1 %1712  ;;  %v3890_v18 = vpop.permute.xlu0 %1714 }
 0x2d9   :  { %4262 = vst [vmem:[#allocation34_spill] sm:$0xff] %v3888_v4  ;;  %4263 = vst [vmem:[#allocation35_spill] sm:$0xff] %v3890_v18  ;;  %v2189_v4 = vmul.f32 %v2185_v23, %v3868_v45 }
 0x2da   :  { %2122 = vrot.lane.b32.xlu1 %v2111_v28, %s2809_s3  ;;  %2142 = vrot.lane.b32.xlu0 %v2134_v61, %s2810_s5  ;;  %v2160_v28 = vmul.f32 %v2159_v50, %v3846_v54 }
 0x2dc   :  { %v3896_v1 = vpop.permute.xlu1 %1716  ;;  %v3898_v55 = vpop.permute.xlu0 %1750 }
 0x2dd   :  { %4264 = vst [vmem:[#allocation36_spill] sm:$0xff] %v3896_v1  ;;  %v1422_v1 = vadd.f32 %v3691_v33, %v1392_v36 }
 0x2de   :  { %2144 = vrot.lane.b32.xlu1 %v2135_v40, %s2810_s5  ;;  %2146 = vrot.lane.b32.xlu0 %v2136_v20, %s2810_s5  ;;  %v2161_v40 = vmul.f32 %v2159_v50, %v3856_v24  ;;  %v2162_v20 = vmul.f32 %v2159_v50, %v3858_v0 }
 0x2df   :  { %v1448_v18 = vadd.f32 %v3709_v25, %v1422_v1  ;;  %v2251_v1 = vstv %s2702_s20 }
 0x2e0   :  { %v3904_v9 = vpop.permute.xlu1 %1752  ;;  %v3906_v56 = vpop.permute.xlu0 %1754 }
 0x2e1   :  { %v1474_v36 = vadd.f32 %v3721_v52, %v1448_v18  ;;  %v3968_v18 = vld [vmem:[#allocation2 + $0x35] sm:$0xff] }
 0x2e2   :  { %2148 = vrot.lane.b32.xlu1 %v2137_v10, %s2810_s5  ;;  %2168 = vrot.lane.b32.xlu0 %v2160_v28, %s2811_s7  ;;  %v2163_v10 = vmul.f32 %v2159_v50, %v3868_v45  ;;  %v2186_v28 = vmul.f32 %v2185_v23, %v3846_v54  ;;  %v2738_v50 = vld [vmem:[#allocation2 + $0x38] sm:$0xff] }
 0x2e3   :  { %v1393_v47 = vmul.f32 %v2738_v50, %v3751_v8  ;;  %v2212_v8 = vmul.f32 %v2211_v34, %v3846_v54  ;;  %v1732_v50 = vmul.f32 %v3782_v2, %v3603_v44  ;;  %v3988_v44 = vld [vmem:[#allocation2 + $0x36] sm:$0xff] }
 0x2e4   :  { %v3912_v61 = vpop.permute.xlu1 %1756  ;;  %v3914_v49 = vpop.permute.xlu0 %1776 }
 0x2e5   :  { %v1423_v33 = vadd.f32 %v3701_v26, %v1393_v47 }
 0x2e6   :  { %2170 = vrot.lane.b32.xlu1 %v2161_v40, %s2811_s7  ;;  %2172 = vrot.lane.b32.xlu0 %v2162_v20, %s2811_s7 }
 0x2e7   :  { %v1449_v25 = vadd.f32 %v3715_v15, %v1423_v33  ;;  %v2213_v15 = vmul.f32 %v2211_v34, %v3856_v24 }
 0x2e8   :  { %v3920_v31 = vpop.permute.xlu1 %1778  ;;  %v3922_v37 = vpop.permute.xlu0 %1780 }
 0x2e9   :  { %v1475_v26 = vadd.f32 %v3727_v41, %v1449_v25  ;;  %v2421_v25 = vstv %s2709_s23 }
 0x2ea   :  { %2174 = vrot.lane.b32.xlu1 %v2163_v10, %s2811_s7  ;;  %2194 = vrot.lane.b32.xlu0 %v2186_v28, %s2812_s9 }
 0x2ec   :  { %v3930_v40 = vpop.permute.xlu1 %1782  ;;  %v3932_v20 = vpop.permute.xlu0 %1802 }
 0x2ee   :  { %2196 = vrot.lane.b32.xlu1 %v2187_v59, %s2812_s9  ;;  %2198 = vrot.lane.b32.xlu0 %v2188_v32, %s2812_s9  ;;  %v1500_v59 = vadd.f32 %v3733_v43, %v1474_v36  ;;  %v2214_v43 = vmul.f32 %v2211_v34, %v3858_v0  ;;  %v1501_v32 = vadd.f32 %v3741_v30, %v1475_v26 }
 0x2ef   :  { %v2252_v36 = vmul.f32 %v2251_v1, %v3968_v18 }
 0x2f0   :  { %v3942_v10 = vpop.permute.xlu1 %1804  ;;  %v3944_v28 = vpop.permute.xlu0 %1806  ;;  %v1526_v23 = vadd.f32 %v3753_v58, %v1500_v59  ;;  %v1527_v41 = vadd.f32 %v3763_v27, %v1501_v32  ;;  %v1561_v58 = vstv %s2673_s21  ;;  %v3984_v27 = vld [vmem:[#allocation2 + $0x4d] sm:$0xff] }
 0x2f1   :  { %v1564_v0 = vmul.f32 %v1561_v58, %v4268_v5  ;;  %v4013_v5 = vld [vmem:[#allocation2 + $0x56] sm:$0xff] }
 0x2f2   :  { %2200 = vrot.lane.b32.xlu1 %v2189_v4, %s2812_s9  ;;  %2220 = vrot.lane.b32.xlu0 %v2212_v8, %s2813_s11  ;;  %v1552_v4 = vadd.f32 %v3772_v22, %v1526_v23  ;;  %v2215_v22 = vmul.f32 %v2211_v34, %v3868_v45  ;;  %v3981_v8 = vld [vmem:[#allocation2 + $0x3d] sm:$0xff]  ;;  %v1553_v59 = vadd.f32 %v3778_v46, %v1527_v41  ;;  %v3986_v23 = vld [vmem:[#allocation2 + $0x55] sm:$0xff]  ;;  %v4267_v45 = vld [vmem:[#allocation15_spill] sm:$0xff]  ;;  %v4006_v41 = vstv %s3956_s26 }
 0x2f3   :  { %v4266_v34 = vld [vmem:[#allocation14_spill] sm:$0xff]  ;;  %v1563_v19 = vmul.f32 %v1561_v58, %v4267_v45  ;;  %v2253_v45 = vmul.f32 %v2251_v1, %v3981_v8  ;;  %v2255_v48 = vmul.f32 %v2251_v1, %v3986_v23 }
 0x2f4   :  { %v3960_v52 = vpop.permute.xlu1 %1808  ;;  %v3962_v47 = vpop.permute.xlu0 %1828  ;;  %v1736_v26 = vadd.f32 %v1732_v50, %v1552_v4  ;;  %v1562_v32 = vmul.f32 %v1561_v58, %v4266_v34  ;;  %v4001_v46 = vld [vmem:[#allocation2 + $0x3e] sm:$0xff]  ;;  %v4003_v4 = vld [vmem:[#allocation2 + $0x4e] sm:$0xff]  ;;  %v1733_v34 = vmul.f32 %v3782_v2, %v3609_v42 }
 0x2f5   :  { %4265 = vst [vmem:[#allocation37_spill] sm:$0xff] %v3960_v52  ;;  %v4269_v50 = vld [vmem:[#allocation17_spill] sm:$0xff]  ;;  %v2254_v52 = vmul.f32 %v2251_v1, %v3984_v27  ;;  %v2423_v42 = vmul.f32 %v2421_v25, %v4001_v46  ;;  %v2424_v2 = vmul.f32 %v2421_v25, %v4003_v4 }
 0x2f6   :  { %2222 = vrot.lane.b32.xlu1 %v2213_v15, %s2813_s11  ;;  %2224 = vrot.lane.b32.xlu0 %v2214_v43, %s2813_s11  ;;  %v3991_v15 = vstv %s3950_s24  ;;  %v3994_v43 = vstv %s3952_s25  ;;  %v1565_v24 = vmul.f32 %v1561_v58, %v4269_v50  ;;  %v1762_v14 = vadd.f32 %v3898_v55, %v1736_v26 }
 0x2f7   :  { %v2422_v58 = vmul.f32 %v2421_v25, %v3988_v44  ;;  %v1737_v50 = vadd.f32 %v1733_v34, %v1553_v59  ;;  %v2278_v1 = vmul.f32 %v3991_v15, %v3968_v18  ;;  %v1902_v59 = vmul.f32 %v3994_v43, %v3737_v12 }
 0x2f8   :  { %v3975_v33 = vpop.permute.xlu1 %1830  ;;  %v3977_v30 = vpop.permute.xlu0 %1832  ;;  %v1788_v55 = vadd.f32 %v3914_v49, %v1762_v14  ;;  %v1764_v49 = vadd.f32 %v3906_v56, %v3788_v29  ;;  %v1594_v34 = vadd.f32 %v3802_v16, %v1564_v0 }
 0x2fa   :  { %2226 = vrot.lane.b32.xlu1 %v2215_v22, %s2813_s11  ;;  %2260 = vrot.lane.b32.xlu0 %v2252_v36, %s2808_s29  ;;  %v1592_v22 = vadd.f32 %v3790_v11, %v1562_v32  ;;  %v2425_v11 = vmul.f32 %v2421_v25, %v4013_v5  ;;  %v1763_v32 = vadd.f32 %v3904_v9, %v1737_v50 }
 0x2fb   :  { %v1814_v14 = vadd.f32 %v3932_v20, %v1788_v55  ;;  %v1595_v9 = vadd.f32 %v3808_v21, %v1565_v24  ;;  %v1790_v56 = vadd.f32 %v3922_v37, %v1764_v49  ;;  %v1765_v21 = vadd.f32 %v3912_v61, %v3798_v13 }
 0x2fc   :  { %v4016_v36 = vpop.permute.xlu1 %1834  ;;  %v1855_v63 = vpop.permute.xlu0 %1854  ;;  %v1618_v26 = vadd.f32 %v3810_v60, %v1592_v22  ;;  %v1593_v60 = vadd.f32 %v3800_v62, %v1563_v19  ;;  %v2072_v22 = vmul.f32 %v4006_v41, %v3846_v54  ;;  %v1789_v29 = vadd.f32 %v3920_v31, %v1763_v32  ;;  %v4275_v32 = vld [vmem:[#allocation27_spill] sm:$0xff] }
 0x2fd   :  { %v1840_v20 = vadd.f32 %v3962_v47, %v1814_v14  ;;  %v1620_v62 = vadd.f32 %v3818_v35, %v1594_v34  ;;  %v1816_v37 = vadd.f32 %v3944_v28, %v1790_v56  ;;  %v4279_v56 = vld [vmem:[#allocation35_spill] sm:$0xff] }
 0x2fe   :  { %2262 = vrot.lane.b32.xlu1 %v2253_v45, %s2808_s29  ;;  %2264 = vrot.lane.b32.xlu0 %v2254_v52, %s2808_s29  ;;  %v1644_v52 = vadd.f32 %v3826_v38, %v1618_v26  ;;  %v1619_v12 = vadd.f32 %v3816_v57, %v1593_v60  ;;  %v1815_v38 = vadd.f32 %v3942_v10, %v1789_v29  ;;  %v2447_v29 = vstv %s4050_s0 }
 0x2ff   :  { %v1866_v54 = vadd.f32 %v1855_v63, %v1840_v20  ;;  %v1621_v57 = vadd.f32 %v3824_v7, %v1595_v9  ;;  %v1842_v13 = vadd.f32 %v3977_v30, %v1816_v37  ;;  %v4270_v7 = vld [vmem:[#allocation33_spill] sm:$0xff]  ;;  %v2280_v37 = vmul.f32 %v3991_v15, %v3984_v27 }
 0x300   :  { %v1857_v25 = vpop.permute.xlu1 %1856  ;;  %v1859_v45 = vpop.permute.xlu0 %1858  ;;  %v1670_v16 = vadd.f32 %v3842_v3, %v1644_v52  ;;  %v1645_v35 = vadd.f32 %v3832_v6, %v1619_v12  ;;  %v1646_v3 = vadd.f32 %v3834_v51, %v1620_v62  ;;  %v1841_v31 = vadd.f32 %v3975_v33, %v1815_v38  ;;  %v4271_v6 = vld [vmem:[#allocation37_spill] sm:$0xff]  ;;  %v4277_v52 = vld [vmem:[#allocation28_spill] sm:$0xff] }
 0x301   :  { %v1868_v47 = vadd.f32 %v1859_v45, %v1842_v13  ;;  %v4272_v33 = vld [vmem:[#allocation25_spill] sm:$0xff]  ;;  %v4278_v45 = vld [vmem:[#allocation34_spill] sm:$0xff]  ;;  %v2279_v38 = vmul.f32 %v3991_v15, %v3981_v8 }
 0x302   :  { %2266 = vrot.lane.b32.xlu1 %v2255_v48, %s2808_s29  ;;  %2430 = vrot.lane.b32.xlu0 %v2422_v58, %s2808_s29  ;;  %v1696_v24 = vadd.f32 %v3864_v53, %v1670_v16  ;;  %v1791_v48 = vadd.f32 %v3930_v40, %v1765_v21  ;;  %v1671_v10 = vadd.f32 %v3850_v39, %v1645_v35  ;;  %v4273_v58 = vld [vmem:[#allocation30_spill] sm:$0xff] }
 0x303   :  { %v1672_v63 = vadd.f32 %v3852_v17, %v1646_v3  ;;  %v1867_v53 = vadd.f32 %v1857_v25, %v1841_v31  ;;  %v1647_v30 = vadd.f32 %v4272_v33, %v1621_v57  ;;  %v4274_v17 = vld [vmem:[#allocation26_spill] sm:$0xff]  ;;  %v4282_v57 = vld [vmem:[#allocation32_spill] sm:$0xff] }
 0x304   :  { %v1861_v0 = vpop.permute.xlu1 %1860  ;;  %v1881_v19 = vpop.permute.xlu0 %1880  ;;  %v1722_v28 = vadd.f32 %v4270_v7, %v1696_v24  ;;  %v1817_v51 = vadd.f32 %v4271_v6, %v1791_v48  ;;  %v1697_v50 = vadd.f32 %v4273_v58, %v1671_v10  ;;  %v2073_v26 = vmul.f32 %v4006_v41, %v4274_v17  ;;  %v4284_v48 = vld [vmem:[#allocation36_spill] sm:$0xff] }
 0x305   :  { %v1892_v61 = vadd.f32 %v1881_v19, %v1866_v54  ;;  %v1673_v25 = vadd.f32 %v4277_v52, %v1647_v30  ;;  %v2448_v6 = vmul.f32 %v2447_v29, %v3988_v44 }
 0x306   :  { %2432 = vrot.lane.b32.xlu1 %v2423_v42, %s2808_s29  ;;  %2434 = vrot.lane.b32.xlu0 %v2424_v2, %s2808_s29  ;;  %v2074_v42 = vmul.f32 %v4006_v41, %v4275_v32  ;;  %v4276_v2 = vld [vmem:[#allocation31_spill] sm:$0xff]  ;;  %v1843_v14 = vadd.f32 %v4016_v36, %v1817_v51  ;;  %v1906_v9 = vadd.f32 %v1902_v59, %v1722_v28 }
 0x307   :  { %v4069_v40 = vadd.f32 %v2072_v22, %v1892_v61  ;;  %v1698_v49 = vadd.f32 %v4276_v2, %v1672_v63  ;;  %v1723_v22 = vadd.f32 %v4278_v45, %v1697_v50  ;;  %v4281_v59 = vld [vmem:[#allocation23_spill] sm:$0xff]  ;;  %v1699_v35 = vadd.f32 %v4282_v57, %v1673_v25 }
 0x308   :  { %v1883_v39 = vpop.permute.xlu1 %1882  ;;  %v1885_v55 = vpop.permute.xlu0 %1884  ;;  %v1869_v12 = vadd.f32 %v1861_v0, %v1843_v14  ;;  %v1904_v54 = vmul.f32 %v3994_v43, %v4281_v59  ;;  %v4283_v0 = vld [vmem:[#allocation29_spill] sm:$0xff]  ;;  %v2281_v28 = vmul.f32 %v3991_v15, %v3986_v23  ;;  %v2449_v50 = vmul.f32 %v2447_v29, %v4001_v46 }
 0x309   :  { %v1893_v60 = vadd.f32 %v1883_v39, %v1867_v53  ;;  %v1894_v34 = vadd.f32 %v1885_v55, %v1868_v47  ;;  %v1724_v20 = vadd.f32 %v4279_v56, %v1698_v49  ;;  %v2075_v19 = vmul.f32 %v4006_v41, %v4283_v0  ;;  %v4285_v41 = vld [vmem:[#allocation24_spill] sm:$0xff] }
 0x30a   :  { %2436 = vrot.lane.b32.xlu1 %v2425_v11, %s2808_s29  ;;  %2286 = vrot.lane.b32.xlu0 %v2278_v1, %s2809_s3  ;;  %v4280_v11 = vld [vmem:[#allocation22_spill] sm:$0xff]  ;;  %s2704_s29 = sld [smem:[#allocation9 + $0x57]]  ;;  %v1725_v31 = vadd.f32 %v4284_v48, %v1699_v35  ;;  %v1905_v47 = vmul.f32 %v3994_v43, %v4285_v41  ;;  %v2450_v39 = vmul.f32 %v2447_v29, %v4003_v4 }
 0x30b   :  { %v4085_v62 = vadd.f32 %v2073_v26, %v1893_v60  ;;  %v4087_v16 = vadd.f32 %v2074_v42, %v1894_v34  ;;  %v1903_v1 = vmul.f32 %v3994_v43, %v4280_v11  ;;  %v1908_v61 = vadd.f32 %v1904_v54, %v1724_v20 }
 0x30c   :  { %v1887_v36 = vpop.permute.xlu1 %1886  ;;  %v1921_v21 = vpop.permute.xlu0 %1920  ;;  %v1909_v33 = vadd.f32 %v1905_v47, %v1725_v31  ;;  %v2451_v32 = vmul.f32 %v2447_v29, %v4013_v5  ;;  %v2329_v54 = vstv %s2705_s28 }
 0x30d   :  { %v1895_v3 = vadd.f32 %v1887_v36, %v1869_v12  ;;  %v1932_v24 = vadd.f32 %v1921_v21, %v1906_v9  ;;  %v1907_v13 = vadd.f32 %v1903_v1, %v1723_v22  ;;  %v2473_v22 = vstv %s2711_s27 }
 0x30e   :  { %2288 = vrot.lane.b32.xlu1 %v2279_v38, %s2809_s3  ;;  %2290 = vrot.lane.b32.xlu0 %v2280_v37, %s2809_s3  ;;  %v2474_v20 = vmul.f32 %v2473_v22, %v3988_v44  ;;  %v2475_v37 = vmul.f32 %v2473_v22, %v4001_v46  ;;  %v2476_v11 = vmul.f32 %v2473_v22, %v4003_v4 }
 0x30f   :  { %v4103_v10 = vadd.f32 %v2075_v19, %v1895_v3  ;;  %v2477_v3 = vmul.f32 %v2473_v22, %v4013_v5 }
 0x310   :  { %v1923_v63 = vpop.permute.xlu1 %1922  ;;  %v1925_v7 = vpop.permute.xlu0 %1924  ;;  %v2303_v17 = vstv %s2704_s29 }
 0x311   :  { %v1933_v51 = vadd.f32 %v1923_v63, %v1907_v13  ;;  %v1934_v53 = vadd.f32 %v1925_v7, %v1908_v61  ;;  %v2304_v42 = vmul.f32 %v2303_v17, %v3968_v18  ;;  %v2305_v34 = vmul.f32 %v2303_v17, %v3981_v8 }
 0x312   :  { %2292 = vrot.lane.b32.xlu1 %v2281_v28, %s2809_s3  ;;  %2456 = vrot.lane.b32.xlu0 %v2448_v6, %s2809_s3  ;;  %v2306_v52 = vmul.f32 %v2303_v17, %v3984_v27  ;;  %v2307_v56 = vmul.f32 %v2303_v17, %v3986_v23  ;;  %v2331_v13 = vmul.f32 %v2329_v54, %v3981_v8 }
 0x313   :  { %v2332_v61 = vmul.f32 %v2329_v54, %v3984_v27 }
 0x314   :  { %v1927_v30 = vpop.permute.xlu1 %1926  ;;  %v1947_v58 = vpop.permute.xlu0 %1946 }
 0x315   :  { %v1935_v55 = vadd.f32 %v1927_v30, %v1909_v33  ;;  %v1958_v15 = vadd.f32 %v1947_v58, %v1932_v24  ;;  %v2330_v24 = vmul.f32 %v2329_v54, %v3968_v18  ;;  %v2241_v30 = vstv %s2701_s30 }
 0x316   :  { %2458 = vrot.lane.b32.xlu1 %v2449_v50, %s2809_s3  ;;  %2460 = vrot.lane.b32.xlu0 %v2450_v39, %s2809_s3 }
 0x318   :  { %v1949_v43 = vpop.permute.xlu1 %1948  ;;  %v1951_v26 = vpop.permute.xlu0 %1950 }
 0x319   :  { %v1959_v2 = vadd.f32 %v1949_v43, %v1933_v51  ;;  %v1960_v49 = vadd.f32 %v1951_v26, %v1934_v53  ;;  %v2333_v53 = vmul.f32 %v2329_v54, %v3986_v23  ;;  %v2355_v43 = vstv %s2706_s4 }
 0x31a   :  { %2462 = vrot.lane.b32.xlu1 %v2451_v32, %s2809_s3  ;;  %2312 = vrot.lane.b32.xlu0 %v2304_v42, %s2810_s5  ;;  %s2712_s3 = sld [smem:[#allocation9 + $0x5f]]  ;;  %v2242_v26 = vmul.f32 %v2241_v30, %v3968_v18 }
 0x31c   :  { %v1953_v14 = vpop.permute.xlu1 %1952  ;;  %v1973_v60 = vpop.permute.xlu0 %1972 }
 0x31d   :  { %v1961_v25 = vadd.f32 %v1953_v14, %v1935_v55  ;;  %v1984_v45 = vadd.f32 %v1973_v60, %v1958_v15  ;;  %v2356_v14 = vmul.f32 %v2355_v43, %v3968_v18 }
 0x31e   :  { %2314 = vrot.lane.b32.xlu1 %v2305_v34, %s2810_s5  ;;  %2316 = vrot.lane.b32.xlu0 %v2306_v52, %s2810_s5  ;;  %v2243_v52 = vmul.f32 %v2241_v30, %v3981_v8 }
 0x320   :  { %v1975_v9 = vpop.permute.xlu1 %1974  ;;  %v1977_v29 = vpop.permute.xlu0 %1976  ;;  %v2499_v28 = vstv %s2712_s3 }
 0x321   :  { %v1985_v12 = vadd.f32 %v1975_v9, %v1959_v2  ;;  %v1986_v36 = vadd.f32 %v1977_v29, %v1960_v49  ;;  %v2500_v41 = vmul.f32 %v2499_v28, %v3988_v44  ;;  %v2501_v39 = vmul.f32 %v2499_v28, %v4001_v46 }
 0x322   :  { %2318 = vrot.lane.b32.xlu1 %v2307_v56, %s2810_s5  ;;  %2482 = vrot.lane.b32.xlu0 %v2474_v20, %s2810_s5  ;;  %v2502_v55 = vmul.f32 %v2499_v28, %v4003_v4  ;;  %v2503_v49 = vmul.f32 %v2499_v28, %v4013_v5  ;;  %v2357_v56 = vmul.f32 %v2355_v43, %v3981_v8 }
 0x323   :  { %v2358_v20 = vmul.f32 %v2355_v43, %v3984_v27 }
 0x324   :  { %v1979_v21 = vpop.permute.xlu1 %1978  ;;  %v1999_v38 = vpop.permute.xlu0 %1998 }
 0x325   :  { %v1987_v1 = vadd.f32 %v1979_v21, %v1961_v25  ;;  %v2010_v59 = vadd.f32 %v1999_v38, %v1984_v45  ;;  %v2244_v25 = vmul.f32 %v2241_v30, %v3984_v27  ;;  %v2245_v38 = vmul.f32 %v2241_v30, %v3986_v23 }
 0x326   :  { %2484 = vrot.lane.b32.xlu1 %v2475_v37, %s2810_s5  ;;  %2486 = vrot.lane.b32.xlu0 %v2476_v11, %s2810_s5 }
 0x328   :  { %v2001_v57 = vpop.permute.xlu1 %2000  ;;  %v2003_v35 = vpop.permute.xlu0 %2002 }
 0x329   :  { %v2011_v0 = vadd.f32 %v2001_v57, %v1985_v12  ;;  %v2012_v19 = vadd.f32 %v2003_v35, %v1986_v36 }
 0x32a   :  { %2488 = vrot.lane.b32.xlu1 %v2477_v3, %s2810_s5  ;;  %2338 = vrot.lane.b32.xlu0 %v2330_v24, %s2811_s7  ;;  %s2713_s5 = sld [smem:[#allocation9 + $0x60]] }
 0x32c   :  { %v2005_v48 = vpop.permute.xlu1 %2004  ;;  %v2025_v31 = vpop.permute.xlu0 %2024 }
 0x32d   :  { %v2013_v63 = vadd.f32 %v2005_v48, %v1987_v1  ;;  %v2036_v7 = vadd.f32 %v2025_v31, %v2010_v59  ;;  %v2359_v59 = vmul.f32 %v2355_v43, %v3986_v23  ;;  %v2381_v31 = vstv %s2707_s6 }
 0x32e   :  { %2340 = vrot.lane.b32.xlu1 %v2331_v13, %s2811_s7  ;;  %2342 = vrot.lane.b32.xlu0 %v2332_v61, %s2811_s7  ;;  %v2382_v61 = vmul.f32 %v2381_v31, %v3968_v18  ;;  %v2385_v30 = vmul.f32 %v2381_v31, %v3986_v23 }
 0x330   :  { %v2027_v6 = vpop.permute.xlu1 %2026  ;;  %v2029_v51 = vpop.permute.xlu0 %2028  ;;  %v2525_v21 = vstv %s2713_s5 }
 0x331   :  { %v2037_v47 = vadd.f32 %v2027_v6, %v2011_v0  ;;  %v2038_v33 = vadd.f32 %v2029_v51, %v2012_v19  ;;  %v2526_v54 = vmul.f32 %v2525_v21, %v3988_v44  ;;  %v2527_v24 = vmul.f32 %v2525_v21, %v4001_v46 }
 0x332   :  { %2344 = vrot.lane.b32.xlu1 %v2333_v53, %s2811_s7  ;;  %2508 = vrot.lane.b32.xlu0 %v2500_v41, %s2811_s7  ;;  %v2528_v0 = vmul.f32 %v2525_v21, %v4003_v4  ;;  %v2529_v13 = vmul.f32 %v2525_v21, %v4013_v5  ;;  %v2383_v6 = vmul.f32 %v2381_v31, %v3981_v8 }
 0x333   :  { %v2384_v51 = vmul.f32 %v2381_v31, %v3984_v27 }
 0x334   :  { %v2031_v58 = vpop.permute.xlu1 %2030  ;;  %v2051_v50 = vpop.permute.xlu0 %2050 }
 0x335   :  { %v2039_v15 = vadd.f32 %v2031_v58, %v2013_v63  ;;  %v2062_v17 = vadd.f32 %v2051_v50, %v2036_v7 }
 0x336   :  { %2510 = vrot.lane.b32.xlu1 %v2501_v39, %s2811_s7  ;;  %2512 = vrot.lane.b32.xlu0 %v2502_v55, %s2811_s7 }
 0x337   :  { %v4149_v32 = vadd.f32 %v2242_v26, %v2062_v17 }
 0x338   :  { %v2053_v42 = vpop.permute.xlu1 %2052  ;;  %v2055_v2 = vpop.permute.xlu0 %2054 }
 0x339   :  { %v2063_v60 = vadd.f32 %v2053_v42, %v2037_v47  ;;  %v2064_v34 = vadd.f32 %v2055_v2, %v2038_v33 }
 0x33a   :  { %2514 = vrot.lane.b32.xlu1 %v2503_v49, %s2811_s7  ;;  %2364 = vrot.lane.b32.xlu0 %v2356_v14, %s2812_s9  ;;  %s2714_s7 = sld [smem:[#allocation9 + $0x61]] }
 0x33b   :  { %v4157_v45 = vadd.f32 %v2243_v52, %v2063_v60  ;;  %v4159_v22 = vadd.f32 %v2244_v25, %v2064_v34 }
 0x33c   :  { %v2057_v9 = vpop.permute.xlu1 %2056  ;;  %v2091_v29 = vpop.permute.xlu0 %2090 }
 0x33d   :  { %v2065_v12 = vadd.f32 %v2057_v9, %v2039_v15  ;;  %v2102_v36 = vadd.f32 %v2091_v29, %v4069_v40 }
 0x33e   :  { %2366 = vrot.lane.b32.xlu1 %v2357_v56, %s2812_s9  ;;  %2368 = vrot.lane.b32.xlu0 %v2358_v20, %s2812_s9 }
 0x33f   :  { %v4167_v37 = vadd.f32 %v2245_v38, %v2065_v12 }
 0x340   :  { %v2093_v11 = vpop.permute.xlu1 %2092  ;;  %v2095_v1 = vpop.permute.xlu0 %2094  ;;  %v2551_v47 = vstv %s2714_s7 }
 0x341   :  { %v2103_v57 = vadd.f32 %v2093_v11, %v4085_v62  ;;  %v2104_v40 = vadd.f32 %v2095_v1, %v4087_v16  ;;  %v2552_v58 = vmul.f32 %v2551_v47, %v3988_v44  ;;  %v2553_v55 = vmul.f32 %v2551_v47, %v4001_v46 }
 0x342   :  { %2370 = vrot.lane.b32.xlu1 %v2359_v59, %s2812_s9  ;;  %2534 = vrot.lane.b32.xlu0 %v2526_v54, %s2812_s9  ;;  %v2554_v15 = vmul.f32 %v2551_v47, %v4003_v4  ;;  %v2555_v42 = vmul.f32 %v2551_v47, %v4013_v5 }
 0x344   :  { %v2097_v35 = vpop.permute.xlu1 %2096  ;;  %v2117_v3 = vpop.permute.xlu0 %2116 }
 0x345   :  { %v2105_v19 = vadd.f32 %v2097_v35, %v4103_v10  ;;  %v2128_v48 = vadd.f32 %v2117_v3, %v2102_v36 }
 0x346   :  { %2536 = vrot.lane.b32.xlu1 %v2527_v24, %s2812_s9  ;;  %2538 = vrot.lane.b32.xlu0 %v2528_v0, %s2812_s9 }
 0x348   :  { %v2119_v62 = vpop.permute.xlu1 %2118  ;;  %v2121_v16 = vpop.permute.xlu0 %2120 }
 0x349   :  { %v2129_v63 = vadd.f32 %v2119_v62, %v2103_v57  ;;  %v2130_v7 = vadd.f32 %v2121_v16, %v2104_v40 }
 0x34a   :  { %2540 = vrot.lane.b32.xlu1 %v2529_v13, %s2812_s9  ;;  %2390 = vrot.lane.b32.xlu0 %v2382_v61, %s2813_s11  ;;  %s2708_s9 = sld [smem:[#allocation9 + $0x5b]] }
 0x34c   :  { %v2123_v10 = vpop.permute.xlu1 %2122  ;;  %v2143_v28 = vpop.permute.xlu0 %2142 }
 0x34d   :  { %v2131_v53 = vadd.f32 %v2123_v10, %v2105_v19  ;;  %v2154_v41 = vadd.f32 %v2143_v28, %v2128_v48 }
 0x34e   :  { %2392 = vrot.lane.b32.xlu1 %v2383_v6, %s2813_s11  ;;  %2394 = vrot.lane.b32.xlu0 %v2384_v51, %s2813_s11 }
 0x350   :  { %v2145_v18 = vpop.permute.xlu1 %2144  ;;  %v2147_v33 = vpop.permute.xlu0 %2146  ;;  %v2411_v20 = vstv %s2708_s9 }
 0x351   :  { %v2155_v50 = vadd.f32 %v2145_v18, %v2129_v63  ;;  %v2156_v39 = vadd.f32 %v2147_v33, %v2130_v7  ;;  %v2412_v11 = vmul.f32 %v2411_v20, %v3988_v44  ;;  %v2413_v35 = vmul.f32 %v2411_v20, %v4001_v46 }
 0x352   :  { %2396 = vrot.lane.b32.xlu1 %v2385_v30, %s2813_s11  ;;  %2560 = vrot.lane.b32.xlu0 %v2552_v58, %s2813_s11  ;;  %v2414_v3 = vmul.f32 %v2411_v20, %v4003_v4  ;;  %v2415_v16 = vmul.f32 %v2411_v20, %v4013_v5 }
 0x354   :  { %v2149_v8 = vpop.permute.xlu1 %2148  ;;  %v2169_v27 = vpop.permute.xlu0 %2168 }
 0x355   :  { %v2157_v17 = vadd.f32 %v2149_v8, %v2131_v53  ;;  %v2180_v43 = vadd.f32 %v2169_v27, %v2154_v41 }
 0x356   :  { %2562 = vrot.lane.b32.xlu1 %v2553_v55, %s2813_s11  ;;  %2564 = vrot.lane.b32.xlu0 %v2554_v15, %s2813_s11 }
 0x358   :  { %v2171_v23 = vpop.permute.xlu1 %2170  ;;  %v2173_v26 = vpop.permute.xlu0 %2172 }
 0x359   :  { %v2181_v2 = vadd.f32 %v2171_v23, %v2155_v50  ;;  %v2182_v49 = vadd.f32 %v2173_v26, %v2156_v39 }
 0x35a   :  { %2566 = vrot.lane.b32.xlu1 %v2555_v42, %s2813_s11  ;;  %s2814_s11 = smov [#allocation10]  }
 0x35b   :  { %s2605_s8 = sshll.u32 %s2814_s11, 4  ;;  %s2606_s8 = int_to_ptr.vmem [resolvable:$true] %s2605_s8 }
 0x35c   :  { %v2175_v14 = vpop.permute.xlu1 %2174  ;;  %v2195_v60 = vpop.permute.xlu0 %2194  ;;  %s2773_s10 = scalar_lea.vmem %s2606_s8, 512  ;;  %p2778_p0 = scmp.lt.s32.totalorder %s2606_s8, %s2606_s8 }
 0x35d   :  { %v2183_v34 = vadd.f32 %v2175_v14, %v2157_v17  ;;  %v2206_v52 = vadd.f32 %v2195_v60, %v2180_v43  ;;  %p2774_p13 = scmp.ne.s32.totalorder %s2606_s8, %s2773_s10  ;;  %p2779_p1 = scmp.lt.s32.totalorder %s2773_s10, %s2773_s10 }
 0x35f   :  { %p2780_p2 = por %p2779_p1, %p2778_p0 }
 0x360   :  { %v2197_v25 = vpop.permute.xlu1 %2196  ;;  %v2199_v9 = vpop.permute.xlu0 %2198 }
 0x361   :  { %v2207_v29 = vadd.f32 %v2197_v25, %v2181_v2  ;;  %v2208_v56 = vadd.f32 %v2199_v9, %v2182_v49  ;;  %p2781_p3 = pnand %p2780_p2, %p2774_p13 }
 0x364   :  { %v2201_v12 = vpop.permute.xlu1 %2200  ;;  %v2221_v36 = vpop.permute.xlu0 %2220 }
 0x365   :  { %v2209_v21 = vadd.f32 %v2201_v12, %v2183_v34  ;;  %v2232_v38 = vadd.f32 %v2221_v36, %v2206_v52 }
 0x367   :  { %v2416_v1 = vadd.f32 %v2412_v11, %v2232_v38 }
 0x368   :  { %v2223_v59 = vpop.permute.xlu1 %2222  ;;  %v2225_v54 = vpop.permute.xlu0 %2224 }
 0x369   :  { %v2233_v57 = vadd.f32 %v2223_v59, %v2207_v29  ;;  %v2234_v40 = vadd.f32 %v2225_v54, %v2208_v56 }
 0x36b   :  { %v2417_v24 = vadd.f32 %v2413_v35, %v2233_v57  ;;  %v2418_v0 = vadd.f32 %v2414_v3, %v2234_v40 }
 0x36c   :  { %v2227_v19 = vpop.permute.xlu1 %2226  ;;  %v2261_v48 = vpop.permute.xlu0 %2260 }
 0x36d   :  { %v2235_v31 = vadd.f32 %v2227_v19, %v2209_v21  ;;  %v2272_v62 = vadd.f32 %v2261_v48, %v4149_v32 }
 0x36f   :  { %v2419_v13 = vadd.f32 %v2415_v16, %v2235_v31 }
 0x370   :  { %v2263_v44 = vpop.permute.xlu1 %2262  ;;  %v2265_v61 = vpop.permute.xlu0 %2264 }
 0x371   :  { %v2273_v63 = vadd.f32 %v2263_v44, %v4157_v45  ;;  %v2274_v7 = vadd.f32 %v2265_v61, %v4159_v22 }
 0x374   :  { %v2267_v10 = vpop.permute.xlu1 %2266  ;;  %v2431_v46 = vpop.permute.xlu0 %2430 }
 0x375   :  { %v2275_v4 = vadd.f32 %v2267_v10, %v4167_v37  ;;  %v2442_v28 = vadd.f32 %v2431_v46, %v2416_v1 }
 0x378   :  { %v2433_v6 = vpop.permute.xlu1 %2432  ;;  %v2435_v51 = vpop.permute.xlu0 %2434 }
 0x379   :  { %v2443_v53 = vadd.f32 %v2433_v6, %v2417_v24  ;;  %v2444_v41 = vadd.f32 %v2435_v51, %v2418_v0 }
 0x37c   :  { %v2437_v47 = vpop.permute.xlu1 %2436  ;;  %v2287_v32 = vpop.permute.xlu0 %2286 }
 0x37d   :  { %v2445_v18 = vadd.f32 %v2437_v47, %v2419_v13  ;;  %v2298_v5 = vadd.f32 %v2287_v32, %v2272_v62 }
 0x380   :  { %v2289_v33 = vpop.permute.xlu1 %2288  ;;  %v2291_v30 = vpop.permute.xlu0 %2290 }
 0x381   :  { %v2299_v58 = vadd.f32 %v2289_v33, %v2273_v63  ;;  %v2300_v50 = vadd.f32 %v2291_v30, %v2274_v7 }
 0x384   :  { %v2293_v45 = vpop.permute.xlu1 %2292  ;;  %v2457_v39 = vpop.permute.xlu0 %2456 }
 0x385   :  { %v2301_v22 = vadd.f32 %v2293_v45, %v2275_v4  ;;  %v2468_v54 = vadd.f32 %v2457_v39, %v2442_v28 }
 0x388   :  { %v2459_v8 = vpop.permute.xlu1 %2458  ;;  %v2461_v27 = vpop.permute.xlu0 %2460 }
 0x389   :  { %v2469_v24 = vadd.f32 %v2459_v8, %v2443_v53  ;;  %v2470_v0 = vadd.f32 %v2461_v27, %v2444_v41 }
 0x38c   :  { %v2463_v55 = vpop.permute.xlu1 %2462  ;;  %v2313_v37 = vpop.permute.xlu0 %2312 }
 0x38d   :  { %v2324_v57 = vadd.f32 %v2313_v37, %v2298_v5  ;;  %v2471_v63 = vadd.f32 %v2463_v55, %v2445_v18  ;;  %v4286_v55 = vld [vmem:[#allocation18_spill] sm:$0xff] }
 0x390   :  { %v2315_v15 = vpop.permute.xlu1 %2314  ;;  %v2317_v17 = vpop.permute.xlu0 %2316 }
 0x391   :  { %v2325_v31 = vadd.f32 %v2315_v15, %v2299_v58  ;;  %v2326_v62 = vadd.f32 %v2317_v17, %v2300_v50 }
 0x394   :  { %v2319_v43 = vpop.permute.xlu1 %2318  ;;  %v2483_v23 = vpop.permute.xlu0 %2482 }
 0x395   :  { %v2494_v40 = vadd.f32 %v2483_v23, %v2468_v54  ;;  %v2327_v32 = vadd.f32 %v2319_v43, %v2301_v22 }
 0x398   :  { %v2485_v26 = vpop.permute.xlu1 %2484  ;;  %v2487_v42 = vpop.permute.xlu0 %2486 }
 0x399   :  { %v2495_v16 = vadd.f32 %v2485_v26, %v2469_v24  ;;  %v2496_v13 = vadd.f32 %v2487_v42, %v2470_v0 }
 0x39c   :  { %v2489_v2 = vpop.permute.xlu1 %2488  ;;  %v2339_v49 = vpop.permute.xlu0 %2338 }
 0x39d   :  { %v2350_v19 = vadd.f32 %v2339_v49, %v2324_v57  ;;  %v2497_v53 = vadd.f32 %v2489_v2, %v2471_v63  ;;  %v4287_v49 = vld [vmem:[#allocation19_spill] sm:$0xff] }
 0x3a0   :  { %v2341_v14 = vpop.permute.xlu1 %2340  ;;  %v2343_v60 = vpop.permute.xlu0 %2342 }
 0x3a1   :  { %v2351_v7 = vadd.f32 %v2341_v14, %v2325_v31  ;;  %v2352_v10 = vadd.f32 %v2343_v60, %v2326_v62  ;;  %v4288_v60 = vld [vmem:[#allocation20_spill] sm:$0xff] }
 0x3a4   :  { %v2345_v34 = vpop.permute.xlu1 %2344  ;;  %v2509_v52 = vpop.permute.xlu0 %2508 }
 0x3a5   :  { %v2520_v48 = vadd.f32 %v2509_v52, %v2494_v40  ;;  %v2353_v50 = vadd.f32 %v2345_v34, %v2327_v32 }
 0x3a8   :  { %v2511_v25 = vpop.permute.xlu1 %2510  ;;  %v2513_v9 = vpop.permute.xlu0 %2512 }
 0x3a9   :  { %v2521_v28 = vadd.f32 %v2511_v25, %v2495_v16  ;;  %v2522_v6 = vadd.f32 %v2513_v9, %v2496_v13  ;;  %v4289_v9 = vld [vmem:[#allocation21_spill] sm:$0xff] }
 0x3ac   :  { %v2515_v29 = vpop.permute.xlu1 %2514  ;;  %v2365_v56 = vpop.permute.xlu0 %2364 }
 0x3ad   :  { %v2376_v44 = vadd.f32 %v2365_v56, %v2350_v19  ;;  %v2523_v45 = vadd.f32 %v2515_v29, %v2497_v53 }
 0x3b0   :  { %v2367_v20 = vpop.permute.xlu1 %2366  ;;  %v2369_v12 = vpop.permute.xlu0 %2368 }
 0x3b1   :  { %v2377_v41 = vadd.f32 %v2367_v20, %v2351_v7  ;;  %v2378_v5 = vadd.f32 %v2369_v12, %v2352_v10 }
 0x3b4   :  { %v2371_v36 = vpop.permute.xlu1 %2370  ;;  %v2535_v21 = vpop.permute.xlu0 %2534 }
 0x3b5   :  { %v2546_v61 = vadd.f32 %v2535_v21, %v2520_v48  ;;  %v2379_v23 = vadd.f32 %v2371_v36, %v2353_v50 }
 0x3b8   :  { %v2537_v38 = vpop.permute.xlu1 %2536  ;;  %v2539_v11 = vpop.permute.xlu0 %2538 }
 0x3b9   :  { %v2547_v33 = vadd.f32 %v2537_v38, %v2521_v28  ;;  %v2548_v30 = vadd.f32 %v2539_v11, %v2522_v6 }
 0x3bc   :  { %v2541_v1 = vpop.permute.xlu1 %2540  ;;  %v2391_v59 = vpop.permute.xlu0 %2390 }
 0x3bd   :  { %v2402_v51 = vadd.f32 %v2391_v59, %v2376_v44  ;;  %v2549_v26 = vadd.f32 %v2541_v1, %v2523_v45 }
 0x3c0   :  { %v2393_v35 = vpop.permute.xlu1 %2392  ;;  %v2395_v3 = vpop.permute.xlu0 %2394 }
 0x3c1   :  { %v2403_v39 = vadd.f32 %v2393_v35, %v2377_v41  ;;  %v2404_v27 = vadd.f32 %v2395_v3, %v2378_v5 }
 0x3c4   :  { %v2397_v46 = vpop.permute.xlu1 %2396  ;;  %v2561_v4 = vpop.permute.xlu0 %2560 }
 0x3c5   :  { %v2572_v47 = vadd.f32 %v2561_v4, %v2546_v61  ;;  %v2405_v2 = vadd.f32 %v2397_v46, %v2379_v23 }
 0x3c7   :  { %v2580_v58 = vadd.f32 %v2572_v47, %v2402_v51 }
 0x3c8   :  { %v2563_v8 = vpop.permute.xlu1 %2562  ;;  %v2565_v18 = vpop.permute.xlu0 %2564 }
 0x3c9   :  { %v2584_v37 = vadd.f32 %v2580_v58, %v4286_v55  ;;  %v2573_v15 = vadd.f32 %v2563_v8, %v2547_v33  ;;  %v2574_v17 = vadd.f32 %v2565_v18, %v2548_v30 }
 0x3cb   :  { %2729 = vtanh.f32 %v2584_v37  ;;  %v2581_v22 = vadd.f32 %v2573_v15, %v2403_v39  ;;  %v2582_v43 = vadd.f32 %v2574_v17, %v2404_v27 }
 0x3cc   :  { %v2567_v42 = vpop.permute.xlu1 %2566 }
 0x3cd   :  { %v2585_v14 = vadd.f32 %v2581_v22, %v4287_v49  ;;  %v2586_v34 = vadd.f32 %v2582_v43, %v4288_v60  ;;  %v2575_v52 = vadd.f32 %v2567_v42, %v2549_v26 }
 0x3cf   :  { %2731 = vtanh.f32 %v2585_v14  ;;  %v2583_v25 = vadd.f32 %v2575_v52, %v2405_v2 }
 0x3d0   :  { %2733 = vtanh.f32 %v2586_v34 }
 0x3d1   :  { %v2587_v29 = vadd.f32 %v2583_v25, %v4289_v9 }
 0x3d3   :  { %2735 = vtanh.f32 %v2587_v29 }
 0x3d5   :  { %v2730_v56 = vpop.eup %2729 }
 0x3d6   :  { %v2592_v20 = vadd.f32 1.0, %v2730_v56 }
 0x3d8   :  { %2596 = vst.msk [vmem:[#allocation10] sm:$0xff] %vm43_vm0, %v2592_v20 }
 0x3d9   :  { %v2732_v12 = vpop.eup %2731 }
 0x3da   :  { %v2734_v36 = vpop.eup %2733  ;;  %v2593_v21 = vadd.f32 1.0, %v2732_v12 }
 0x3db   :  { %v2594_v38 = vadd.f32 1.0, %v2734_v36 }
 0x3dc   :  { %2597 = vst.msk [vmem:[#allocation10 + $0x8] sm:$0xff] %vm43_vm0, %v2593_v21 }
 0x3dd   :  { %v2736_v11 = vpop.eup %2735  ;;  %2598 = vst.msk [vmem:[#allocation10 + $0x10] sm:$0xff] %vm43_vm0, %v2594_v38 }
 0x3de   :  { %v2595_v1 = vadd.f32 1.0, %v2736_v11 }
 0x3e0   :  { %2599 = vst.msk [vmem:[#allocation10 + $0x18] sm:$0xff] %vm43_vm0, %v2595_v1 }
 0x3e1   :  { %2784 = shalt.err (!%p2781_p3)
}
 0x3e2   :  { %s2785_s14 = scalar_lea.hbm %s4231_s2, 512 }
 0x3e3   :  { %p2786_p4 = scmp.ne.s32.totalorder %s4231_s2, %s2785_s14  ;;  %p2789_p5 = scmp.lt.u32.totalorder %s2785_s14, %s4231_s2 }
 0x3e5   :  { %p2791_p6 = pnand %p2789_p5, %p2786_p4 }
 0x3e7   :  { %2794 = shalt.err (!%p2791_p6)
}
 0x3e8   :  { %2611 = dma.vmem_to_hbm [thread:$0]  %s2606_s8, 512, %s4231_s2, [#allocation7], %s2802_s1, %s2802_s1, %s2803_s22  }
 0x3e9   :  { %2799 = dma.done.wait [#allocation7], 512  }
 0x3ea   :  { %2800 = vsyncadd [#allocation7], 4294966784 }
 0x3eb   :  { %2615 = vsyncpa [#allocation6], 1 }
 0x3ec   :  { %2616 = vsyncpa [#allocation7], 1 }
 0x3ed   :  { %2617 = vsyncpa [#allocation8], 1 }

</bundles_post_ra>
